<compile_context>
chip_gen: v6e
topology: v6e:2x2x1
jax: 0.10.0
libtpu: 0.0.40
codegen_flags: <defaults>
</compile_context>

<pallas_src>
import functools

import jax
import jax.numpy as jnp
from jax.experimental import pallas as pl
from jax.experimental.pallas import tpu as pltpu


def _vspec():
    return pl.BlockSpec(memory_space=pltpu.MemorySpace.VMEM)


# Actual per-call VMEM footprint here is < 2 MiB; 32 MiB gives headroom and is safely below
# physical VMEM on every generation (64 MiB v7x, 128 MiB v5e/v6e).
_COMPILER_PARAMS = pltpu.CompilerParams(vmem_limit_bytes=32 * 1024 * 1024)


# --------------------------------------------------------------------------------------
# Kernel bodies (whole-array VMEM blocks; shapes are tiny so each call is one invocation).
# --------------------------------------------------------------------------------------

def _pre_fc_kernel(x_ref, w_ref, b_ref, o_ref):
    # Linear + ReLU
    y = jnp.dot(x_ref[...], w_ref[...], preferred_element_type=jnp.float32) + b_ref[...]
    o_ref[...] = jnp.maximum(y, 0.0)


def _gc_layer_kernel(h_ref, ea_ref, src_ref, dst_ref,
                     w1_ref, b1_ref, w2_ref, b2_ref,
                     rootw_ref, rootb_ref, bnscale_ref, bnshift_ref,
                     wi_ref, wh_ref, bi_ref, bh_ref,
                     o_ref):
    """One fused MPNN layer: NNConv(aggr='mean') + folded BN + ReLU + single-step GRU."""
    h = h_ref[...]                                   # (N, F) node features == GRU hidden
    n_nodes, feat = h.shape
    n_edges = ea_ref.shape[0]

    # ---- NNConv edge network: Linear -> ReLU -> Linear.  w_flat never leaves VMEM. ----
    t = jnp.dot(ea_ref[...], w1_ref[...], preferred_element_type=jnp.float32) + b1_ref[...]
    t = jnp.maximum(t, 0.0)                                              # (E, dim3)
    # enn2 columns are stored out-major (c = o*F + i) -> no transpose / 3-D reshape needed.
    w_flat = jnp.dot(t, w2_ref[...], preferred_element_type=jnp.float32) + b2_ref[...]  # (E, F*F)

    # ---- gather source-node features x_j with an in-kernel one-hot matmul (MXU) ----
    col = jax.lax.broadcasted_iota(jnp.int32, (n_edges, n_nodes), 1)
    gather = (col == src_ref[...]).astype(jnp.float32)                   # (E, N)
    x_src = jnp.dot(gather, h, preferred_element_type=jnp.float32)       # (E, F)

    # ---- per-edge message x_j @ W_e as one large MXU matmul over a stacked weight slab ----
    # msg[e, o] = sum_i x_src[e, i] * w_flat[e, o*F + i]
    x_rep = jnp.concatenate([x_src] * feat, axis=1)                      # (E, F*F): chunk o = x_src
    prod = x_rep * w_flat                                                # (E, F*F)
    jj = jax.lax.broadcasted_iota(jnp.int32, (feat * feat, feat), 0)
    oo = jax.lax.broadcasted_iota(jnp.int32, (feat * feat, feat), 1)
    blk_sum = jnp.logical_and(jj >= oo * feat, jj < (oo + 1) * feat).astype(jnp.float32)
    msg = jnp.dot(prod, blk_sum, preferred_element_type=jnp.float32)     # (E, F)

    # ---- scatter-mean over incoming edges (normalized one-hot matmul on MXU) ----
    row = jax.lax.broadcasted_iota(jnp.int32, (n_nodes, n_edges), 0)
    scatter = (row == dst_ref[...]).astype(jnp.float32)                  # (N, E)
    deg = jnp.maximum(jnp.sum(scatter, axis=1, keepdims=True), 1.0)      # isolated nodes -> 0
    agg = jnp.dot(scatter, msg, preferred_element_type=jnp.float32) / deg  # (N, F)

    # ---- NNConv root/bias combine + folded inference BatchNorm + ReLU ----
    m = agg + jnp.dot(h, rootw_ref[...], preferred_element_type=jnp.float32) + rootb_ref[...]
    m = jnp.maximum(m * bnscale_ref[...] + bnshift_ref[...], 0.0)
    # F.dropout(p=0.2, training=False) -> identity.

    # ---- single-step GRU (PyTorch gate order r, z, n), per-gate lane-dense matrices ----
    def gates(idx):
        gi = jnp.dot(m, wi_ref[idx], preferred_element_type=jnp.float32) + bi_ref[idx]
        gh = jnp.dot(h, wh_ref[idx], preferred_element_type=jnp.float32) + bh_ref[idx]
        return gi, gh

    gi_r, gh_r = gates(0)
    gi_z, gh_z = gates(1)
    gi_n, gh_n = gates(2)
    r = jax.nn.sigmoid(gi_r + gh_r)
    z = jax.nn.sigmoid(gi_z + gh_z)
    n = jnp.tanh(gi_n + r * gh_n)
    o_ref[...] = (1.0 - z) * n + z * h


def _epilogue_kernel(h_ref, batch_ref, wp_ref, bp_ref, wo_ref, bo_ref, o_ref):
    # global_mean_pool (pool_order='early') + post Linear/ReLU + output head, fused.
    h = h_ref[...]                                   # (N, F)
    n_nodes = h.shape[0]
    n_graphs = o_ref.shape[0]
    row = jax.lax.broadcasted_iota(jnp.int32, (n_graphs, n_nodes), 0)
    pool = (row == batch_ref[...]).astype(jnp.float32)                   # (G, N)
    cnt = jnp.maximum(jnp.sum(pool, axis=1, keepdims=True), 1.0)
    pooled = jnp.dot(pool, h, preferred_element_type=jnp.float32) / cnt  # (G, F)
    p = jnp.dot(pooled, wp_ref[...], preferred_element_type=jnp.float32) + bp_ref[...]
    p = jnp.maximum(p, 0.0)
    o_ref[...] = jnp.dot(p, wo_ref[...], preferred_element_type=jnp.float32) + bo_ref[...]


# --------------------------------------------------------------------------------------
# pallas_call wrappers
# --------------------------------------------------------------------------------------

def pallas_pre_fc(x, w, b):
    return pl.pallas_call(
        _pre_fc_kernel,
        out_shape=jax.ShapeDtypeStruct((x.shape[0], w.shape[1]), jnp.float32),
        in_specs=[_vspec()] * 3, out_specs=_vspec(),
        compiler_params=_COMPILER_PARAMS,
    )(x, w, b)


def pallas_gc_layer(h, edge_attr, src_col, dst_row, layer):
    return pl.pallas_call(
        _gc_layer_kernel,
        out_shape=jax.ShapeDtypeStruct(h.shape, jnp.float32),
        in_specs=[_vspec()] * 16, out_specs=_vspec(),
        compiler_params=_COMPILER_PARAMS,
    )(h, edge_attr, src_col, dst_row,
      layer['enn1_w'], layer['enn1_b'], layer['enn2_w'], layer['enn2_b'],
      layer['root_w'], layer['root_b'], layer['bn_scale'], layer['bn_shift'],
      layer['gru_wi'], layer['gru_wh'], layer['gru_bi'], layer['gru_bh'])


def pallas_epilogue(h, batch_row, wp, bp, wo, bo, num_graphs):
    return pl.pallas_call(
        _epilogue_kernel,
        out_shape=jax.ShapeDtypeStruct((num_graphs, wo.shape[1]), jnp.float32),
        in_specs=[_vspec()] * 6, out_specs=_vspec(),
        compiler_params=_COMPILER_PARAMS,
    )(h, batch_row, wp, bp, wo, bo)


# --------------------------------------------------------------------------------------
# deterministic parameter init (matches the torch module's architecture/shapes)
# --------------------------------------------------------------------------------------

def init_params(key, num_features, num_edge_features, dim1, dim2, dim3, output_dim, gc_count):
    keys = iter(jax.random.split(key, 64))

    def dense(in_d, out_d):
        w = 0.1 * jax.random.normal(next(keys), (in_d, out_d), jnp.float32)
        b = 0.1 * jax.random.normal(next(keys), (1, out_d), jnp.float32)
        return w, b

    feat = dim1  # gc_dim (pre_fc_count > 0)
    eps = 1e-5
    # Inference BatchNorm1d with default running stats (mean=0, var=1, gamma=1, beta=0),
    # folded once into a per-feature scale/shift applied inside the fused layer kernel.
    gamma = jnp.ones((1, feat), jnp.float32)
    beta = jnp.zeros((1, feat), jnp.float32)
    mean = jnp.zeros((1, feat), jnp.float32)
    var = jnp.ones((1, feat), jnp.float32)
    bn_scale = gamma * jax.lax.rsqrt(var + eps)
    bn_shift = beta - mean * bn_scale

    pre_w, pre_b = dense(num_features, dim1)
    params = {'pre_w': pre_w, 'pre_b': pre_b, 'gc': []}
    for _ in range(gc_count):
        enn1_w, enn1_b = dense(num_edge_features, dim3)
        # enn2: Linear(dim3, F*F).  Columns stored out-major (c = o*F + i) so the kernel
        # contracts without any transpose/reshape (equivalent architecture under random init).
        enn2_w, enn2_b = dense(dim3, feat * feat)
        params['gc'].append({
            'enn1_w': enn1_w, 'enn1_b': enn1_b,
            'enn2_w': enn2_w, 'enn2_b': enn2_b,
            'root_w': 0.1 * jax.random.normal(next(keys), (feat, feat), jnp.float32),
            'root_b': 0.1 * jax.random.normal(next(keys), (1, feat), jnp.float32),
            'bn_scale': bn_scale, 'bn_shift': bn_shift,
            # GRU(F, F): per-gate (r, z, n) weight matrices, pre-transposed and lane-dense.
            'gru_wi': 0.1 * jax.random.normal(next(keys), (3, feat, feat), jnp.float32),
            'gru_wh': 0.1 * jax.random.normal(next(keys), (3, feat, feat), jnp.float32),
            'gru_bi': 0.1 * jax.random.normal(next(keys), (3, 1, feat), jnp.float32),
            'gru_bh': 0.1 * jax.random.normal(next(keys), (3, 1, feat), jnp.float32),
        })
    post_w, post_b = dense(dim1, dim2)
    out_w, out_b = dense(dim2, output_dim)
    params.update({'post_w': post_w, 'post_b': post_b, 'out_w': out_w, 'out_b': out_b})
    return params


# --------------------------------------------------------------------------------------
# forward pass
# --------------------------------------------------------------------------------------

def mpnn_forward(params, x, edge_index, edge_attr, batch, num_graphs):
    # TODO(synk): for production-size graphs, grid over edge/node tiles (with "parallel"
    # dimension_semantics to use v7x's 2 TensorCores) and replace the in-kernel one-hot
    # matmuls with scalar-prefetched index DMA gather / segment-sum.
    src_col = edge_index[0].astype(jnp.int32).reshape(-1, 1)   # (E, 1)
    dst_row = edge_index[1].astype(jnp.int32).reshape(1, -1)   # (1, E)
    batch_row = batch.astype(jnp.int32).reshape(1, -1)         # (1, N)

    # pre FC: Linear + ReLU; result also initializes the GRU hidden state.
    h = pallas_pre_fc(x, params['pre_w'], params['pre_b'])

    # message-passing layers: one fused kernel per layer, intermediates stay in VMEM.
    for layer in params['gc']:
        h = pallas_gc_layer(h, edge_attr, src_col, dst_row, layer)

    # pool_order='early': global_mean_pool + post FC + output head in one epilogue kernel.
    out = pallas_epilogue(h, batch_row, params['post_w'], params['post_b'],
                          params['out_w'], params['out_b'], num_graphs)
    return out.reshape(-1)  # output_dim == 1 -> .view(-1)


if __name__ == "__main__":
    key = jax.random.PRNGKey(0)
    k_x, k_e, k_p = jax.random.split(key, 3)

    N, NUM_FEAT, NUM_EDGE_FEAT = 8, 8, 4
    DIM1 = DIM2 = DIM3 = 32
    OUTPUT_DIM, GC_COUNT, NUM_GRAPHS = 1, 3, 2

    x = jax.random.normal(k_x, (N, NUM_FEAT), jnp.float32)
    edge_index = jnp.array([[0, 1, 2, 3, 1, 2, 3, 0, 4, 5, 6, 7, 5, 6, 7, 4],
                            [1, 2, 3, 0, 0, 1, 2, 3, 5, 6, 7, 4, 4, 5, 6, 7]], jnp.int32)
    edge_attr = jax.random.normal(k_e, (edge_index.shape[1], NUM_EDGE_FEAT), jnp.float32)
    batch = jnp.array([0, 0, 0, 0, 1, 1, 1, 1], jnp.int32)

    params = init_params(k_p, NUM_FEAT, NUM_EDGE_FEAT, DIM1, DIM2, DIM3, OUTPUT_DIM, GC_COUNT)

    fwd = jax.jit(functools.partial(mpnn_forward, num_graphs=NUM_GRAPHS))
    y = fwd(params, x, edge_index, edge_attr, batch)
    jax.block_until_ready(y)
    assert y.shape == (NUM_GRAPHS,)
    print("KERNEL_OK")
</pallas_src>

<mosaic_0001>
module attributes {stable_mosaic.version = 11 : i64} {
  func.func @_pre_fc_kernel(%arg0: memref<8x8xf32, #tpu.memory_space<vmem>>, %arg1: memref<8x32xf32, #tpu.memory_space<vmem>>, %arg2: memref<1x32xf32, #tpu.memory_space<vmem>>, %arg3: memref<8x32xf32, #tpu.memory_space<vmem>>) attributes {dimension_semantics = [], scalar_prefetch = 0 : i64, scratch_operands = 0 : i64, tpu.core_type = #tpu.core_type<tc>} {
    %c0 = arith.constant 0 : index
    %c0_0 = arith.constant 0 : index
    %0 = vector.load %arg0[%c0, %c0_0] : memref<8x8xf32, #tpu.memory_space<vmem>>, vector<8x8xf32>
    %c0_1 = arith.constant 0 : index
    %c0_2 = arith.constant 0 : index
    %1 = vector.load %arg1[%c0_1, %c0_2] : memref<8x32xf32, #tpu.memory_space<vmem>>, vector<8x32xf32>
    %cst = arith.constant dense<0.000000e+00> : vector<8x32xf32>
    %2 = tpu.matmul %0, %1, %cst {dimension_numbers = #tpu.dot_dimension_numbers<[1], [0], [0], [1], [0, 0, 1, 1], [], []>} : vector<8x8xf32>, vector<8x32xf32>, vector<8x32xf32> -> vector<8x32xf32>
    %c0_3 = arith.constant 0 : index
    %c0_4 = arith.constant 0 : index
    %3 = vector.load %arg2[%c0_3, %c0_4] : memref<1x32xf32, #tpu.memory_space<vmem>>, vector<1x32xf32>
    %4 = vector.broadcast %3 : vector<1x32xf32> to vector<8x32xf32>
    %5 = arith.addf %2, %4 : vector<8x32xf32>
    %cst_5 = arith.constant 0.000000e+00 : f32
    %6 = vector.broadcast %cst_5 : f32 to vector<8x32xf32>
    %7 = arith.maximumf %5, %6 : vector<8x32xf32>
    %c0_6 = arith.constant 0 : index
    %c0_7 = arith.constant 0 : index
    %8 = vector.load %arg3[%c0_6, %c0_7] : memref<8x32xf32, #tpu.memory_space<vmem>>, vector<8x32xf32>
    tpu.vector_store %arg3[%c0_6, %c0_7], %7 {strides = array<i32>} : memref<8x32xf32, #tpu.memory_space<vmem>>, vector<8x32xf32>,
    return
  }
}

module attributes {stable_mosaic.version = 11 : i64} {
  func.func @_gc_layer_kernel(%arg0: memref<8x32xf32, #tpu.memory_space<vmem>>, %arg1: memref<16x4xf32, #tpu.memory_space<vmem>>, %arg2: memref<16x1xi32, #tpu.memory_space<vmem>>, %arg3: memref<1x16xi32, #tpu.memory_space<vmem>>, %arg4: memref<4x32xf32, #tpu.memory_space<vmem>>, %arg5: memref<1x32xf32, #tpu.memory_space<vmem>>, %arg6: memref<32x1024xf32, #tpu.memory_space<vmem>>, %arg7: memref<1x1024xf32, #tpu.memory_space<vmem>>, %arg8: memref<32x32xf32, #tpu.memory_space<vmem>>, %arg9: memref<1x32xf32, #tpu.memory_space<vmem>>, %arg10: memref<1x32xf32, #tpu.memory_space<vmem>>, %arg11: memref<1x32xf32, #tpu.memory_space<vmem>>, %arg12: memref<3x32x32xf32, #tpu.memory_space<vmem>>, %arg13: memref<3x32x32xf32, #tpu.memory_space<vmem>>, %arg14: memref<3x1x32xf32, #tpu.memory_space<vmem>>, %arg15: memref<3x1x32xf32, #tpu.memory_space<vmem>>, %arg16: memref<8x32xf32, #tpu.memory_space<vmem>>) attributes {dimension_semantics = [], scalar_prefetch = 0 : i64, scratch_operands = 0 : i64, tpu.core_type = #tpu.core_type<tc>} {
    %c0 = arith.constant 0 : index
    %c0_0 = arith.constant 0 : index
    %0 = vector.load %arg0[%c0, %c0_0] : memref<8x32xf32, #tpu.memory_space<vmem>>, vector<8x32xf32>
    %c0_1 = arith.constant 0 : index
    %c0_2 = arith.constant 0 : index
    %1 = vector.load %arg1[%c0_1, %c0_2] : memref<16x4xf32, #tpu.memory_space<vmem>>, vector<16x4xf32>
    %c0_3 = arith.constant 0 : index
    %c0_4 = arith.constant 0 : index
    %2 = vector.load %arg4[%c0_3, %c0_4] : memref<4x32xf32, #tpu.memory_space<vmem>>, vector<4x32xf32>
    %cst = arith.constant dense<0.000000e+00> : vector<16x32xf32>
    %3 = tpu.matmul %1, %2, %cst {dimension_numbers = #tpu.dot_dimension_numbers<[1], [0], [0], [1], [0, 0, 1, 1], [], []>} : vector<16x4xf32>, vector<4x32xf32>, vector<16x32xf32> -> vector<16x32xf32>
    %c0_5 = arith.constant 0 : index
    %c0_6 = arith.constant 0 : index
    %4 = vector.load %arg5[%c0_5, %c0_6] : memref<1x32xf32, #tpu.memory_space<vmem>>, vector<1x32xf32>
    %5 = vector.broadcast %4 : vector<1x32xf32> to vector<16x32xf32>
    %6 = arith.addf %3, %5 : vector<16x32xf32>
    %cst_7 = arith.constant 0.000000e+00 : f32
    %7 = vector.broadcast %cst_7 : f32 to vector<16x32xf32>
    %8 = arith.maximumf %6, %7 : vector<16x32xf32>
    %c0_8 = arith.constant 0 : index
    %c0_9 = arith.constant 0 : index
    %9 = vector.load %arg6[%c0_8, %c0_9] : memref<32x1024xf32, #tpu.memory_space<vmem>>, vector<32x1024xf32>
    %cst_10 = arith.constant dense<0.000000e+00> : vector<16x1024xf32>
    %10 = tpu.matmul %8, %9, %cst_10 {dimension_numbers = #tpu.dot_dimension_numbers<[1], [0], [0], [1], [0, 0, 1, 1], [], []>} : vector<16x32xf32>, vector<32x1024xf32>, vector<16x1024xf32> -> vector<16x1024xf32>
    %c0_11 = arith.constant 0 : index
    %c0_12 = arith.constant 0 : index
    %11 = vector.load %arg7[%c0_11, %c0_12] : memref<1x1024xf32, #tpu.memory_space<vmem>>, vector<1x1024xf32>
    %12 = vector.broadcast %11 : vector<1x1024xf32> to vector<16x1024xf32>
    %13 = arith.addf %10, %12 : vector<16x1024xf32>
    %14 = tpu.iota {dimensions = array<i32: 1>} : vector<16x8xi32>
    %c0_13 = arith.constant 0 : index
    %c0_14 = arith.constant 0 : index
    %15 = vector.load %arg2[%c0_13, %c0_14] : memref<16x1xi32, #tpu.memory_space<vmem>>, vector<16x1xi32>
    %16 = vector.broadcast %15 : vector<16x1xi32> to vector<16x8xi32>
    %17 = arith.cmpi eq, %14, %16 : vector<16x8xi32>
    %18 = arith.extui %17 : vector<16x8xi1> to vector<16x8xi32>
    %19 = arith.sitofp %18 : vector<16x8xi32> to vector<16x8xf32>
    %cst_15 = arith.constant dense<0.000000e+00> : vector<16x32xf32>
    %20 = tpu.matmul %19, %0, %cst_15 {dimension_numbers = #tpu.dot_dimension_numbers<[1], [0], [0], [1], [0, 0, 1, 1], [], []>} : vector<16x8xf32>, vector<8x32xf32>, vector<16x32xf32> -> vector<16x32xf32>
    %21 = tpu.concatenate %20, %20, %20, %20, %20, %20, %20, %20, %20, %20, %20, %20, %20, %20, %20, %20 in 1 : vector<16x32xf32>, vector<16x32xf32>, vector<16x32xf32>, vector<16x32xf32>, vector<16x32xf32>, vector<16x32xf32>, vector<16x32xf32>, vector<16x32xf32>, vector<16x32xf32>, vector<16x32xf32>, vector<16x32xf32>, vector<16x32xf32>, vector<16x32xf32>, vector<16x32xf32>, vector<16x32xf32>, vector<16x32xf32> -> vector<16x512xf32>
    %22 = tpu.concatenate %20, %20, %20, %20, %20, %20, %20, %20, %20, %20, %20, %20, %20, %20, %20, %20 in 1 : vector<16x32xf32>, vector<16x32xf32>, vector<16x32xf32>, vector<16x32xf32>, vector<16x32xf32>, vector<16x32xf32>, vector<16x32xf32>, vector<16x32xf32>, vector<16x32xf32>, vector<16x32xf32>, vector<16x32xf32>, vector<16x32xf32>, vector<16x32xf32>, vector<16x32xf32>, vector<16x32xf32>, vector<16x32xf32> -> vector<16x512xf32>
    %23 = tpu.concatenate %21, %22 in 1 : vector<16x512xf32>, vector<16x512xf32> -> vector<16x1024xf32>
    %24 = arith.mulf %23, %13 : vector<16x1024xf32>
    %25 = tpu.iota {dimensions = array<i32: 0>} : vector<1024x32xi32>
    %26 = tpu.iota {dimensions = array<i32: 1>} : vector<1024x32xi32>
    %c32_i32 = arith.constant 32 : i32
    %27 = vector.broadcast %c32_i32 : i32 to vector<1024x32xi32>
    %28 = arith.muli %26, %27 : vector<1024x32xi32>
    %29 = arith.cmpi sge, %25, %28 : vector<1024x32xi32>
    %c1_i32 = arith.constant 1 : i32
    %30 = vector.broadcast %c1_i32 : i32 to vector<1024x32xi32>
    %31 = arith.addi %26, %30 : vector<1024x32xi32>
    %c32_i32_16 = arith.constant 32 : i32
    %32 = vector.broadcast %c32_i32_16 : i32 to vector<1024x32xi32>
    %33 = arith.muli %31, %32 : vector<1024x32xi32>
    %34 = arith.cmpi slt, %25, %33 : vector<1024x32xi32>
    %35 = arith.andi %29, %34 : vector<1024x32xi1>
    %36 = arith.extui %35 : vector<1024x32xi1> to vector<1024x32xi32>
    %37 = arith.sitofp %36 : vector<1024x32xi32> to vector<1024x32xf32>
    %cst_17 = arith.constant dense<0.000000e+00> : vector<16x32xf32>
    %38 = tpu.matmul %24, %37, %cst_17 {dimension_numbers = #tpu.dot_dimension_numbers<[1], [0], [0], [1], [0, 0, 1, 1], [], []>} : vector<16x1024xf32>, vector<1024x32xf32>, vector<16x32xf32> -> vector<16x32xf32>
    %39 = tpu.iota {dimensions = array<i32: 0>} : vector<8x16xi32>
    %c0_18 = arith.constant 0 : index
    %c0_19 = arith.constant 0 : index
    %40 = vector.load %arg3[%c0_18, %c0_19] : memref<1x16xi32, #tpu.memory_space<vmem>>, vector<1x16xi32>
    %41 = vector.broadcast %40 : vector<1x16xi32> to vector<8x16xi32>
    %42 = arith.cmpi eq, %39, %41 : vector<8x16xi32>
    %43 = arith.extui %42 : vector<8x16xi1> to vector<8x16xi32>
    %44 = arith.sitofp %43 : vector<8x16xi32> to vector<8x16xf32>
    %cst_20 = arith.constant dense<0.000000e+00> : vector<8xf32>
    %45 = vector.multi_reduction <add>, %44, %cst_20 [1] : vector<8x16xf32> to vector<8xf32>
    %46 = vector.shape_cast %45 : vector<8xf32> to vector<8x1xf32>
    %cst_21 = arith.constant 1.000000e+00 : f32
    %47 = vector.broadcast %cst_21 : f32 to vector<8x1xf32>
    %48 = arith.maximumf %46, %47 : vector<8x1xf32>
    %cst_22 = arith.constant dense<0.000000e+00> : vector<8x32xf32>
    %49 = tpu.matmul %44, %38, %cst_22 {dimension_numbers = #tpu.dot_dimension_numbers<[1], [0], [0], [1], [0, 0, 1, 1], [], []>} : vector<8x16xf32>, vector<16x32xf32>, vector<8x32xf32> -> vector<8x32xf32>
    %50 = vector.broadcast %48 : vector<8x1xf32> to vector<8x32xf32>
    %51 = arith.divf %49, %50 : vector<8x32xf32>
    %c0_23 = arith.constant 0 : index
    %c0_24 = arith.constant 0 : index
    %52 = vector.load %arg8[%c0_23, %c0_24] : memref<32x32xf32, #tpu.memory_space<vmem>>, vector<32x32xf32>
    %cst_25 = arith.constant dense<0.000000e+00> : vector<8x32xf32>
    %53 = tpu.matmul %0, %52, %cst_25 {dimension_numbers = #tpu.dot_dimension_numbers<[1], [0], [0], [1], [0, 0, 1, 1], [], []>} : vector<8x32xf32>, vector<32x32xf32>, vector<8x32xf32> -> vector<8x32xf32>
    %54 = arith.addf %51, %53 : vector<8x32xf32>
    %c0_26 = arith.constant 0 : index
    %c0_27 = arith.constant 0 : index
    %55 = vector.load %arg9[%c0_26, %c0_27] : memref<1x32xf32, #tpu.memory_space<vmem>>, vector<1x32xf32>
    %56 = vector.broadcast %55 : vector<1x32xf32> to vector<8x32xf32>
    %57 = arith.addf %54, %56 : vector<8x32xf32>
    %c0_28 = arith.constant 0 : index
    %c0_29 = arith.constant 0 : index
    %58 = vector.load %arg10[%c0_28, %c0_29] : memref<1x32xf32, #tpu.memory_space<vmem>>, vector<1x32xf32>
    %59 = vector.broadcast %58 : vector<1x32xf32> to vector<8x32xf32>
    %60 = arith.mulf %57, %59 : vector<8x32xf32>
    %c0_30 = arith.constant 0 : index
    %c0_31 = arith.constant 0 : index
    %61 = vector.load %arg11[%c0_30, %c0_31] : memref<1x32xf32, #tpu.memory_space<vmem>>, vector<1x32xf32>
    %62 = vector.broadcast %61 : vector<1x32xf32> to vector<8x32xf32>
    %63 = arith.addf %60, %62 : vector<8x32xf32>
    %cst_32 = arith.constant 0.000000e+00 : f32
    %64 = vector.broadcast %cst_32 : f32 to vector<8x32xf32>
    %65 = arith.maximumf %63, %64 : vector<8x32xf32>
    %c0_33 = arith.constant 0 : index
    %c0_34 = arith.constant 0 : index
    %c0_35 = arith.constant 0 : index
    %66 = vector.load %arg12[%c0_33, %c0_34, %c0_35] : memref<3x32x32xf32, #tpu.memory_space<vmem>>, vector<1x32x32xf32>
    %67 = vector.shape_cast %66 : vector<1x32x32xf32> to vector<32x32xf32>
    %cst_36 = arith.constant dense<0.000000e+00> : vector<8x32xf32>
    %68 = tpu.matmul %65, %67, %cst_36 {dimension_numbers = #tpu.dot_dimension_numbers<[1], [0], [0], [1], [0, 0, 1, 1], [], []>} : vector<8x32xf32>, vector<32x32xf32>, vector<8x32xf32> -> vector<8x32xf32>
    %c0_37 = arith.constant 0 : index
    %c0_38 = arith.constant 0 : index
    %c0_39 = arith.constant 0 : index
    %69 = vector.load %arg14[%c0_37, %c0_38, %c0_39] : memref<3x1x32xf32, #tpu.memory_space<vmem>>, vector<1x1x32xf32>
    %70 = vector.shape_cast %69 : vector<1x1x32xf32> to vector<1x32xf32>
    %71 = vector.broadcast %70 : vector<1x32xf32> to vector<8x32xf32>
    %72 = arith.addf %68, %71 : vector<8x32xf32>
    %c0_40 = arith.constant 0 : index
    %c0_41 = arith.constant 0 : index
    %c0_42 = arith.constant 0 : index
    %73 = vector.load %arg13[%c0_40, %c0_41, %c0_42] : memref<3x32x32xf32, #tpu.memory_space<vmem>>, vector<1x32x32xf32>
    %74 = vector.shape_cast %73 : vector<1x32x32xf32> to vector<32x32xf32>
    %cst_43 = arith.constant dense<0.000000e+00> : vector<8x32xf32>
    %75 = tpu.matmul %0, %74, %cst_43 {dimension_numbers = #tpu.dot_dimension_numbers<[1], [0], [0], [1], [0, 0, 1, 1], [], []>} : vector<8x32xf32>, vector<32x32xf32>, vector<8x32xf32> -> vector<8x32xf32>
    %c0_44 = arith.constant 0 : index
    %c0_45 = arith.constant 0 : index
    %c0_46 = arith.constant 0 : index
    %76 = vector.load %arg15[%c0_44, %c0_45, %c0_46] : memref<3x1x32xf32, #tpu.memory_space<vmem>>, vector<1x1x32xf32>
    %77 = vector.shape_cast %76 : vector<1x1x32xf32> to vector<1x32xf32>
    %78 = vector.broadcast %77 : vector<1x32xf32> to vector<8x32xf32>
    %79 = arith.addf %75, %78 : vector<8x32xf32>
    %c1 = arith.constant 1 : index
    %c0_47 = arith.constant 0 : index
    %c0_48 = arith.constant 0 : index
    %80 = vector.load %arg12[%c1, %c0_47, %c0_48] : memref<3x32x32xf32, #tpu.memory_space<vmem>>, vector<1x32x32xf32>
    %81 = vector.shape_cast %80 : vector<1x32x32xf32> to vector<32x32xf32>
    %cst_49 = arith.constant dense<0.000000e+00> : vector<8x32xf32>
    %82 = tpu.matmul %65, %81, %cst_49 {dimension_numbers = #tpu.dot_dimension_numbers<[1], [0], [0], [1], [0, 0, 1, 1], [], []>} : vector<8x32xf32>, vector<32x32xf32>, vector<8x32xf32> -> vector<8x32xf32>
    %c1_50 = arith.constant 1 : index
    %c0_51 = arith.constant 0 : index
    %c0_52 = arith.constant 0 : index
    %83 = vector.load %arg14[%c1_50, %c0_51, %c0_52] : memref<3x1x32xf32, #tpu.memory_space<vmem>>, vector<1x1x32xf32>
    %84 = vector.shape_cast %83 : vector<1x1x32xf32> to vector<1x32xf32>
    %85 = vector.broadcast %84 : vector<1x32xf32> to vector<8x32xf32>
    %86 = arith.addf %82, %85 : vector<8x32xf32>
    %c1_53 = arith.constant 1 : index
    %c0_54 = arith.constant 0 : index
    %c0_55 = arith.constant 0 : index
    %87 = vector.load %arg13[%c1_53, %c0_54, %c0_55] : memref<3x32x32xf32, #tpu.memory_space<vmem>>, vector<1x32x32xf32>
    %88 = vector.shape_cast %87 : vector<1x32x32xf32> to vector<32x32xf32>
    %cst_56 = arith.constant dense<0.000000e+00> : vector<8x32xf32>
    %89 = tpu.matmul %0, %88, %cst_56 {dimension_numbers = #tpu.dot_dimension_numbers<[1], [0], [0], [1], [0, 0, 1, 1], [], []>} : vector<8x32xf32>, vector<32x32xf32>, vector<8x32xf32> -> vector<8x32xf32>
    %c1_57 = arith.constant 1 : index
    %c0_58 = arith.constant 0 : index
    %c0_59 = arith.constant 0 : index
    %90 = vector.load %arg15[%c1_57, %c0_58, %c0_59] : memref<3x1x32xf32, #tpu.memory_space<vmem>>, vector<1x1x32xf32>
    %91 = vector.shape_cast %90 : vector<1x1x32xf32> to vector<1x32xf32>
    %92 = vector.broadcast %91 : vector<1x32xf32> to vector<8x32xf32>
    %93 = arith.addf %89, %92 : vector<8x32xf32>
    %c2 = arith.constant 2 : index
    %c0_60 = arith.constant 0 : index
    %c0_61 = arith.constant 0 : index
    %94 = vector.load %arg12[%c2, %c0_60, %c0_61] : memref<3x32x32xf32, #tpu.memory_space<vmem>>, vector<1x32x32xf32>
    %95 = vector.shape_cast %94 : vector<1x32x32xf32> to vector<32x32xf32>
    %cst_62 = arith.constant dense<0.000000e+00> : vector<8x32xf32>
    %96 = tpu.matmul %65, %95, %cst_62 {dimension_numbers = #tpu.dot_dimension_numbers<[1], [0], [0], [1], [0, 0, 1, 1], [], []>} : vector<8x32xf32>, vector<32x32xf32>, vector<8x32xf32> -> vector<8x32xf32>
    %c2_63 = arith.constant 2 : index
    %c0_64 = arith.constant 0 : index
    %c0_65 = arith.constant 0 : index
    %97 = vector.load %arg14[%c2_63, %c0_64, %c0_65] : memref<3x1x32xf32, #tpu.memory_space<vmem>>, vector<1x1x32xf32>
    %98 = vector.shape_cast %97 : vector<1x1x32xf32> to vector<1x32xf32>
    %99 = vector.broadcast %98 : vector<1x32xf32> to vector<8x32xf32>
    %100 = arith.addf %96, %99 : vector<8x32xf32>
    %c2_66 = arith.constant 2 : index
    %c0_67 = arith.constant 0 : index
    %c0_68 = arith.constant 0 : index
    %101 = vector.load %arg13[%c2_66, %c0_67, %c0_68] : memref<3x32x32xf32, #tpu.memory_space<vmem>>, vector<1x32x32xf32>
    %102 = vector.shape_cast %101 : vector<1x32x32xf32> to vector<32x32xf32>
    %cst_69 = arith.constant dense<0.000000e+00> : vector<8x32xf32>
    %103 = tpu.matmul %0, %102, %cst_69 {dimension_numbers = #tpu.dot_dimension_numbers<[1], [0], [0], [1], [0, 0, 1, 1], [], []>} : vector<8x32xf32>, vector<32x32xf32>, vector<8x32xf32> -> vector<8x32xf32>
    %c2_70 = arith.constant 2 : index
    %c0_71 = arith.constant 0 : index
    %c0_72 = arith.constant 0 : index
    %104 = vector.load %arg15[%c2_70, %c0_71, %c0_72] : memref<3x1x32xf32, #tpu.memory_space<vmem>>, vector<1x1x32xf32>
    %105 = vector.shape_cast %104 : vector<1x1x32xf32> to vector<1x32xf32>
    %106 = vector.broadcast %105 : vector<1x32xf32> to vector<8x32xf32>
    %107 = arith.addf %103, %106 : vector<8x32xf32>
    %108 = arith.addf %72, %79 : vector<8x32xf32>
    %109 = arith.negf %108 : vector<8x32xf32>
    %110 = math.exp %109 : vector<8x32xf32>
    %cst_73 = arith.constant 1.000000e+00 : f32
    %111 = vector.broadcast %cst_73 : f32 to vector<8x32xf32>
    %112 = arith.addf %111, %110 : vector<8x32xf32>
    %113 = arith.divf %111, %112 : vector<8x32xf32>
    %114 = arith.addf %86, %93 : vector<8x32xf32>
    %115 = arith.negf %114 : vector<8x32xf32>
    %116 = math.exp %115 : vector<8x32xf32>
    %cst_74 = arith.constant 1.000000e+00 : f32
    %117 = vector.broadcast %cst_74 : f32 to vector<8x32xf32>
    %118 = arith.addf %117, %116 : vector<8x32xf32>
    %119 = arith.divf %117, %118 : vector<8x32xf32>
    %120 = arith.mulf %113, %107 : vector<8x32xf32>
    %121 = arith.addf %100, %120 : vector<8x32xf32>
    %122 = math.tanh %121 : vector<8x32xf32>
    %cst_75 = arith.constant 1.000000e+00 : f32
    %123 = vector.broadcast %cst_75 : f32 to vector<8x32xf32>
    %124 = arith.subf %123, %119 : vector<8x32xf32>
    %125 = arith.mulf %124, %122 : vector<8x32xf32>
    %126 = arith.mulf %119, %0 : vector<8x32xf32>
    %127 = arith.addf %125, %126 : vector<8x32xf32>
    %c0_76 = arith.constant 0 : index
    %c0_77 = arith.constant 0 : index
    %128 = vector.load %arg16[%c0_76, %c0_77] : memref<8x32xf32, #tpu.memory_space<vmem>>, vector<8x32xf32>
    tpu.vector_store %arg16[%c0_76, %c0_77], %127 {strides = array<i32>} : memref<8x32xf32, #tpu.memory_space<vmem>>, vector<8x32xf32>,
    return
  }
}

module attributes {stable_mosaic.version = 11 : i64} {
  func.func @_gc_layer_kernel(%arg0: memref<8x32xf32, #tpu.memory_space<vmem>>, %arg1: memref<16x4xf32, #tpu.memory_space<vmem>>, %arg2: memref<16x1xi32, #tpu.memory_space<vmem>>, %arg3: memref<1x16xi32, #tpu.memory_space<vmem>>, %arg4: memref<4x32xf32, #tpu.memory_space<vmem>>, %arg5: memref<1x32xf32, #tpu.memory_space<vmem>>, %arg6: memref<32x1024xf32, #tpu.memory_space<vmem>>, %arg7: memref<1x1024xf32, #tpu.memory_space<vmem>>, %arg8: memref<32x32xf32, #tpu.memory_space<vmem>>, %arg9: memref<1x32xf32, #tpu.memory_space<vmem>>, %arg10: memref<1x32xf32, #tpu.memory_space<vmem>>, %arg11: memref<1x32xf32, #tpu.memory_space<vmem>>, %arg12: memref<3x32x32xf32, #tpu.memory_space<vmem>>, %arg13: memref<3x32x32xf32, #tpu.memory_space<vmem>>, %arg14: memref<3x1x32xf32, #tpu.memory_space<vmem>>, %arg15: memref<3x1x32xf32, #tpu.memory_space<vmem>>, %arg16: memref<8x32xf32, #tpu.memory_space<vmem>>) attributes {dimension_semantics = [], scalar_prefetch = 0 : i64, scratch_operands = 0 : i64, tpu.core_type = #tpu.core_type<tc>} {
    %c0 = arith.constant 0 : index
    %c0_0 = arith.constant 0 : index
    %0 = vector.load %arg0[%c0, %c0_0] : memref<8x32xf32, #tpu.memory_space<vmem>>, vector<8x32xf32>
    %c0_1 = arith.constant 0 : index
    %c0_2 = arith.constant 0 : index
    %1 = vector.load %arg1[%c0_1, %c0_2] : memref<16x4xf32, #tpu.memory_space<vmem>>, vector<16x4xf32>
    %c0_3 = arith.constant 0 : index
    %c0_4 = arith.constant 0 : index
    %2 = vector.load %arg4[%c0_3, %c0_4] : memref<4x32xf32, #tpu.memory_space<vmem>>, vector<4x32xf32>
    %cst = arith.constant dense<0.000000e+00> : vector<16x32xf32>
    %3 = tpu.matmul %1, %2, %cst {dimension_numbers = #tpu.dot_dimension_numbers<[1], [0], [0], [1], [0, 0, 1, 1], [], []>} : vector<16x4xf32>, vector<4x32xf32>, vector<16x32xf32> -> vector<16x32xf32>
    %c0_5 = arith.constant 0 : index
    %c0_6 = arith.constant 0 : index
    %4 = vector.load %arg5[%c0_5, %c0_6] : memref<1x32xf32, #tpu.memory_space<vmem>>, vector<1x32xf32>
    %5 = vector.broadcast %4 : vector<1x32xf32> to vector<16x32xf32>
    %6 = arith.addf %3, %5 : vector<16x32xf32>
    %cst_7 = arith.constant 0.000000e+00 : f32
    %7 = vector.broadcast %cst_7 : f32 to vector<16x32xf32>
    %8 = arith.maximumf %6, %7 : vector<16x32xf32>
    %c0_8 = arith.constant 0 : index
    %c0_9 = arith.constant 0 : index
    %9 = vector.load %arg6[%c0_8, %c0_9] : memref<32x1024xf32, #tpu.memory_space<vmem>>, vector<32x1024xf32>
    %cst_10 = arith.constant dense<0.000000e+00> : vector<16x1024xf32>
    %10 = tpu.matmul %8, %9, %cst_10 {dimension_numbers = #tpu.dot_dimension_numbers<[1], [0], [0], [1], [0, 0, 1, 1], [], []>} : vector<16x32xf32>, vector<32x1024xf32>, vector<16x1024xf32> -> vector<16x1024xf32>
    %c0_11 = arith.constant 0 : index
    %c0_12 = arith.constant 0 : index
    %11 = vector.load %arg7[%c0_11, %c0_12] : memref<1x1024xf32, #tpu.memory_space<vmem>>, vector<1x1024xf32>
    %12 = vector.broadcast %11 : vector<1x1024xf32> to vector<16x1024xf32>
    %13 = arith.addf %10, %12 : vector<16x1024xf32>
    %14 = tpu.iota {dimensions = array<i32: 1>} : vector<16x8xi32>
    %c0_13 = arith.constant 0 : index
    %c0_14 = arith.constant 0 : index
    %15 = vector.load %arg2[%c0_13, %c0_14] : memref<16x1xi32, #tpu.memory_space<vmem>>, vector<16x1xi32>
    %16 = vector.broadcast %15 : vector<16x1xi32> to vector<16x8xi32>
    %17 = arith.cmpi eq, %14, %16 : vector<16x8xi32>
    %18 = arith.extui %17 : vector<16x8xi1> to vector<16x8xi32>
    %19 = arith.sitofp %18 : vector<16x8xi32> to vector<16x8xf32>
    %cst_15 = arith.constant dense<0.000000e+00> : vector<16x32xf32>
    %20 = tpu.matmul %19, %0, %cst_15 {dimension_numbers = #tpu.dot_dimension_numbers<[1], [0], [0], [1], [0, 0, 1, 1], [], []>} : vector<16x8xf32>, vector<8x32xf32>, vector<16x32xf32> -> vector<16x32xf32>
    %21 = tpu.concatenate %20, %20, %20, %20, %20, %20, %20, %20, %20, %20, %20, %20, %20, %20, %20, %20 in 1 : vector<16x32xf32>, vector<16x32xf32>, vector<16x32xf32>, vector<16x32xf32>, vector<16x32xf32>, vector<16x32xf32>, vector<16x32xf32>, vector<16x32xf32>, vector<16x32xf32>, vector<16x32xf32>, vector<16x32xf32>, vector<16x32xf32>, vector<16x32xf32>, vector<16x32xf32>, vector<16x32xf32>, vector<16x32xf32> -> vector<16x512xf32>
    %22 = tpu.concatenate %20, %20, %20, %20, %20, %20, %20, %20, %20, %20, %20, %20, %20, %20, %20, %20 in 1 : vector<16x32xf32>, vector<16x32xf32>, vector<16x32xf32>, vector<16x32xf32>, vector<16x32xf32>, vector<16x32xf32>, vector<16x32xf32>, vector<16x32xf32>, vector<16x32xf32>, vector<16x32xf32>, vector<16x32xf32>, vector<16x32xf32>, vector<16x32xf32>, vector<16x32xf32>, vector<16x32xf32>, vector<16x32xf32> -> vector<16x512xf32>
    %23 = tpu.concatenate %21, %22 in 1 : vector<16x512xf32>, vector<16x512xf32> -> vector<16x1024xf32>
    %24 = arith.mulf %23, %13 : vector<16x1024xf32>
    %25 = tpu.iota {dimensions = array<i32: 0>} : vector<1024x32xi32>
    %26 = tpu.iota {dimensions = array<i32: 1>} : vector<1024x32xi32>
    %c32_i32 = arith.constant 32 : i32
    %27 = vector.broadcast %c32_i32 : i32 to vector<1024x32xi32>
    %28 = arith.muli %26, %27 : vector<1024x32xi32>
    %29 = arith.cmpi sge, %25, %28 : vector<1024x32xi32>
    %c1_i32 = arith.constant 1 : i32
    %30 = vector.broadcast %c1_i32 : i32 to vector<1024x32xi32>
    %31 = arith.addi %26, %30 : vector<1024x32xi32>
    %c32_i32_16 = arith.constant 32 : i32
    %32 = vector.broadcast %c32_i32_16 : i32 to vector<1024x32xi32>
    %33 = arith.muli %31, %32 : vector<1024x32xi32>
    %34 = arith.cmpi slt, %25, %33 : vector<1024x32xi32>
    %35 = arith.andi %29, %34 : vector<1024x32xi1>
    %36 = arith.extui %35 : vector<1024x32xi1> to vector<1024x32xi32>
    %37 = arith.sitofp %36 : vector<1024x32xi32> to vector<1024x32xf32>
    %cst_17 = arith.constant dense<0.000000e+00> : vector<16x32xf32>
    %38 = tpu.matmul %24, %37, %cst_17 {dimension_numbers = #tpu.dot_dimension_numbers<[1], [0], [0], [1], [0, 0, 1, 1], [], []>} : vector<16x1024xf32>, vector<1024x32xf32>, vector<16x32xf32> -> vector<16x32xf32>
    %39 = tpu.iota {dimensions = array<i32: 0>} : vector<8x16xi32>
    %c0_18 = arith.constant 0 : index
    %c0_19 = arith.constant 0 : index
    %40 = vector.load %arg3[%c0_18, %c0_19] : memref<1x16xi32, #tpu.memory_space<vmem>>, vector<1x16xi32>
    %41 = vector.broadcast %40 : vector<1x16xi32> to vector<8x16xi32>
    %42 = arith.cmpi eq, %39, %41 : vector<8x16xi32>
    %43 = arith.extui %42 : vector<8x16xi1> to vector<8x16xi32>
    %44 = arith.sitofp %43 : vector<8x16xi32> to vector<8x16xf32>
    %cst_20 = arith.constant dense<0.000000e+00> : vector<8xf32>
    %45 = vector.multi_reduction <add>, %44, %cst_20 [1] : vector<8x16xf32> to vector<8xf32>
    %46 = vector.shape_cast %45 : vector<8xf32> to vector<8x1xf32>
    %cst_21 = arith.constant 1.000000e+00 : f32
    %47 = vector.broadcast %cst_21 : f32 to vector<8x1xf32>
    %48 = arith.maximumf %46, %47 : vector<8x1xf32>
    %cst_22 = arith.constant dense<0.000000e+00> : vector<8x32xf32>
    %49 = tpu.matmul %44, %38, %cst_22 {dimension_numbers = #tpu.dot_dimension_numbers<[1], [0], [0], [1], [0, 0, 1, 1], [], []>} : vector<8x16xf32>, vector<16x32xf32>, vector<8x32xf32> -> vector<8x32xf32>
    %50 = vector.broadcast %48 : vector<8x1xf32> to vector<8x32xf32>
    %51 = arith.divf %49, %50 : vector<8x32xf32>
    %c0_23 = arith.constant 0 : index
    %c0_24 = arith.constant 0 : index
    %52 = vector.load %arg8[%c0_23, %c0_24] : memref<32x32xf32, #tpu.memory_space<vmem>>, vector<32x32xf32>
    %cst_25 = arith.constant dense<0.000000e+00> : vector<8x32xf32>
    %53 = tpu.matmul %0, %52, %cst_25 {dimension_numbers = #tpu.dot_dimension_numbers<[1], [0], [0], [1], [0, 0, 1, 1], [], []>} : vector<8x32xf32>, vector<32x32xf32>, vector<8x32xf32> -> vector<8x32xf32>
    %54 = arith.addf %51, %53 : vector<8x32xf32>
    %c0_26 = arith.constant 0 : index
    %c0_27 = arith.constant 0 : index
    %55 = vector.load %arg9[%c0_26, %c0_27] : memref<1x32xf32, #tpu.memory_space<vmem>>, vector<1x32xf32>
    %56 = vector.broadcast %55 : vector<1x32xf32> to vector<8x32xf32>
    %57 = arith.addf %54, %56 : vector<8x32xf32>
    %c0_28 = arith.constant 0 : index
    %c0_29 = arith.constant 0 : index
    %58 = vector.load %arg10[%c0_28, %c0_29] : memref<1x32xf32, #tpu.memory_space<vmem>>, vector<1x32xf32>
    %59 = vector.broadcast %58 : vector<1x32xf32> to vector<8x32xf32>
    %60 = arith.mulf %57, %59 : vector<8x32xf32>
    %c0_30 = arith.constant 0 : index
    %c0_31 = arith.constant 0 : index
    %61 = vector.load %arg11[%c0_30, %c0_31] : memref<1x32xf32, #tpu.memory_space<vmem>>, vector<1x32xf32>
    %62 = vector.broadcast %61 : vector<1x32xf32> to vector<8x32xf32>
    %63 = arith.addf %60, %62 : vector<8x32xf32>
    %cst_32 = arith.constant 0.000000e+00 : f32
    %64 = vector.broadcast %cst_32 : f32 to vector<8x32xf32>
    %65 = arith.maximumf %63, %64 : vector<8x32xf32>
    %c0_33 = arith.constant 0 : index
    %c0_34 = arith.constant 0 : index
    %c0_35 = arith.constant 0 : index
    %66 = vector.load %arg12[%c0_33, %c0_34, %c0_35] : memref<3x32x32xf32, #tpu.memory_space<vmem>>, vector<1x32x32xf32>
    %67 = vector.shape_cast %66 : vector<1x32x32xf32> to vector<32x32xf32>
    %cst_36 = arith.constant dense<0.000000e+00> : vector<8x32xf32>
    %68 = tpu.matmul %65, %67, %cst_36 {dimension_numbers = #tpu.dot_dimension_numbers<[1], [0], [0], [1], [0, 0, 1, 1], [], []>} : vector<8x32xf32>, vector<32x32xf32>, vector<8x32xf32> -> vector<8x32xf32>
    %c0_37 = arith.constant 0 : index
    %c0_38 = arith.constant 0 : index
    %c0_39 = arith.constant 0 : index
    %69 = vector.load %arg14[%c0_37, %c0_38, %c0_39] : memref<3x1x32xf32, #tpu.memory_space<vmem>>, vector<1x1x32xf32>
    %70 = vector.shape_cast %69 : vector<1x1x32xf32> to vector<1x32xf32>
    %71 = vector.broadcast %70 : vector<1x32xf32> to vector<8x32xf32>
    %72 = arith.addf %68, %71 : vector<8x32xf32>
    %c0_40 = arith.constant 0 : index
    %c0_41 = arith.constant 0 : index
    %c0_42 = arith.constant 0 : index
    %73 = vector.load %arg13[%c0_40, %c0_41, %c0_42] : memref<3x32x32xf32, #tpu.memory_space<vmem>>, vector<1x32x32xf32>
    %74 = vector.shape_cast %73 : vector<1x32x32xf32> to vector<32x32xf32>
    %cst_43 = arith.constant dense<0.000000e+00> : vector<8x32xf32>
    %75 = tpu.matmul %0, %74, %cst_43 {dimension_numbers = #tpu.dot_dimension_numbers<[1], [0], [0], [1], [0, 0, 1, 1], [], []>} : vector<8x32xf32>, vector<32x32xf32>, vector<8x32xf32> -> vector<8x32xf32>
    %c0_44 = arith.constant 0 : index
    %c0_45 = arith.constant 0 : index
    %c0_46 = arith.constant 0 : index
    %76 = vector.load %arg15[%c0_44, %c0_45, %c0_46] : memref<3x1x32xf32, #tpu.memory_space<vmem>>, vector<1x1x32xf32>
    %77 = vector.shape_cast %76 : vector<1x1x32xf32> to vector<1x32xf32>
    %78 = vector.broadcast %77 : vector<1x32xf32> to vector<8x32xf32>
    %79 = arith.addf %75, %78 : vector<8x32xf32>
    %c1 = arith.constant 1 : index
    %c0_47 = arith.constant 0 : index
    %c0_48 = arith.constant 0 : index
    %80 = vector.load %arg12[%c1, %c0_47, %c0_48] : memref<3x32x32xf32, #tpu.memory_space<vmem>>, vector<1x32x32xf32>
    %81 = vector.shape_cast %80 : vector<1x32x32xf32> to vector<32x32xf32>
    %cst_49 = arith.constant dense<0.000000e+00> : vector<8x32xf32>
    %82 = tpu.matmul %65, %81, %cst_49 {dimension_numbers = #tpu.dot_dimension_numbers<[1], [0], [0], [1], [0, 0, 1, 1], [], []>} : vector<8x32xf32>, vector<32x32xf32>, vector<8x32xf32> -> vector<8x32xf32>
    %c1_50 = arith.constant 1 : index
    %c0_51 = arith.constant 0 : index
    %c0_52 = arith.constant 0 : index
    %83 = vector.load %arg14[%c1_50, %c0_51, %c0_52] : memref<3x1x32xf32, #tpu.memory_space<vmem>>, vector<1x1x32xf32>
    %84 = vector.shape_cast %83 : vector<1x1x32xf32> to vector<1x32xf32>
    %85 = vector.broadcast %84 : vector<1x32xf32> to vector<8x32xf32>
    %86 = arith.addf %82, %85 : vector<8x32xf32>
    %c1_53 = arith.constant 1 : index
    %c0_54 = arith.constant 0 : index
    %c0_55 = arith.constant 0 : index
    %87 = vector.load %arg13[%c1_53, %c0_54, %c0_55] : memref<3x32x32xf32, #tpu.memory_space<vmem>>, vector<1x32x32xf32>
    %88 = vector.shape_cast %87 : vector<1x32x32xf32> to vector<32x32xf32>
    %cst_56 = arith.constant dense<0.000000e+00> : vector<8x32xf32>
    %89 = tpu.matmul %0, %88, %cst_56 {dimension_numbers = #tpu.dot_dimension_numbers<[1], [0], [0], [1], [0, 0, 1, 1], [], []>} : vector<8x32xf32>, vector<32x32xf32>, vector<8x32xf32> -> vector<8x32xf32>
    %c1_57 = arith.constant 1 : index
    %c0_58 = arith.constant 0 : index
    %c0_59 = arith.constant 0 : index
    %90 = vector.load %arg15[%c1_57, %c0_58, %c0_59] : memref<3x1x32xf32, #tpu.memory_space<vmem>>, vector<1x1x32xf32>
    %91 = vector.shape_cast %90 : vector<1x1x32xf32> to vector<1x32xf32>
    %92 = vector.broadcast %91 : vector<1x32xf32> to vector<8x32xf32>
    %93 = arith.addf %89, %92 : vector<8x32xf32>
    %c2 = arith.constant 2 : index
    %c0_60 = arith.constant 0 : index
    %c0_61 = arith.constant 0 : index
    %94 = vector.load %arg12[%c2, %c0_60, %c0_61] : memref<3x32x32xf32, #tpu.memory_space<vmem>>, vector<1x32x32xf32>
    %95 = vector.shape_cast %94 : vector<1x32x32xf32> to vector<32x32xf32>
    %cst_62 = arith.constant dense<0.000000e+00> : vector<8x32xf32>
    %96 = tpu.matmul %65, %95, %cst_62 {dimension_numbers = #tpu.dot_dimension_numbers<[1], [0], [0], [1], [0, 0, 1, 1], [], []>} : vector<8x32xf32>, vector<32x32xf32>, vector<8x32xf32> -> vector<8x32xf32>
    %c2_63 = arith.constant 2 : index
    %c0_64 = arith.constant 0 : index
    %c0_65 = arith.constant 0 : index
    %97 = vector.load %arg14[%c2_63, %c0_64, %c0_65] : memref<3x1x32xf32, #tpu.memory_space<vmem>>, vector<1x1x32xf32>
    %98 = vector.shape_cast %97 : vector<1x1x32xf32> to vector<1x32xf32>
    %99 = vector.broadcast %98 : vector<1x32xf32> to vector<8x32xf32>
    %100 = arith.addf %96, %99 : vector<8x32xf32>
    %c2_66 = arith.constant 2 : index
    %c0_67 = arith.constant 0 : index
    %c0_68 = arith.constant 0 : index
    %101 = vector.load %arg13[%c2_66, %c0_67, %c0_68] : memref<3x32x32xf32, #tpu.memory_space<vmem>>, vector<1x32x32xf32>
    %102 = vector.shape_cast %101 : vector<1x32x32xf32> to vector<32x32xf32>
    %cst_69 = arith.constant dense<0.000000e+00> : vector<8x32xf32>
    %103 = tpu.matmul %0, %102, %cst_69 {dimension_numbers = #tpu.dot_dimension_numbers<[1], [0], [0], [1], [0, 0, 1, 1], [], []>} : vector<8x32xf32>, vector<32x32xf32>, vector<8x32xf32> -> vector<8x32xf32>
    %c2_70 = arith.constant 2 : index
    %c0_71 = arith.constant 0 : index
    %c0_72 = arith.constant 0 : index
    %104 = vector.load %arg15[%c2_70, %c0_71, %c0_72] : memref<3x1x32xf32, #tpu.memory_space<vmem>>, vector<1x1x32xf32>
    %105 = vector.shape_cast %104 : vector<1x1x32xf32> to vector<1x32xf32>
    %106 = vector.broadcast %105 : vector<1x32xf32> to vector<8x32xf32>
    %107 = arith.addf %103, %106 : vector<8x32xf32>
    %108 = arith.addf %72, %79 : vector<8x32xf32>
    %109 = arith.negf %108 : vector<8x32xf32>
    %110 = math.exp %109 : vector<8x32xf32>
    %cst_73 = arith.constant 1.000000e+00 : f32
    %111 = vector.broadcast %cst_73 : f32 to vector<8x32xf32>
    %112 = arith.addf %111, %110 : vector<8x32xf32>
    %113 = arith.divf %111, %112 : vector<8x32xf32>
    %114 = arith.addf %86, %93 : vector<8x32xf32>
    %115 = arith.negf %114 : vector<8x32xf32>
    %116 = math.exp %115 : vector<8x32xf32>
    %cst_74 = arith.constant 1.000000e+00 : f32
    %117 = vector.broadcast %cst_74 : f32 to vector<8x32xf32>
    %118 = arith.addf %117, %116 : vector<8x32xf32>
    %119 = arith.divf %117, %118 : vector<8x32xf32>
    %120 = arith.mulf %113, %107 : vector<8x32xf32>
    %121 = arith.addf %100, %120 : vector<8x32xf32>
    %122 = math.tanh %121 : vector<8x32xf32>
    %cst_75 = arith.constant 1.000000e+00 : f32
    %123 = vector.broadcast %cst_75 : f32 to vector<8x32xf32>
    %124 = arith.subf %123, %119 : vector<8x32xf32>
    %125 = arith.mulf %124, %122 : vector<8x32xf32>
    %126 = arith.mulf %119, %0 : vector<8x32xf32>
    %127 = arith.addf %125, %126 : vector<8x32xf32>
    %c0_76 = arith.constant 0 : index
    %c0_77 = arith.constant 0 : index
    %128 = vector.load %arg16[%c0_76, %c0_77] : memref<8x32xf32, #tpu.memory_space<vmem>>, vector<8x32xf32>
    tpu.vector_store %arg16[%c0_76, %c0_77], %127 {strides = array<i32>} : memref<8x32xf32, #tpu.memory_space<vmem>>, vector<8x32xf32>,
    return
  }
}

module attributes {stable_mosaic.version = 11 : i64} {
  func.func @_epilogue_kernel(%arg0: memref<8x32xf32, #tpu.memory_space<vmem>>, %arg1: memref<1x8xi32, #tpu.memory_space<vmem>>, %arg2: memref<32x32xf32, #tpu.memory_space<vmem>>, %arg3: memref<1x32xf32, #tpu.memory_space<vmem>>, %arg4: memref<32x1xf32, #tpu.memory_space<vmem>>, %arg5: memref<1x1xf32, #tpu.memory_space<vmem>>, %arg6: memref<2x1xf32, #tpu.memory_space<vmem>>) attributes {dimension_semantics = [], scalar_prefetch = 0 : i64, scratch_operands = 0 : i64, tpu.core_type = #tpu.core_type<tc>} {
    %c0 = arith.constant 0 : index
    %c0_0 = arith.constant 0 : index
    %0 = vector.load %arg0[%c0, %c0_0] : memref<8x32xf32, #tpu.memory_space<vmem>>, vector<8x32xf32>
    %1 = tpu.iota {dimensions = array<i32: 0>} : vector<2x8xi32>
    %c0_1 = arith.constant 0 : index
    %c0_2 = arith.constant 0 : index
    %2 = vector.load %arg1[%c0_1, %c0_2] : memref<1x8xi32, #tpu.memory_space<vmem>>, vector<1x8xi32>
    %3 = vector.broadcast %2 : vector<1x8xi32> to vector<2x8xi32>
    %4 = arith.cmpi eq, %1, %3 : vector<2x8xi32>
    %5 = arith.extui %4 : vector<2x8xi1> to vector<2x8xi32>
    %6 = arith.sitofp %5 : vector<2x8xi32> to vector<2x8xf32>
    %cst = arith.constant dense<0.000000e+00> : vector<2xf32>
    %7 = vector.multi_reduction <add>, %6, %cst [1] : vector<2x8xf32> to vector<2xf32>
    %8 = vector.shape_cast %7 : vector<2xf32> to vector<2x1xf32>
    %cst_3 = arith.constant 1.000000e+00 : f32
    %9 = vector.broadcast %cst_3 : f32 to vector<2x1xf32>
    %10 = arith.maximumf %8, %9 : vector<2x1xf32>
    %cst_4 = arith.constant dense<0.000000e+00> : vector<2x32xf32>
    %11 = tpu.matmul %6, %0, %cst_4 {dimension_numbers = #tpu.dot_dimension_numbers<[1], [0], [0], [1], [0, 0, 1, 1], [], []>} : vector<2x8xf32>, vector<8x32xf32>, vector<2x32xf32> -> vector<2x32xf32>
    %12 = vector.broadcast %10 : vector<2x1xf32> to vector<2x32xf32>
    %13 = arith.divf %11, %12 : vector<2x32xf32>
    %c0_5 = arith.constant 0 : index
    %c0_6 = arith.constant 0 : index
    %14 = vector.load %arg2[%c0_5, %c0_6] : memref<32x32xf32, #tpu.memory_space<vmem>>, vector<32x32xf32>
    %cst_7 = arith.constant dense<0.000000e+00> : vector<2x32xf32>
    %15 = tpu.matmul %13, %14, %cst_7 {dimension_numbers = #tpu.dot_dimension_numbers<[1], [0], [0], [1], [0, 0, 1, 1], [], []>} : vector<2x32xf32>, vector<32x32xf32>, vector<2x32xf32> -> vector<2x32xf32>
    %c0_8 = arith.constant 0 : index
    %c0_9 = arith.constant 0 : index
    %16 = vector.load %arg3[%c0_8, %c0_9] : memref<1x32xf32, #tpu.memory_space<vmem>>, vector<1x32xf32>
    %17 = vector.broadcast %16 : vector<1x32xf32> to vector<2x32xf32>
    %18 = arith.addf %15, %17 : vector<2x32xf32>
    %cst_10 = arith.constant 0.000000e+00 : f32
    %19 = vector.broadcast %cst_10 : f32 to vector<2x32xf32>
    %20 = arith.maximumf %18, %19 : vector<2x32xf32>
    %c0_11 = arith.constant 0 : index
    %c0_12 = arith.constant 0 : index
    %21 = vector.load %arg4[%c0_11, %c0_12] : memref<32x1xf32, #tpu.memory_space<vmem>>, vector<32x1xf32>
    %cst_13 = arith.constant dense<0.000000e+00> : vector<2x1xf32>
    %22 = tpu.matmul %20, %21, %cst_13 {dimension_numbers = #tpu.dot_dimension_numbers<[1], [0], [0], [1], [0, 0, 1, 1], [], []>} : vector<2x32xf32>, vector<32x1xf32>, vector<2x1xf32> -> vector<2x1xf32>
    %c0_14 = arith.constant 0 : index
    %c0_15 = arith.constant 0 : index
    %23 = vector.load %arg5[%c0_14, %c0_15] : memref<1x1xf32, #tpu.memory_space<vmem>>, vector<1x1xf32>
    %24 = vector.broadcast %23 : vector<1x1xf32> to vector<2x1xf32>
    %25 = arith.addf %22, %24 : vector<2x1xf32>
    %c0_16 = arith.constant 0 : index
    %c0_17 = arith.constant 0 : index
    %26 = vector.load %arg6[%c0_16, %c0_17] : memref<2x1xf32, #tpu.memory_space<vmem>>, vector<2x1xf32>
    tpu.vector_store %arg6[%c0_16, %c0_17], %25 {strides = array<i32>} : memref<2x1xf32, #tpu.memory_space<vmem>>, vector<2x1xf32>,
    return
  }
}

</mosaic_0001>

<bundles_post_ra>
// kernel: mpnn_forward.5
= control target key start
LH: loop header
LB: loop body
LE: loop exit
PB: predicated region body
PF: predicated region fallthrough
CT: control target
= control target key end

     0   :  { %vm23_vm0 = vcmask 64512   ;;  %v115_v0 = vmov 0.0   ;;  %vm116_vm1 = vmmov 0   ;;  %vm98_vm2 = vcmask 261120   ;;  %s149_s1 = inlined_call_operand.vmem [shape: f32[8,32], index: 1, kind: input, shape index: {}]   ;;  %s150_s0 = inlined_call_operand.vmem [shape: f32[8,8], index: 0, kind: input, shape index: {}]   ;;  %s151_s2 = inlined_call_operand.vmem [shape: f32[1,32], index: 2, kind: input, shape index: {}]   ;;  %s152_s3 = inlined_call_operand.vmem [shape: f32[8,32], index: 3, kind: output, shape index: {}]  }
   0x1   :  { %108 = vmatprep.subr.mxu0 %v115_v0  ;;  %v15_v1 = vld [vmem:[%s149_s1] sm:$0xff]  ;;  %110 = vmatprep.mubr.msk.f32.mxu0 %vm116_vm1, %v115_v0 }
   0x2   :  { %v14_v2 = vld [vmem:[%s150_s0] sm:$0xff]  ;;  %109 = vmatpush3.msra.mxu0 %v15_v1 }
   0x3   :  { %111 = vmatmul.mubr.msk.f32.vlgmr.msra.gmra.mxu0 %vm23_vm0, %v14_v2  ;;  %v104_v3 = vld [vmem:[%s151_s2] ss:$0 sm:$0xff] }
  0xc3   :  { %v93_v4 = vpop.f32.mrf.mxu0 }
  0xc4   :  { %v94_v5 = vadd.f32 %v104_v3, %v93_v4 }
  0xc5   :  { %v112_v6 = vpop.f32.mrf.mxu0 }
  0xc6   :  { %v97_v7 = vmax.f32 %v94_v5, 0.0 }
  0xc8   :  { %99 = vst.msk [vmem:[%s152_s3] sm:$0xff] %vm98_vm2, %v97_v7 }

// kernel: mpnn_forward.9
= control target key start
LH: loop header
LB: loop body
LE: loop exit
PB: predicated region body
PF: predicated region fallthrough
CT: control target
= control target key end

     0   :  { %v26_v0 = vlaneseq  ;;  %v343_v1 = vmov 0.0   ;;  %vm344_vm0 = vmmov 0   ;;  %vm41_vm1 = vcmask 64512   ;;  %s421_s0 = inlined_call_operand.vmem [shape: f32[8,32], index: 0, kind: input, shape index: {}]   ;;  %s422_s1 = inlined_call_operand.vmem [shape: s32[1,8], index: 1, kind: input, shape index: {}]   ;;  %s423_s2 = inlined_call_operand.vmem [shape: f32[32,32], index: 2, kind: input, shape index: {}]   ;;  %s424_s4 = inlined_call_operand.vmem [shape: f32[32,1], index: 4, kind: input, shape index: {}]   ;;  %s425_s5 = inlined_call_operand.<no memory space> [shape: f32[1,1], index: 5, kind: input, shape index: {}]   ;;  %s426_s3 = inlined_call_operand.vmem [shape: f32[1,32], index: 3, kind: input, shape index: {}]   ;;  %s427_s6 = inlined_call_operand.vmem [shape: f32[2,1], index: 6, kind: output, shape index: {}]  }
   0x1   :  { %312 = vmatprep.subr.mxu0 %v343_v1  ;;  %v25_v2 = vld [vmem:[%s421_s0] sm:$0xff]  ;;  %314 = vmatprep.mubr.msk.f32.mxu0 %vm344_vm0, %v343_v1  ;;  %vm36_vm2 = vcmask 58368   ;;  %v120_v7 = vld [vmem:[%s423_s2 + $0x18] sm:$0xff]  ;;  %v119_v8 = vld [vmem:[%s423_s2 + $0x10] sm:$0xff]  ;;  %vm128_vm4 = vcmask 261120   ;;  %v11_v21 = vstv %s425_s5  ;;  %vm287_vm5 = vcmask 1024  }
   0x2   :  { %v293_v3 = vld [vmem:[%s422_s1] ss:$0 sm:$0xff]  ;;  %313 = vmatpush3.msra.mxu0 %v25_v2  ;;  %v27_v4 = vshrl.u32 %v26_v0, 7  ;;  %317 = vmatprep.subr.mxu1 %v343_v1  ;;  %v118_v9 = vld [vmem:[%s423_s2 + $0x8] sm:$0xff]  ;;  %v206_v11 = vld [vmem:[%s424_s4 + $0x18] sm:$0xff] }
   0x3   :  { %325 = vmatprep.mubr.msk.f32.mxu1 %vm344_vm0, %v343_v1  ;;  %328 = vmatprep.subr.mxu0 %v343_v1  ;;  %v117_v10 = vld [vmem:[%s423_s2] sm:$0xff]  ;;  %v205_v18 = vld [vmem:[%s424_s4 + $0x10] sm:$0xff]  ;;  %v204_v19 = vld [vmem:[%s424_s4 + $0x8] sm:$0xff]  ;;  %12 = vst [vmem:[#allocation2] sm:$0x1] %v11_v21 }
   0x4   :  { %vm33_vm3 = vcmp.eq.s32.totalorder %v27_v4, %v293_v3  ;;  %318 = vmatpush3.msra.mxu1 %v120_v7  ;;  %v203_v20 = vld [vmem:[%s424_s4] sm:$0xff] }
   0x5   :  { %v294_v5 = vsel %vm33_vm3, 1.0, %v343_v1  ;;  %319 = vmatprep.subr.mxu1 %v343_v1  ;;  %v296_v22 = vld [vmem:[%s426_s3] ss:$0 sm:$0xff] }
   0x6   :  { %315 = vmatmul.mubr.msk.f32.vlgmr.msra.gmra.mxu0 %vm41_vm1, %v294_v5  ;;  %v37_v6 = vsel %vm36_vm2, %v294_v5, 0.0  ;;  %320 = vmatpush3.msra.mxu1 %v119_v8 }
   0x7   :  { %38 = vadd.xlane.f32.xlu0 %v37_v6  ;;  %336 = vmatprep.mubr.msk.f32.mxu0 %vm344_vm0, %v343_v1 }
   0x8   :  { %321 = vmatprep.subr.mxu1 %v343_v1  ;;  %329 = vmatpush3.msra.mxu0 %v206_v11 }
   0x9   :  { %322 = vmatpush3.msra.mxu1 %v118_v9  ;;  %330 = vmatprep.subr.mxu0 %v343_v1 }
   0xa   :  { %323 = vmatprep.subr.mxu1 %v343_v1  ;;  %331 = vmatpush3.msra.mxu0 %v205_v18  ;;  %v298_v27 = vld [vmem:[#allocation2] ss:$0 sm:$0xff] }
   0xb   :  { %324 = vmatpush3.msra.mxu1 %v117_v10  ;;  %332 = vmatprep.subr.mxu0 %v343_v1 }
   0xc   :  { %333 = vmatpush3.msra.mxu0 %v204_v19 }
   0xd   :  { %334 = vmatprep.subr.mxu0 %v343_v1 }
   0xe   :  { %335 = vmatpush3.msra.mxu0 %v203_v20 }
  0x90   :  { %v39_v12 = vpop.xlane.xlu0 %38 }
  0x91   :  { %v40_v13 = vmax.f32 %v39_v12, 1.0 }
  0x93   :  { %341 = vrcp.f32 %v40_v13 }
  0xa0   :  { %v342_v14 = vpop.eup %341 }
  0xc6   :  { %v111_v15 = vpop.f32.mrf.mxu0 }
  0xc7   :  { %v116_v16 = vmul.f32 %v342_v14, %v111_v15 }
  0xc8   :  { %v316_v17 = vpop.f32.mrf.mxu0 }
  0xc9   :  { %326 = vmatmul.mubr.msk.f32.vlgmr.msra.gmra.mxu1 %vm128_vm4, %v116_v16 }
 0x189   :  { %v198_v23 = vpop.f32.mrf.mxu1 }
 0x18a   :  { %v199_v24 = vadd.f32 %v296_v22, %v198_v23 }
 0x18b   :  { %v327_v25 = vpop.f32.mrf.mxu1 }
 0x18c   :  { %v202_v26 = vmax.f32 %v199_v24, 0.0 }
 0x18e   :  { %337 = vmatmul.mubr.msk.f32.vlgmr.msra.gmra.mxu0 %vm128_vm4, %v202_v26 }
 0x24e   :  { %v283_v28 = vpop.f32.mrf.mxu0 }
 0x24f   :  { %v284_v29 = vadd.f32 %v298_v27, %v283_v28 }
 0x250   :  { %v338_v30 = vpop.f32.mrf.mxu0 }
 0x251   :  { %288 = vst.msk [vmem:[%s427_s6] sm:$0x3] %vm287_vm5, %v284_v29 }

// kernel: mpnn_forward.6
= control target key start
LH: loop header
LB: loop body
LE: loop exit
PB: predicated region body
PF: predicated region fallthrough
CT: control target
= control target key end

     0   :  { %s5045_s0 = inlined_call_operand.vmem [shape: f32[8,32], index: 0, kind: input, shape index: {}]   ;;  %s5046_s1 = inlined_call_operand.vmem [shape: f32[16,4], index: 1, kind: input, shape index: {}]   ;;  %s5047_s2 = inlined_call_operand.vmem [shape: s32[16,1], index: 2, kind: input, shape index: {}]   ;;  %s5048_s3 = inlined_call_operand.vmem [shape: s32[1,16], index: 3, kind: input, shape index: {}]   ;;  %s5049_s4 = inlined_call_operand.vmem [shape: f32[4,32], index: 4, kind: input, shape index: {}]   ;;  %s5050_s5 = inlined_call_operand.vmem [shape: f32[1,32], index: 5, kind: input, shape index: {}]   ;;  %s5051_s6 = inlined_call_operand.hbm [shape: f32[32,1024], index: 6, kind: input, shape index: {}]   ;;  %s5052_s7 = inlined_call_operand.vmem [shape: f32[1,1024], index: 7, kind: input, shape index: {}]   ;;  %s5053_s8 = inlined_call_operand.hbm [shape: f32[32,32], index: 8, kind: input, shape index: {}]   ;;  %s5054_s9 = inlined_call_operand.hbm [shape: f32[1,32], index: 9, kind: input, shape index: {}]   ;;  %s5055_s10 = inlined_call_operand.vmem [shape: f32[1,32], index: 10, kind: input, shape index: {}]   ;;  %s5056_s11 = inlined_call_operand.vmem [shape: f32[1,32], index: 11, kind: input, shape index: {}]   ;;  %s5057_s12 = inlined_call_operand.vmem [shape: f32[3,32,32], index: 12, kind: input, shape index: {}]   ;;  %s5058_s13 = inlined_call_operand.hbm [shape: f32[3,32,32], index: 13, kind: input, shape index: {}]   ;;  %s5059_s14 = inlined_call_operand.hbm [shape: f32[3,1,32], index: 14, kind: input, shape index: {}]   ;;  %s5060_s15 = inlined_call_operand.vmem [shape: f32[3,1,32], index: 15, kind: input, shape index: {}]   ;;  %s5061_s16 = inlined_call_operand.vmem [shape: f32[8,32], index: 16, kind: output, shape index: {}]  }
   0x1   :  { %5064 = sst [smem:[#allocation13_spill]] %s5045_s0 }
   0x2   :  { %21 = vsyncpa [#allocation3], 0 }
   0x3   :  { %22 = vsyncpa [#allocation5], 0 }
   0x4   :  { %23 = vsyncpa [#allocation8], 0  ;;  %s3268_s21 = smov [#allocation4]  }
   0x5   :  { %s55_s22 = sshll.u32 %s3268_s21, 4  ;;  %s56_s22 = int_to_ptr.vmem [resolvable:$true] %s55_s22 }
   0x6   :  { %s3170_s23 = scalar_lea.vmem %s56_s22, 512  ;;  %p3175_p1 = scmp.lt.s32.totalorder %s56_s22, %s56_s22 }
   0x7   :  { %p3171_p0 = scmp.ne.s32.totalorder %s56_s22, %s3170_s23  ;;  %p3176_p2 = scmp.lt.s32.totalorder %s3170_s23, %s3170_s23 }
   0x9   :  { %p3177_p3 = por %p3176_p2, %p3175_p1 }
   0xb   :  { %p3178_p4 = pnand %p3177_p3, %p3171_p0 }
   0xd   :  { %3181 = shalt.err (!%p3178_p4)
}
   0xe   :  { %s3269_s24 = smov 128   ;;  %s3270_s25 = smov 8  }
   0xf   :  { %61 = dma.hbm_to_vmem [thread:$0]  %s5053_s8, 512, %s56_s22, [#allocation5], %s3269_s24, %s3269_s24, %s3270_s25  }
  0x10   :  { %s3271_s28 = smov [#allocation7]   ;;  %s3272_s30 = smov [#allocation2]  }
  0x11   :  { %s83_s29 = sshll.u32 %s3271_s28, 4  ;;  %s41_s0 = sshll.u32 %s3272_s30, 4  ;;  %s84_s29 = int_to_ptr.vmem [resolvable:$true] %s83_s29  ;;  %s42_s0 = int_to_ptr.vmem [resolvable:$true] %s41_s0 }
  0x12   :  { %s3190_s17 = scalar_lea.vmem %s84_s29, 1536  ;;  %p3195_p6 = scmp.lt.s32.totalorder %s84_s29, %s84_s29 }
  0x13   :  { %p3191_p5 = scmp.ne.s32.totalorder %s84_s29, %s3190_s17  ;;  %p3196_p7 = scmp.lt.s32.totalorder %s3190_s17, %s3190_s17 }
  0x15   :  { %p3197_p8 = por %p3196_p7, %p3195_p6 }
  0x17   :  { %p3198_p9 = pnand %p3197_p8, %p3191_p5 }
  0x19   :  { %3201 = shalt.err (!%p3198_p9)
}
  0x1a   :  { %89 = dma.hbm_to_vmem [thread:$0]  %s5058_s13, 1536, %s84_s29, [#allocation8], %s3269_s24, %s3269_s24, %s3270_s25  }
  0x1b   :  { %s3210_s20 = scalar_lea.vmem %s42_s0, 4096  ;;  %p3215_p11 = scmp.lt.s32.totalorder %s42_s0, %s42_s0 }
  0x1c   :  { %p3211_p10 = scmp.ne.s32.totalorder %s42_s0, %s3210_s20  ;;  %p3216_p12 = scmp.lt.s32.totalorder %s3210_s20, %s3210_s20 }
  0x1e   :  { %p3217_p13 = por %p3216_p12, %p3215_p11 }
  0x20   :  { %p3218_p0 = pnand %p3217_p13, %p3211_p10 }
  0x22   :  { %3221 = shalt.err (!%p3218_p0)
}
  0x23   :  { %s3273_s8 = smov 1024   ;;  %s3274_s21 = smov 64  }
  0x24   :  { %47 = dma.hbm_to_vmem [thread:$0]  %s5051_s6, 4096, %s42_s0, [#allocation3], %s3273_s8, %s3273_s8, %s3274_s21  }
  0x25   :  { %s3275_s26 = smov [#allocation6]   ;;  %s3276_s28 = smov [#allocation9]  }
  0x26   :  { %s68_s27 = sshll.u32 %s3275_s26, 4  ;;  %s95_s13 = sshll.u32 %s3276_s28, 4  ;;  %s69_s27 = int_to_ptr.vmem [resolvable:$true] %s68_s27  ;;  %s96_s13 = int_to_ptr.vmem [resolvable:$true] %s95_s13 }
  0x27   :  { %s3230_s24 = scalar_lea.vmem %s69_s27, 16  ;;  %s3234_s25 = scalar_lea.vmem %s69_s27, 32 }
  0x28   :  { %p3231_p1 = scmp.ne.s32.totalorder %s69_s27, %s3230_s24  ;;  %p3235_p2 = scmp.lt.s32.totalorder %s69_s27, %s69_s27 }
  0x29   :  { %p3236_p3 = scmp.lt.s32.totalorder %s3234_s25, %s3230_s24 }
  0x2b   :  { %p3237_p4 = por %p3236_p3, %p3235_p2 }
  0x2d   :  { %p3238_p5 = pnand %p3237_p4, %p3231_p1 }
  0x2f   :  { %3241 = shalt.err (!%p3238_p5)
}
  0x30   :  { %71 = dma.hbm_to_vmem [thread:$0]  %s5054_s9, 16, %s69_s27, [#allocation5]  }
  0x31   :  { %s3250_s17 = scalar_lea.vmem %s96_s13, 48  ;;  %s3254_s6 = scalar_lea.vmem %s96_s13, 64 }
  0x32   :  { %p3251_p6 = scmp.ne.s32.totalorder %s96_s13, %s3250_s17  ;;  %p3255_p7 = scmp.lt.s32.totalorder %s96_s13, %s96_s13 }
  0x33   :  { %p3256_p8 = scmp.lt.s32.totalorder %s3254_s6, %s3250_s17 }
  0x35   :  { %p3257_p9 = por %p3256_p8, %p3255_p7 }
  0x37   :  { %p3258_p10 = pnand %p3257_p9, %p3251_p6 }
  0x39   :  { %3261 = shalt.err (!%p3258_p10)
}
  0x3a   :  { %s3277_s0 = smov 16   ;;  %s3278_s18 = smov 1  }
  0x3b   :  { %101 = dma.hbm_to_vmem [thread:$0]  %s5059_s14, 48, %s96_s13, [#allocation8], %s3277_s0, %s3277_s0, %s3278_s18  }
  0x3c   :  { %3262 = dma.done.wait [#allocation3], 4096  }
  0x3d   :  { %3263 = vsyncadd [#allocation3], 4294963200 }
  0x3e   :  { %3264 = dma.done.wait [#allocation5], 528  }
  0x3f   :  { %3265 = vsyncadd [#allocation5], 4294966768 }
  0x40   :  { %3266 = dma.done.wait [#allocation8], 1584  }
  0x41   :  { %3267 = vsyncadd [#allocation8], 4294965712  ;;  %v3279_v0 = vmov 0   ;;  %vm137_vm0 = vcmask 1043456   ;;  %vm130_vm1 = vcmask 31744   ;;  %v120_v2 = vld [vmem:[%s5046_s1] sm:$0xff]  ;;  %v252_v37 = vlaneseq }
  0x42   :  { %3148 = vset.pattern.permute.xlu0 %v3279_v0  ;;  %v122_v1 = vld [vmem:[%s5049_s4] sm:$0xf]  ;;  %v121_v3 = vld [vmem:[%s5046_s1 + $0x8] sm:$0xff]  ;;  %3039 = vmatprep.mubr.msk.f32.mxu0 %vm130_vm1, %v120_v2  ;;  %v245_v6 = vld [vmem:[#allocation2 + $0xd8] sm:$0xff]  ;;  %v3280_v22 = vmov 0.0   ;;  %vm5063_vm2 = vcmask 261120  }
  0x43   :  { %3037 = vmatprep.subr.msk.mxu0 %vm137_vm0, %v122_v1  ;;  %v609_v4 = vld [vmem:[%s5047_s2] sm:$0xff]  ;;  %v243_v5 = vld [vmem:[#allocation2 + $0xc8] sm:$0xff]  ;;  %v244_v9 = vld [vmem:[#allocation2 + $0xd0] sm:$0xff]  ;;  %363 = vmatprep.mubr.f32.mxu1 %v3280_v22  ;;  %v608_v45 = vand.u32 127, %v252_v37  ;;  %s5065_s25 = sld [smem:[#allocation13_spill]]  ;;  %vm623_vm4 = vcmask 64512  }
  0x44   :  { %3038 = vmatpush3.msk.msra.mxu0 %vm137_vm0, %v122_v1  ;;  %612 = vperm.xlu0 %3148, %v609_v4   ;;  %v610_v7 = vld [vmem:[%s5047_s2 + $0x8] sm:$0xff]  ;;  %v242_v8 = vld [vmem:[#allocation2 + $0xc0] sm:$0xff]  ;;  %v237_v11 = vld [vmem:[#allocation2 + $0x98] sm:$0xff]  ;;  %v3425_v54 = vshrl.u32 %v252_v37, 7  ;;  %v3281_v0 = vmov 1.0   ;;  %s3282_s29 = smov 96  }
  0x45   :  { %3040 = vmatmul.mubr.msk.f32.vlgmr.msra.gmra.mxu0 %vm130_vm1, %v121_v3  ;;  %323 = vmatprep.subr.mxu1 %v243_v5  ;;  %v235_v10 = vld [vmem:[#allocation2 + $0x88] sm:$0xff]  ;;  %v234_v12 = vld [vmem:[#allocation2 + $0x80] sm:$0xff]  ;;  %v236_v13 = vld [vmem:[#allocation2 + $0x90] sm:$0xff]  ;;  %v1007_v53 = vadd.s32 1, %v608_v45  ;;  %v3427_v55 = vmul.u32 32, %v608_v45  ;;  %s3283_s30 = smov 32  }
  0x46   :  { %400 = vmatprep.subr.mxu0 %v245_v6  ;;  %324 = vmatpush1.msra.mxu1 %v242_v8  ;;  %v227_v14 = vld [vmem:[#allocation2 + $0x48] sm:$0xff]  ;;  %v229_v15 = vld [vmem:[#allocation2 + $0x58] sm:$0xff]  ;;  %v226_v16 = vld [vmem:[#allocation2 + $0x40] sm:$0xff]  ;;  %v781_v57 = vadd.s32 248, %v3425_v54  ;;  %v813_v58 = vadd.s32 504, %v3425_v54  ;;  %v765_v59 = vadd.s32 120, %v3425_v54 }
  0x47   :  { %401 = vmatpush1.msra.mxu0 %v244_v9  ;;  %325 = vmatprep.subr.mxu1 %v235_v10  ;;  %v228_v17 = vld [vmem:[#allocation2 + $0x50] sm:$0xff]  ;;  %v219_v18 = vld [vmem:[#allocation2 + $0x8] sm:$0xff]  ;;  %v221_v19 = vld [vmem:[#allocation2 + $0x18] sm:$0xff]  ;;  %v3429_v56 = vmul.u32 32, %v1007_v53  ;;  %v797_v60 = vadd.s32 376, %v3425_v54  ;;  %v780_v61 = vadd.s32 240, %v3425_v54 }
  0x48   :  { %615 = vperm.xlu0 %3148, %v610_v7   ;;  %402 = vmatprep.subr.mxu0 %v237_v11  ;;  %v218_v20 = vld [vmem:[#allocation2] sm:$0xff]  ;;  %v220_v21 = vld [vmem:[#allocation2 + $0x10] sm:$0xff]  ;;  %v247_v23 = vld [vmem:[#allocation2 + $0xe8] sm:$0xff]  ;;  %v812_v62 = vadd.s32 496, %v3425_v54  ;;  %v764_v63 = vadd.s32 112, %v3425_v54  ;;  %vm910_vm6 = vcmp.ge.s32.totalorder %v781_v57, %v3427_v55  ;;  %vm942_vm8 = vcmp.ge.s32.totalorder %v813_v58, %v3427_v55 }
  0x49   :  { %326 = vmatpush1.msra.mxu1 %v234_v12  ;;  %403 = vmatpush1.msra.mxu0 %v236_v13  ;;  %v249_v24 = vld [vmem:[#allocation2 + $0xf8] sm:$0xff]  ;;  %v2538_v26 = vld [vmem:[%s5050_s5] ss:$0 sm:$0xff]  ;;  %v248_v31 = vld [vmem:[#allocation2 + $0xf0] sm:$0xff]  ;;  %vm1040_vm7 = vcmp.lt.s32.totalorder %v781_v57, %v3429_v56  ;;  %vm1072_vm9 = vcmp.lt.s32.totalorder %v813_v58, %v3429_v56  ;;  %vm894_vm11 = vcmp.ge.s32.totalorder %v765_v59, %v3427_v55  ;;  %v796_v1 = vadd.s32 368, %v3425_v54 }
  0x4a   :  { %327 = vmatprep.subr.mxu1 %v227_v14  ;;  %404 = vmatprep.subr.mxu0 %v229_v15  ;;  %v246_v30 = vld [vmem:[#allocation2 + $0xe0] sm:$0xff]  ;;  %v239_v33 = vld [vmem:[#allocation2 + $0xa8] sm:$0xff]  ;;  %v241_v34 = vld [vmem:[#allocation2 + $0xb8] sm:$0xff]  ;;  %vm1024_vm12 = vcmp.lt.s32.totalorder %v765_v59, %v3429_v56  ;;  %vm926_vm13 = vcmp.ge.s32.totalorder %v797_v60, %v3427_v55  ;;  %vm1056_vm14 = vcmp.lt.s32.totalorder %v797_v60, %v3429_v56  ;;  %v779_v2 = vadd.s32 232, %v3425_v54 }
  0x4b   :  { %328 = vmatpush1.msra.mxu1 %v226_v16  ;;  %405 = vmatpush1.msra.mxu0 %v228_v17  ;;  %v238_v35 = vld [vmem:[#allocation2 + $0xa0] sm:$0xff]  ;;  %v240_v36 = vld [vmem:[#allocation2 + $0xb0] sm:$0xff]  ;;  %v231_v39 = vld [vmem:[#allocation2 + $0x68] sm:$0xff]  ;;  %vm909_vm0 = vcmp.ge.s32.totalorder %v780_v61, %v3427_v55  ;;  %vm1039_vm1 = vcmp.lt.s32.totalorder %v780_v61, %v3429_v56  ;;  %v811_v3 = vadd.s32 488, %v3425_v54  ;;  %v763_v4 = vadd.s32 104, %v3425_v54 }
  0x4c   :  { %329 = vmatprep.subr.mxu1 %v219_v18  ;;  %406 = vmatprep.subr.mxu0 %v221_v19  ;;  %v233_v40 = vld [vmem:[#allocation2 + $0x78] sm:$0xff]  ;;  %v230_v41 = vld [vmem:[#allocation2 + $0x60] sm:$0xff]  ;;  %v232_v42 = vld [vmem:[#allocation2 + $0x70] sm:$0xff]  ;;  %v795_v5 = vadd.s32 360, %v3425_v54  ;;  %v778_v6 = vadd.s32 224, %v3425_v54  ;;  %v810_v7 = vadd.s32 480, %v3425_v54 }
  0x4d   :  { %330 = vmatpush1.msra.mxu1 %v218_v20  ;;  %407 = vmatpush1.msra.mxu0 %v220_v21  ;;  %v223_v43 = vld [vmem:[#allocation2 + $0x28] sm:$0xff]  ;;  %v225_v44 = vld [vmem:[#allocation2 + $0x38] sm:$0xff]  ;;  %v222_v47 = vld [vmem:[#allocation2 + $0x20] sm:$0xff]  ;;  %v762_v8 = vadd.s32 96, %v3425_v54  ;;  %v794_v9 = vadd.s32 352, %v3425_v54  ;;  %v777_v10 = vadd.s32 216, %v3425_v54 }
  0x4e   :  { %440 = vmatprep.mubr.f32.mxu0 %v3280_v22  ;;  %477 = vmatprep.subr.mxu1 %v247_v23  ;;  %v224_v48 = vld [vmem:[#allocation2 + $0x30] sm:$0xff]  ;;  %v119_v49 = vld [vmem:[%s5065_s25] sm:$0xff]  ;;  %vm1168_vm10 = vmand %vm910_vm6, %vm1040_vm7  ;;  %vm893_vm7 = vcmp.ge.s32.totalorder %v764_v63, %v3427_v55  ;;  %v809_v11 = vadd.s32 472, %v3425_v54  ;;  %v761_v12 = vadd.s32 88, %v3425_v54  ;;  %v793_v13 = vadd.s32 344, %v3425_v54 }
  0x4f   :  { %554 = vmatprep.subr.mxu0 %v249_v24  ;;  %vm1200_vm15 = vmand %vm942_vm8, %vm1072_vm9  ;;  %vm1023_vm8 = vcmp.lt.s32.totalorder %v764_v63, %v3429_v56  ;;  %v776_v14 = vadd.s32 208, %v3425_v54  ;;  %v808_v15 = vadd.s32 464, %v3425_v54  ;;  %v760_v16 = vadd.s32 80, %v3425_v54 }
  0x50   :  { %vm1184_vm6 = vmand %vm926_vm13, %vm1056_vm14  ;;  %vm908_vm13 = vcmp.ge.s32.totalorder %v779_v2, %v3427_v55  ;;  %vm1038_vm14 = vcmp.lt.s32.totalorder %v779_v2, %v3429_v56  ;;  %v792_v17 = vadd.s32 336, %v3425_v54  ;;  %v775_v18 = vadd.s32 200, %v3425_v54 }
  0x51   :  { %vm1167_vm9 = vmand %vm909_vm0, %vm1039_vm1  ;;  %vm940_vm0 = vcmp.ge.s32.totalorder %v811_v3, %v3427_v55  ;;  %vm1070_vm1 = vcmp.lt.s32.totalorder %v811_v3, %v3429_v56  ;;  %v807_v19 = vadd.s32 456, %v3425_v54  ;;  %v759_v20 = vadd.s32 72, %v3425_v54 }
  0x52   :  { %v791_v21 = vadd.s32 328, %v3425_v54  ;;  %v774_v23 = vadd.s32 192, %v3425_v54  ;;  %v806_v24 = vadd.s32 448, %v3425_v54  ;;  %v755_v37 = vadd.s32 40, %v3425_v54 }
  0x53   :  { %v752_v53 = vadd.s32 16, %v3425_v54  ;;  %v784_v57 = vadd.s32 272, %v3425_v54  ;;  %v767_v58 = vadd.s32 136, %v3425_v54  ;;  %v799_v59 = vadd.s32 392, %v3425_v54 }
  0x54   :  { %v751_v63 = vadd.s32 8, %v3425_v54  ;;  %v766_v2 = vadd.s32 128, %v3425_v54  ;;  %v798_v3 = vadd.s32 384, %v3425_v54 }
  0xbf   :  { %v613_v46 = vpop.permute.xlu0 %612 }
  0xc0   :  { %vm617_vm3 = vcmp.eq.s32.totalorder %v608_v45, %v613_v46  ;;  %v769_v46 = vadd.s32 152, %v3425_v54 }
  0xc1   :  { %v2550_v51 = vsel %vm617_vm3, 1.0, %v3280_v22  ;;  %vm1152_vm3 = vmand %vm894_vm11, %vm1024_vm12  ;;  %vm1055_vm11 = vcmp.lt.s32.totalorder %v796_v1, %v3429_v56 }
  0xc3   :  { %v616_v50 = vpop.permute.xlu0 %615 }
  0xc4   :  { %vm618_vm5 = vcmp.eq.s32.totalorder %v608_v45, %v616_v50 }
  0xc5   :  { %v2551_v52 = vsel %vm618_vm5, 1.0, %v3280_v22  ;;  %vm1071_vm5 = vcmp.lt.s32.totalorder %v812_v62, %v3429_v56 }
 0x105   :  { %v3041_v25 = vpop.f32.mrf.mxu0 }
 0x106   :  { %v213_v32 = vadd.f32 %v3041_v25, %v2538_v26  ;;  %v758_v25 = vadd.s32 64, %v3425_v54 }
 0x107   :  { %v207_v27 = vpop.f32.mrf.mxu0 }
 0x108   :  { %v208_v28 = vadd.f32 %v2538_v26, %v207_v27  ;;  %v217_v38 = vmax.f32 %v213_v32, 0.0  ;;  %v790_v26 = vadd.s32 320, %v3425_v54  ;;  %v773_v27 = vadd.s32 184, %v3425_v54 }
 0x109   :  { %v804_v32 = vadd.s32 432, %v3425_v54 }
 0x10a   :  { %v216_v29 = vmax.f32 %v208_v28, 0.0  ;;  %v805_v28 = vadd.s32 440, %v3425_v54 }
 0x10c   :  { %2542 = vmatmul.mubr.msk.f32.vlgmr.msra.gmra.mxu1 %vm5063_vm2, %v216_v29  ;;  %2544 = vmatmul.mubr.msk.f32.vlgmr.msra.gmra.mxu0 %vm5063_vm2, %v216_v29 }
 0x10d   :  { %478 = vmatpush1.msra.mxu1 %v246_v30  ;;  %555 = vmatpush1.msra.mxu0 %v248_v31  ;;  %v789_v30 = vadd.s32 312, %v3425_v54  ;;  %v772_v31 = vadd.s32 176, %v3425_v54 }
 0x10e   :  { %479 = vmatprep.subr.mxu1 %v239_v33  ;;  %556 = vmatprep.subr.mxu0 %v241_v34  ;;  %v756_v33 = vadd.s32 48, %v3425_v54  ;;  %v788_v34 = vadd.s32 304, %v3425_v54 }
 0x10f   :  { %369 = vmatprep.mubr.f32.mxu1 %v3280_v22  ;;  %446 = vmatprep.mubr.f32.mxu0 %v3280_v22 }
 0x110   :  { %480 = vmatpush1.msra.mxu1 %v238_v35  ;;  %557 = vmatpush1.msra.mxu0 %v240_v36  ;;  %v771_v35 = vadd.s32 168, %v3425_v54  ;;  %v803_v36 = vadd.s32 424, %v3425_v54 }
 0x111   :  { %2543 = vmatmul.mubr.msk.f32.gmra.mxu1 %vm5063_vm2, %v217_v38  ;;  %2545 = vmatmul.mubr.msk.f32.gmra.mxu0 %vm5063_vm2, %v217_v38 }
 0x112   :  { %481 = vmatprep.subr.mxu1 %v231_v39  ;;  %558 = vmatprep.subr.mxu0 %v233_v40  ;;  %v770_v39 = vadd.s32 160, %v3425_v54  ;;  %v802_v40 = vadd.s32 416, %v3425_v54 }
 0x113   :  { %482 = vmatpush1.msra.mxu1 %v230_v41  ;;  %559 = vmatpush1.msra.mxu0 %v232_v42  ;;  %v754_v41 = vadd.s32 32, %v3425_v54  ;;  %v786_v42 = vadd.s32 288, %v3425_v54 }
 0x114   :  { %483 = vmatprep.subr.mxu1 %v223_v43  ;;  %560 = vmatprep.subr.mxu0 %v225_v44 }
 0x115   :  { %484 = vmatpush1.msra.mxu1 %v222_v47  ;;  %517 = vmatprep.mubr.f32.mxu1 %v3280_v22  ;;  %v801_v47 = vadd.s32 408, %v3425_v54 }
 0x116   :  { %561 = vmatpush1.msra.mxu0 %v224_v48  ;;  %594 = vmatprep.mubr.f32.mxu0 %v3280_v22  ;;  %v753_v48 = vadd.s32 24, %v3425_v54 }
 0x117   :  { %2546 = vmatmul.mubr.msk.f32.vlgmr.msra.gmra.mxu1 %vm5063_vm2, %v216_v29  ;;  %2548 = vmatmul.mubr.msk.f32.vlgmr.msra.gmra.mxu0 %vm5063_vm2, %v216_v29  ;;  %v757_v29 = vadd.s32 56, %v3425_v54 }
 0x118   :  { %523 = vmatprep.mubr.f32.mxu1 %v3280_v22  ;;  %600 = vmatprep.mubr.f32.mxu0 %v3280_v22 }
 0x119   :  { %3042 = vmatprep.subr.mxu1 %v119_v49  ;;  %2847 = vmatprep.subr.msk.mxu0 %vm1168_vm10, %v3281_v0  ;;  %vm925_vm10 = vcmp.ge.s32.totalorder %v796_v1, %v3427_v55  ;;  %v783_v1 = vadd.s32 264, %v3425_v54 }
 0x11a   :  { %3043 = vmatpush3.msra.mxu1 %v119_v49  ;;  %2848 = vmatpush3.msk.msra.mxu0 %vm1152_vm3, %v3281_v0  ;;  %vm1183_vm3 = vmand %vm925_vm10, %vm1055_vm11  ;;  %vm907_vm10 = vcmp.ge.s32.totalorder %v778_v6, %v3427_v55  ;;  %vm1037_vm11 = vcmp.lt.s32.totalorder %v778_v6, %v3429_v56  ;;  %v785_v49 = vadd.s32 280, %v3425_v54  ;;  %v782_v6 = vadd.s32 256, %v3425_v54 }
 0x11b   :  { %2547 = vmatmul.mubr.msk.f32.gmra.mxu1 %vm5063_vm2, %v217_v38  ;;  %2549 = vmatmul.mubr.msk.f32.gmra.mxu0 %vm5063_vm2, %v217_v38  ;;  %v787_v38 = vadd.s32 296, %v3425_v54  ;;  %vm1013_vm2 = vcmp.lt.s32.totalorder %v754_v41, %v3429_v56 }
 0x11c   :  { %3044 = vmatprep.mubr.msk.f32.mxu1 %vm623_vm4, %v2550_v51  ;;  %2885 = vmatprep.subr.msk.mxu1 %vm1200_vm15, %v3281_v0  ;;  %vm1151_vm15 = vmand %vm893_vm7, %vm1023_vm8  ;;  %vm924_vm7 = vcmp.ge.s32.totalorder %v795_v5, %v3427_v55  ;;  %vm1054_vm8 = vcmp.lt.s32.totalorder %v795_v5, %v3429_v56  ;;  %v768_v51 = vadd.s32 144, %v3425_v54 }
 0x11d   :  { %2849 = vmatprep.subr.msk.mxu0 %vm1167_vm9, %v3281_v0  ;;  %vm1198_vm9 = vmand %vm940_vm0, %vm1070_vm1  ;;  %vm891_vm0 = vcmp.ge.s32.totalorder %v762_v8, %v3427_v55  ;;  %vm1021_vm1 = vcmp.lt.s32.totalorder %v762_v8, %v3429_v56  ;;  %v877_v8 = vadd.s32 1016, %v3425_v54 }
 0x11e   :  { %2850 = vmatpush3.msk.msra.mxu0 %vm1151_vm15, %v3281_v0  ;;  %vm1182_vm15 = vmand %vm924_vm7, %vm1054_vm8  ;;  %vm906_vm7 = vcmp.ge.s32.totalorder %v777_v10, %v3427_v55  ;;  %vm1036_vm8 = vcmp.lt.s32.totalorder %v777_v10, %v3429_v56 }
 0x11f   :  { %3045 = vmatmul.mubr.msk.f32.vlgmr.msra.gmra.mxu1 %vm623_vm4, %v2551_v52  ;;  %vm941_vm4 = vcmp.ge.s32.totalorder %v812_v62, %v3427_v55  ;;  %v800_v52 = vadd.s32 400, %v3425_v54 }
 0x120   :  { %2886 = vmatpush3.msk.msra.mxu1 %vm1184_vm6, %v3281_v0  ;;  %vm1199_vm12 = vmand %vm941_vm4, %vm1071_vm5  ;;  %vm892_vm4 = vcmp.ge.s32.totalorder %v763_v4, %v3427_v55  ;;  %vm1022_vm5 = vcmp.lt.s32.totalorder %v763_v4, %v3429_v56 }
 0x121   :  { %2887 = vmatprep.subr.msk.mxu1 %vm1199_vm12, %v3281_v0  ;;  %vm1166_vm6 = vmand %vm908_vm13, %vm1038_vm14  ;;  %vm939_vm13 = vcmp.ge.s32.totalorder %v810_v7, %v3427_v55  ;;  %vm1069_vm14 = vcmp.lt.s32.totalorder %v810_v7, %v3429_v56  ;;  %v845_v7 = vadd.s32 760, %v3425_v54 }
 0x122   :  { %2888 = vmatpush3.msk.msra.mxu1 %vm1183_vm3, %v3281_v0  ;;  %2851 = vmatprep.subr.msk.mxu0 %vm1166_vm6, %v3281_v0  ;;  %vm1150_vm12 = vmand %vm892_vm4, %vm1022_vm5  ;;  %vm923_vm4 = vcmp.ge.s32.totalorder %v794_v9, %v3427_v55  ;;  %vm1053_vm5 = vcmp.lt.s32.totalorder %v794_v9, %v3429_v56 }
 0x123   :  { %2889 = vmatprep.subr.msk.mxu1 %vm1198_vm9, %v3281_v0  ;;  %2852 = vmatpush3.msk.msra.mxu0 %vm1150_vm12, %v3281_v0  ;;  %vm1165_vm3 = vmand %vm907_vm10, %vm1037_vm11  ;;  %vm938_vm10 = vcmp.ge.s32.totalorder %v809_v11, %v3427_v55  ;;  %vm1068_vm11 = vcmp.lt.s32.totalorder %v809_v11, %v3429_v56 }
 0x124   :  { %2890 = vmatpush3.msk.msra.mxu1 %vm1182_vm15, %v3281_v0  ;;  %2853 = vmatprep.subr.msk.mxu0 %vm1165_vm3, %v3281_v0  ;;  %vm1197_vm6 = vmand %vm939_vm13, %vm1069_vm14  ;;  %vm890_vm13 = vcmp.ge.s32.totalorder %v761_v12, %v3427_v55  ;;  %vm1020_vm14 = vcmp.lt.s32.totalorder %v761_v12, %v3429_v56 }
 0x125   :  { %2891 = vmatprep.subr.msk.mxu1 %vm1197_vm6, %v3281_v0  ;;  %vm1149_vm9 = vmand %vm891_vm0, %vm1021_vm1  ;;  %vm922_vm0 = vcmp.ge.s32.totalorder %v793_v13, %v3427_v55  ;;  %vm1052_vm1 = vcmp.lt.s32.totalorder %v793_v13, %v3429_v56  ;;  %v254_v13 = vsub.s32 0, %v3425_v54 }
 0x126   :  { %2854 = vmatpush3.msk.msra.mxu0 %vm1149_vm9, %v3281_v0  ;;  %vm1181_vm12 = vmand %vm923_vm4, %vm1053_vm5  ;;  %vm905_vm4 = vcmp.ge.s32.totalorder %v776_v14, %v3427_v55  ;;  %vm1035_vm5 = vcmp.lt.s32.totalorder %v776_v14, %v3429_v56  ;;  %v262_v14 = vsub.s32 2, %v3425_v54 }
 0x127   :  { %2892 = vmatpush3.msk.msra.mxu1 %vm1181_vm12, %v3281_v0  ;;  %vm1164_vm15 = vmand %vm906_vm7, %vm1036_vm8  ;;  %vm937_vm7 = vcmp.ge.s32.totalorder %v808_v15, %v3427_v55  ;;  %vm1067_vm8 = vcmp.lt.s32.totalorder %v808_v15, %v3429_v56  ;;  %v3739_v15 = vld [vmem:[%s5052_s7] sm:$0xff] }
 0x128   :  { %2855 = vmatprep.subr.msk.mxu0 %vm1164_vm15, %v3281_v0  ;;  %vm1196_vm3 = vmand %vm938_vm10, %vm1068_vm11  ;;  %vm889_vm10 = vcmp.ge.s32.totalorder %v760_v16, %v3427_v55  ;;  %vm1019_vm11 = vcmp.lt.s32.totalorder %v760_v16, %v3429_v56  ;;  %v258_v16 = vsub.s32 1, %v3425_v54 }
 0x129   :  { %2893 = vmatprep.subr.msk.mxu1 %vm1196_vm3, %v3281_v0  ;;  %vm1148_vm6 = vmand %vm890_vm13, %vm1020_vm14  ;;  %vm921_vm13 = vcmp.ge.s32.totalorder %v792_v17, %v3427_v55  ;;  %vm1051_vm14 = vcmp.lt.s32.totalorder %v792_v17, %v3429_v56  ;;  %v266_v17 = vsub.s32 3, %v3425_v54 }
 0x12a   :  { %2856 = vmatpush3.msk.msra.mxu0 %vm1148_vm6, %v3281_v0  ;;  %vm1180_vm9 = vmand %vm922_vm0, %vm1052_vm1  ;;  %vm904_vm0 = vcmp.ge.s32.totalorder %v775_v18, %v3427_v55  ;;  %vm1034_vm1 = vcmp.lt.s32.totalorder %v775_v18, %v3429_v56 }
 0x12b   :  { %2894 = vmatpush3.msk.msra.mxu1 %vm1180_vm9, %v3281_v0  ;;  %vm1163_vm12 = vmand %vm905_vm4, %vm1035_vm5  ;;  %vm936_vm4 = vcmp.ge.s32.totalorder %v807_v19, %v3427_v55  ;;  %vm1066_vm5 = vcmp.lt.s32.totalorder %v807_v19, %v3429_v56  ;;  %v255_v19 = vrot.slane %v3739_v15, %v254_v13  ;;  %v3952_v13 = vadd.s32 840, %v3425_v54 }
 0x12c   :  { %2857 = vmatprep.subr.msk.mxu0 %vm1163_vm12, %v3281_v0  ;;  %vm1195_vm15 = vmand %vm937_vm7, %vm1067_vm8  ;;  %vm888_vm7 = vcmp.ge.s32.totalorder %v759_v20, %v3427_v55  ;;  %vm1018_vm8 = vcmp.lt.s32.totalorder %v759_v20, %v3429_v56  ;;  %v263_v20 = vrot.slane %v3739_v15, %v262_v14  ;;  %v848_v14 = vadd.s32 784, %v3425_v54 }
 0x12d   :  { %2895 = vmatprep.subr.msk.mxu1 %vm1195_vm15, %v3281_v0  ;;  %vm1147_vm3 = vmand %vm889_vm10, %vm1019_vm11  ;;  %vm920_vm10 = vcmp.ge.s32.totalorder %v791_v21, %v3427_v55  ;;  %vm1050_vm11 = vcmp.lt.s32.totalorder %v791_v21, %v3429_v56  ;;  %v274_v21 = vsub.s32 5, %v3425_v54 }
 0x12e   :  { %2858 = vmatpush3.msk.msra.mxu0 %vm1147_vm3, %v3281_v0  ;;  %vm1179_vm6 = vmand %vm921_vm13, %vm1051_vm14  ;;  %vm903_vm13 = vcmp.ge.s32.totalorder %v774_v23, %v3427_v55  ;;  %vm1033_vm14 = vcmp.lt.s32.totalorder %v774_v23, %v3429_v56  ;;  %v282_v23 = vsub.s32 7, %v3425_v54 }
 0x12f   :  { %2896 = vmatpush3.msk.msra.mxu1 %vm1179_vm6, %v3281_v0  ;;  %vm1162_vm9 = vmand %vm904_vm0, %vm1034_vm1  ;;  %vm935_vm0 = vcmp.ge.s32.totalorder %v806_v24, %v3427_v55  ;;  %vm1065_vm1 = vcmp.lt.s32.totalorder %v806_v24, %v3429_v56  ;;  %v259_v24 = vrot.slane %v3739_v15, %v258_v16  ;;  %v831_v16 = vadd.s32 648, %v3425_v54 }
 0x130   :  { %2859 = vmatprep.subr.msk.mxu0 %vm1162_vm9, %v3281_v0  ;;  %vm1194_vm12 = vmand %vm936_vm4, %vm1066_vm5  ;;  %vm887_vm4 = vcmp.ge.s32.totalorder %v758_v25, %v3427_v55  ;;  %vm1017_vm5 = vcmp.lt.s32.totalorder %v758_v25, %v3429_v56  ;;  %v267_v25 = vrot.slane %v3739_v15, %v266_v17  ;;  %v3983_v17 = vadd.s32 704, %v3425_v54 }
 0x131   :  { %2897 = vmatprep.subr.msk.mxu1 %vm1194_vm12, %v3281_v0  ;;  %vm1146_vm15 = vmand %vm888_vm7, %vm1018_vm8  ;;  %vm919_vm7 = vcmp.ge.s32.totalorder %v790_v26, %v3427_v55  ;;  %vm1049_vm8 = vcmp.lt.s32.totalorder %v790_v26, %v3429_v56 }
 0x132   :  { %2860 = vmatpush3.msk.msra.mxu0 %vm1146_vm15, %v3281_v0  ;;  %vm1178_vm3 = vmand %vm920_vm10, %vm1050_vm11  ;;  %vm902_vm10 = vcmp.ge.s32.totalorder %v773_v27, %v3427_v55  ;;  %vm1032_vm11 = vcmp.lt.s32.totalorder %v773_v27, %v3429_v56 }
 0x133   :  { %2898 = vmatpush3.msk.msra.mxu1 %vm1178_vm3, %v3281_v0  ;;  %vm1161_vm6 = vmand %vm903_vm13, %vm1033_vm14  ;;  %vm934_vm13 = vcmp.ge.s32.totalorder %v805_v28, %v3427_v55  ;;  %vm1064_vm14 = vcmp.lt.s32.totalorder %v805_v28, %v3429_v56 }
 0x134   :  { %2861 = vmatprep.subr.msk.mxu0 %vm1161_vm6, %v3281_v0  ;;  %vm1193_vm9 = vmand %vm935_vm0, %vm1065_vm1  ;;  %vm886_vm0 = vcmp.ge.s32.totalorder %v757_v29, %v3427_v55  ;;  %vm1016_vm1 = vcmp.lt.s32.totalorder %v757_v29, %v3429_v56  ;;  %v3757_v29 = vrot.slane %v3739_v15, %v274_v21  ;;  %v4017_v21 = vadd.s32 576, %v3425_v54 }
 0x135   :  { %2899 = vmatprep.subr.msk.mxu1 %vm1193_vm9, %v3281_v0  ;;  %vm1145_vm12 = vmand %vm887_vm4, %vm1017_vm5  ;;  %vm918_vm4 = vcmp.ge.s32.totalorder %v789_v30, %v3427_v55  ;;  %vm1048_vm5 = vcmp.lt.s32.totalorder %v789_v30, %v3429_v56  ;;  %v3760_v30 = vrot.slane %v3739_v15, %v282_v23  ;;  %v5162_v23 = vmov 0 }
 0x136   :  { %2862 = vmatpush3.msk.msra.mxu0 %vm1145_vm12, %v3281_v0  ;;  %vm1177_vm15 = vmand %vm919_vm7, %vm1049_vm8  ;;  %vm901_vm7 = vcmp.ge.s32.totalorder %v772_v31, %v3427_v55  ;;  %vm1031_vm8 = vcmp.lt.s32.totalorder %v772_v31, %v3429_v56 }
 0x137   :  { %2900 = vmatpush3.msk.msra.mxu1 %vm1177_vm15, %v3281_v0  ;;  %vm1160_vm3 = vmand %vm902_vm10, %vm1032_vm11  ;;  %vm933_vm10 = vcmp.ge.s32.totalorder %v804_v32, %v3427_v55  ;;  %vm1063_vm11 = vcmp.lt.s32.totalorder %v804_v32, %v3429_v56 }
 0x138   :  { %2863 = vmatprep.subr.msk.mxu0 %vm1160_vm3, %v3281_v0  ;;  %vm1192_vm6 = vmand %vm934_vm13, %vm1064_vm14  ;;  %vm885_vm13 = vcmp.ge.s32.totalorder %v756_v33, %v3427_v55  ;;  %vm1015_vm14 = vcmp.lt.s32.totalorder %v756_v33, %v3429_v56 }
 0x139   :  { %2901 = vmatprep.subr.msk.mxu1 %vm1192_vm6, %v3281_v0  ;;  %vm1144_vm9 = vmand %vm886_vm0, %vm1016_vm1  ;;  %vm917_vm0 = vcmp.ge.s32.totalorder %v788_v34, %v3427_v55  ;;  %vm1047_vm1 = vcmp.lt.s32.totalorder %v788_v34, %v3429_v56  ;;  %v3768_v34 = vadd.s32 632, %v3425_v54 }
 0x13a   :  { %2864 = vmatpush3.msk.msra.mxu0 %vm1144_vm9, %v3281_v0  ;;  %vm1176_vm12 = vmand %vm918_vm4, %vm1048_vm5  ;;  %vm900_vm4 = vcmp.ge.s32.totalorder %v771_v35, %v3427_v55  ;;  %vm1030_vm5 = vcmp.lt.s32.totalorder %v771_v35, %v3429_v56  ;;  %v3771_v35 = vadd.s32 888, %v3425_v54 }
 0x13b   :  { %2902 = vmatpush3.msk.msra.mxu1 %vm1176_vm12, %v3281_v0  ;;  %vm1159_vm15 = vmand %vm901_vm7, %vm1031_vm8  ;;  %vm932_vm7 = vcmp.ge.s32.totalorder %v803_v36, %v3427_v55  ;;  %vm1062_vm8 = vcmp.lt.s32.totalorder %v803_v36, %v3429_v56 }
 0x13c   :  { %2865 = vmatprep.subr.msk.mxu0 %vm1159_vm15, %v3281_v0  ;;  %vm1191_vm3 = vmand %vm933_vm10, %vm1063_vm11  ;;  %vm884_vm10 = vcmp.ge.s32.totalorder %v755_v37, %v3427_v55  ;;  %vm1014_vm11 = vcmp.lt.s32.totalorder %v755_v37, %v3429_v56 }
 0x13d   :  { %2903 = vmatprep.subr.msk.mxu1 %vm1191_vm3, %v3281_v0  ;;  %vm1143_vm6 = vmand %vm885_vm13, %vm1015_vm14  ;;  %vm916_vm13 = vcmp.ge.s32.totalorder %v787_v38, %v3427_v55  ;;  %vm1046_vm14 = vcmp.lt.s32.totalorder %v787_v38, %v3429_v56  ;;  %v3779_v38 = vadd.s32 752, %v3425_v54 }
 0x13e   :  { %2866 = vmatpush3.msk.msra.mxu0 %vm1143_vm6, %v3281_v0  ;;  %vm1175_vm9 = vmand %vm917_vm0, %vm1047_vm1  ;;  %vm899_vm0 = vcmp.ge.s32.totalorder %v770_v39, %v3427_v55  ;;  %vm1029_vm1 = vcmp.lt.s32.totalorder %v770_v39, %v3429_v56  ;;  %vm931_vm6 = vcmp.ge.s32.totalorder %v802_v40, %v3427_v55  ;;  %v3782_v39 = vadd.s32 1008, %v3425_v54 }
 0x13f   :  { %2904 = vmatpush3.msk.msra.mxu1 %vm1175_vm9, %v3281_v0  ;;  %vm1158_vm12 = vmand %vm900_vm4, %vm1030_vm5  ;;  %vm1061_vm4 = vcmp.lt.s32.totalorder %v802_v40, %v3429_v56  ;;  %vm883_vm9 = vcmp.ge.s32.totalorder %v754_v41, %v3427_v55 }
 0x140   :  { %2867 = vmatprep.subr.msk.mxu0 %vm1158_vm12, %v3281_v0  ;;  %vm1190_vm15 = vmand %vm932_vm7, %vm1062_vm8  ;;  %vm915_vm8 = vcmp.ge.s32.totalorder %v786_v42, %v3427_v55  ;;  %vm1045_vm12 = vcmp.lt.s32.totalorder %v786_v42, %v3429_v56  ;;  %v3790_v42 = vadd.s32 624, %v3425_v54 }
 0x141   :  { %2905 = vmatprep.subr.msk.mxu1 %vm1190_vm15, %v3281_v0  ;;  %vm1142_vm3 = vmand %vm884_vm10, %vm1014_vm11  ;;  %vm930_vm15 = vcmp.ge.s32.totalorder %v801_v47, %v3427_v55 }
 0x142   :  { %2868 = vmatpush3.msk.msra.mxu0 %vm1142_vm3, %v3281_v0  ;;  %vm1174_vm5 = vmand %vm916_vm13, %vm1046_vm14  ;;  %vm1028_vm14 = vcmp.lt.s32.totalorder %v769_v46, %v3429_v56  ;;  %vm882_vm3 = vcmp.ge.s32.totalorder %v753_v48, %v3427_v55 }
 0x143   :  { %2906 = vmatpush3.msk.msra.mxu1 %vm1174_vm5, %v3281_v0  ;;  %vm1157_vm7 = vmand %vm899_vm0, %vm1029_vm1  ;;  %vm1060_vm0 = vcmp.lt.s32.totalorder %v801_v47, %v3429_v56  ;;  %vm914_vm5 = vcmp.ge.s32.totalorder %v785_v49, %v3427_v55  ;;  %v3806_v47 = vadd.s32 1000, %v3425_v54 }
 0x144   :  { %2869 = vmatprep.subr.msk.mxu0 %vm1157_vm7, %v3281_v0  ;;  %vm1189_vm10 = vmand %vm931_vm6, %vm1061_vm4  ;;  %vm1012_vm6 = vcmp.lt.s32.totalorder %v753_v48, %v3429_v56  ;;  %v3817_v48 = vadd.s32 616, %v3425_v54 }
 0x145   :  { %2907 = vmatprep.subr.msk.mxu1 %vm1189_vm10, %v3281_v0  ;;  %vm1141_vm11 = vmand %vm883_vm9, %vm1013_vm2  ;;  %vm898_vm2 = vcmp.ge.s32.totalorder %v769_v46, %v3427_v55  ;;  %vm1044_vm9 = vcmp.lt.s32.totalorder %v785_v49, %v3429_v56  ;;  %vm1027_vm10 = vcmp.lt.s32.totalorder %v768_v51, %v3429_v56  ;;  %v3803_v46 = vadd.s32 744, %v3425_v54 }
 0x146   :  { %2870 = vmatpush3.msk.msra.mxu0 %vm1141_vm11, %v3281_v0  ;;  %vm1173_vm13 = vmand %vm915_vm8, %vm1045_vm12  ;;  %vm897_vm12 = vcmp.ge.s32.totalorder %v768_v51, %v3427_v55  ;;  %vm929_vm11 = vcmp.ge.s32.totalorder %v800_v52, %v3427_v55  ;;  %v3820_v49 = vadd.s32 872, %v3425_v54  ;;  %v3842_v51 = vadd.s32 992, %v3425_v54 }
 0x147   :  { %2908 = vmatpush3.msk.msra.mxu1 %vm1173_vm13, %v3281_v0  ;;  %vm1156_vm1 = vmand %vm898_vm2, %vm1028_vm14  ;;  %vm1059_vm13 = vcmp.lt.s32.totalorder %v800_v52, %v3429_v56  ;;  %vm881_vm14 = vcmp.ge.s32.totalorder %v752_v53, %v3427_v55  ;;  %v3853_v52 = vadd.s32 608, %v3425_v54 }
 0x148   :  { %2871 = vmatprep.subr.msk.mxu0 %vm1156_vm1, %v3281_v0  ;;  %vm1188_vm4 = vmand %vm930_vm15, %vm1060_vm0  ;;  %vm1011_vm15 = vcmp.lt.s32.totalorder %v752_v53, %v3429_v56  ;;  %vm913_vm1 = vcmp.ge.s32.totalorder %v784_v57, %v3427_v55  ;;  %v3862_v53 = vadd.s32 864, %v3425_v54 }
 0x149   :  { %2909 = vmatprep.subr.msk.mxu1 %vm1188_vm4, %v3281_v0  ;;  %vm1140_vm7 = vmand %vm882_vm3, %vm1012_vm6  ;;  %vm1043_vm3 = vcmp.lt.s32.totalorder %v784_v57, %v3429_v56  ;;  %vm896_vm4 = vcmp.ge.s32.totalorder %v767_v58, %v3427_v55  ;;  %v3869_v57 = vadd.s32 728, %v3425_v54 }
 0x14a   :  { %2872 = vmatpush3.msk.msra.mxu0 %vm1140_vm7, %v3281_v0  ;;  %vm1172_vm8 = vmand %vm914_vm5, %vm1044_vm9  ;;  %vm1026_vm5 = vcmp.lt.s32.totalorder %v767_v58, %v3429_v56  ;;  %vm928_vm7 = vcmp.ge.s32.totalorder %v799_v59, %v3427_v55  ;;  %v3872_v58 = vadd.s32 984, %v3425_v54 }
 0x14b   :  { %2910 = vmatpush3.msk.msra.mxu1 %vm1172_vm8, %v3281_v0  ;;  %vm1155_vm2 = vmand %vm897_vm12, %vm1027_vm10  ;;  %vm1058_vm8 = vcmp.lt.s32.totalorder %v799_v59, %v3429_v56  ;;  %v3881_v59 = vadd.s32 600, %v3425_v54 }
 0x14c   :  { %2873 = vmatprep.subr.msk.mxu0 %vm1155_vm2, %v3281_v0  ;;  %vm1187_vm0 = vmand %vm929_vm11, %vm1059_vm13  ;;  %vm880_vm11 = vcmp.ge.s32.totalorder %v751_v63, %v3427_v55  ;;  %vm1010_vm13 = vcmp.lt.s32.totalorder %v751_v63, %v3429_v56  ;;  %vm912_vm2 = vcmp.ge.s32.totalorder %v783_v1, %v3427_v55  ;;  %v3891_v63 = vadd.s32 720, %v3425_v54 }
 0x14d   :  { %2911 = vmatprep.subr.msk.mxu1 %vm1187_vm0, %v3281_v0  ;;  %vm1139_vm6 = vmand %vm881_vm14, %vm1011_vm15  ;;  %vm1042_vm14 = vcmp.lt.s32.totalorder %v783_v1, %v3429_v56  ;;  %vm895_vm0 = vcmp.ge.s32.totalorder %v766_v2, %v3427_v55  ;;  %v3898_v1 = vadd.s32 976, %v3425_v54 }
 0x14e   :  { %2874 = vmatpush3.msk.msra.mxu0 %vm1139_vm6, %v3281_v0  ;;  %vm1171_vm9 = vmand %vm913_vm1, %vm1043_vm3  ;;  %vm1025_vm1 = vcmp.lt.s32.totalorder %v766_v2, %v3429_v56  ;;  %vm927_vm6 = vcmp.ge.s32.totalorder %v798_v3, %v3427_v55  ;;  %v3901_v2 = vadd.s32 592, %v3425_v54 }
 0x14f   :  { %2912 = vmatpush3.msk.msra.mxu1 %vm1171_vm9, %v3281_v0  ;;  %vm1154_vm12 = vmand %vm896_vm4, %vm1026_vm5  ;;  %vm1057_vm4 = vcmp.lt.s32.totalorder %v798_v3, %v3429_v56  ;;  %vm879_vm5 = vcmp.ge.s32.totalorder %v3425_v54, %v3427_v55  ;;  %vm1009_vm9 = vcmp.lt.s32.totalorder %v3425_v54, %v3429_v56  ;;  %v3912_v3 = vadd.s32 848, %v3425_v54 }
 0x150   :  { %2875 = vmatprep.subr.msk.mxu0 %vm1154_vm12, %v3281_v0  ;;  %vm1186_vm10 = vmand %vm928_vm7, %vm1058_vm8 }
 0x151   :  { %2913 = vmatprep.subr.msk.mxu1 %vm1186_vm10, %v3281_v0  ;;  %vm1138_vm15 = vmand %vm880_vm11, %vm1010_vm13  ;;  %vm911_vm10 = vcmp.ge.s32.totalorder %v782_v6, %v3427_v55  ;;  %vm1041_vm11 = vcmp.lt.s32.totalorder %v782_v6, %v3429_v56  ;;  %vm974_vm13 = vcmp.ge.s32.totalorder %v845_v7, %v3427_v55  ;;  %v3919_v6 = vadd.s32 712, %v3425_v54 }
 0x152   :  { %2876 = vmatpush3.msk.msra.mxu0 %vm1138_vm15, %v3281_v0  ;;  %vm1170_vm3 = vmand %vm912_vm2, %vm1042_vm14  ;;  %vm1104_vm14 = vcmp.lt.s32.totalorder %v845_v7, %v3429_v56  ;;  %vm1006_vm15 = vcmp.ge.s32.totalorder %v877_v8, %v3427_v55  ;;  %v3922_v7 = vadd.s32 968, %v3425_v54 }
 0x153   :  { %2914 = vmatpush3.msk.msra.mxu1 %vm1170_vm3, %v3281_v0  ;;  %vm1153_vm7 = vmand %vm895_vm0, %vm1025_vm1  ;;  %vm1136_vm0 = vcmp.lt.s32.totalorder %v877_v8, %v3429_v56 }
 0x154   :  { %2877 = vmatprep.subr.msk.mxu0 %vm1153_vm7, %v3281_v0  ;;  %vm1185_vm8 = vmand %vm927_vm6, %vm1057_vm4  ;;  %vm958_vm6 = vcmp.ge.s32.totalorder %v3768_v34, %v3427_v55  ;;  %vm1088_vm4 = vcmp.lt.s32.totalorder %v3768_v34, %v3429_v56  ;;  %vm973_vm7 = vcmp.ge.s32.totalorder %v3779_v38, %v3427_v55  ;;  %v5091_v34 = vmov 0 }
 0x155   :  { %vm1137_vm12 = vmand %vm879_vm5, %vm1009_vm9  ;;  %2915 = vmatprep.subr.msk.mxu1 %vm1185_vm8, %v3281_v0  ;;  %vm990_vm5 = vcmp.ge.s32.totalorder %v3771_v35, %v3427_v55  ;;  %vm1120_vm9 = vcmp.lt.s32.totalorder %v3771_v35, %v3429_v56  ;;  %vm1103_vm8 = vcmp.lt.s32.totalorder %v3779_v38, %v3429_v56  ;;  %v5095_v35 = vmov 0 }
 0x156   :  { %2878 = vmatpush3.msk.msra.mxu0 %vm1137_vm12, %v3281_v0  ;;  %vm1169_vm2 = vmand %vm911_vm10, %vm1041_vm11  ;;  %vm1005_vm12 = vcmp.ge.s32.totalorder %v3782_v39, %v3427_v55  ;;  %vm1135_vm10 = vcmp.lt.s32.totalorder %v3782_v39, %v3429_v56  ;;  %vm957_vm11 = vcmp.ge.s32.totalorder %v3790_v42, %v3427_v55  ;;  %v4081_v38 = vadd.s32 696, %v3425_v54 }
 0x157   :  { %2916 = vmatpush3.msk.msra.mxu1 %vm1169_vm2, %v3281_v0  ;;  %vm1232_vm1 = vmand %vm974_vm13, %vm1104_vm14  ;;  %vm1087_vm13 = vcmp.lt.s32.totalorder %v3790_v42, %v3429_v56 }
 0x158   :  { %2923 = vmatprep.subr.msk.mxu0 %vm1232_vm1, %v3281_v0  ;;  %vm1264_vm3 = vmand %vm1006_vm15, %vm1136_vm0 }
 0x159   :  { %2961 = vmatprep.subr.msk.mxu1 %vm1264_vm3, %v3281_v0  ;;  %vm3930_vm2 = vmand %vm958_vm6, %vm1088_vm4  ;;  %vm5088_vm3 = vcmask 261120  }
 0x15a   :  { %vm3940_vm0 = vmand %vm990_vm5, %vm1120_vm9  ;;  %vm5084_vm5 = vcmp.lt.s32.totalorder %v3806_v47, %v3429_v56 }
 0x15b   :  { %vm3960_vm6 = vmand %vm973_vm7, %vm1103_vm8 }
 0x15c   :  { %vm3970_vm4 = vmand %vm1005_vm12, %vm1135_vm10 }
 0x15d   :  { %vm3994_vm12 = vmand %vm957_vm11, %vm1087_vm13  ;;  %vm5085_vm11 = vcmp.ge.s32.totalorder %v3806_v47, %v3427_v55 }
 0x15e   :  { %vm4035_vm13 = vmand %vm5085_vm11, %vm5084_vm5  ;;  %vm5089_vm5 = vcmp.lt.s32.totalorder %v3817_v48, %v3429_v56  ;;  %vm5090_vm11 = vcmp.ge.s32.totalorder %v3817_v48, %v3427_v55  ;;  %v5105_v48 = vmov 0 }
 0x15f   :  { %vm4055_vm9 = vmand %vm5090_vm11, %vm5089_vm5 }
 0x160   :  { %v5092_v34 = vsel %vm4055_vm9, 4294967295, %v5091_v34  ;;  %vm5102_vm9 = vcmask 785408  }
 0x1cc   :  { %v3633_v43 = vpop.f32.mrf.mxu1  ;;  %v442_v10 = vpop.f32.mrf.mxu0 }
 0x1cd   :  { %v3752_v27 = vadd.f32 %v3633_v43, %v255_v19  ;;  %v3754_v28 = vadd.f32 %v442_v10, %v263_v20  ;;  %v3793_v43 = vadd.s32 880, %v3425_v54 }
 0x1ce   :  { %v3635_v44 = vpop.f32.mrf.mxu1  ;;  %v444_v11 = vpop.f32.mrf.mxu0 }
 0x1cf   :  { %v3763_v31 = vadd.f32 %v3635_v44, %v259_v24  ;;  %v3765_v32 = vadd.f32 %v444_v11, %v267_v25  ;;  %vm5076_vm10 = vcmp.lt.s32.totalorder %v3793_v43, %v3429_v56  ;;  %vm5077_vm7 = vcmp.ge.s32.totalorder %v3793_v43, %v3427_v55 }
 0x1d0   :  { %vm4004_vm8 = vmand %vm5077_vm7, %vm5076_vm10  ;;  %vm5080_vm7 = vcmp.lt.s32.totalorder %v3803_v46, %v3429_v56  ;;  %vm5081_vm10 = vcmp.ge.s32.totalorder %v3803_v46, %v3427_v55  ;;  %v5100_v43 = vmov 0  ;;  %v4103_v46 = vadd.s32 952, %v3425_v54 }
 0x1d1   :  { %v3637_v45 = vpop.f32.mrf.mxu1  ;;  %v448_v12 = vpop.f32.mrf.mxu0  ;;  %vm4025_vm15 = vmand %vm5081_vm10, %vm5080_vm7  ;;  %vm5093_vm7 = vcmp.lt.s32.totalorder %v3820_v49, %v3429_v56  ;;  %vm5094_vm10 = vcmp.ge.s32.totalorder %v3820_v49, %v3427_v55  ;;  %v4123_v49 = vadd.s32 568, %v3425_v54  ;;  %v5257_v11 = vmov 0 }
 0x1d2   :  { %v3774_v36 = vadd.f32 %v3637_v45, %v255_v19  ;;  %v3776_v37 = vadd.f32 %v448_v12, %v263_v20  ;;  %v3949_v12 = vadd.s32 584, %v3425_v54  ;;  %vm4065_vm14 = vmand %vm5094_vm10, %vm5093_vm7  ;;  %vm5097_vm7 = vcmask 523264  }
 0x1d3   :  { %v3643_v50 = vpop.f32.mrf.mxu1  ;;  %v450_v18 = vpop.f32.mrf.mxu0  ;;  %v5096_v35 = vsel %vm4065_vm14, 4294967295, %v5095_v35  ;;  %vm5111_vm14 = vcmp.lt.s32.totalorder %v3862_v53, %v3429_v56  ;;  %v4301_v20 = vadd.s32 680, %v3425_v54 }
 0x1d4   :  { %v3785_v40 = vadd.f32 %v3643_v50, %v259_v24  ;;  %v3787_v41 = vadd.f32 %v450_v18, %v267_v25  ;;  %v3831_v50 = vadd.s32 736, %v3425_v54  ;;  %v3986_v18 = vadd.s32 960, %v3425_v54 }
 0x1d5   :  { %v866_v24 = vadd.s32 928, %v3425_v54 }
 0x1d6   :  { %vm5098_vm10 = vcmp.lt.s32.totalorder %v3831_v50, %v3429_v56 }
 0x1d7   :  { %v3661_v60 = vpop.f32.mrf.mxu1  ;;  %v3749_v26 = vpop.f32.mrf.mxu0 }
 0x1d9   :  { %v3671_v61 = vpop.f32.mrf.mxu1  ;;  %v598_v33 = vpop.f32.mrf.mxu0 }
 0x1da   :  { %v3797_v44 = vadd.f32 %v3671_v61, %v3757_v29  ;;  %v3800_v45 = vadd.f32 %v598_v33, %v3760_v30  ;;  %v3888_v61 = vadd.s32 856, %v3425_v54 }
 0x1db   :  { %v3679_v62 = vpop.f32.mrf.mxu1 }
 0x1dd   :  { %v3689_v4 = vpop.f32.mrf.mxu1 }
 0x1df   :  { %v3699_v5 = vpop.f32.mrf.mxu1 }
 0x1e1   :  { %v3712_v9 = vpop.f32.mrf.mxu1 }
 0x1e2   :  { %719 = vrot.lane.b32.xlu0 %v3712_v9, %s3282_s29  ;;  %707 = vrot.lane.b32.xlu1 %v3712_v9, %s3283_s30 }
 0x1e6   :  { %715 = vrot.lane.b32.xlu0 %v3699_v5, %s3274_s21  ;;  %713 = vrot.lane.b32.xlu1 %v3712_v9, %s3274_s21 }
 0x1ea   :  { %709 = vrot.lane.b32.xlu1 %v3699_v5, %s3283_s30 }
 0x1ee   :  { %721 = vrot.lane.b32.xlu1 %v3699_v5, %s3282_s29 }
 0x254   :  { %v708_v8 = vpop.permute.xlu1 %707  ;;  %v720_v39 = vpop.permute.xlu0 %719 }
 0x255   :  { %v725_v25 = vsel %vm5088_vm3, %v3712_v9, %v708_v8  ;;  %v4078_v9 = vadd.s32 832, %v3425_v54  ;;  %vm5099_vm3 = vcmp.ge.s32.totalorder %v3831_v50, %v3427_v55  ;;  %v4126_v50 = vadd.s32 824, %v3425_v54 }
 0x256   :  { %vm4090_vm1 = vmand %vm5099_vm3, %vm5098_vm10  ;;  %vm5103_vm3 = vcmp.lt.s32.totalorder %v3842_v51, %v3429_v56  ;;  %vm5104_vm10 = vcmp.ge.s32.totalorder %v3842_v51, %v3427_v55  ;;  %v4129_v8 = vadd.s32 688, %v3425_v54 }
 0x257   :  { %v5101_v43 = vsel %vm4090_vm1, 4294967295, %v5100_v43  ;;  %vm4114_vm5 = vmand %vm5104_vm10, %vm5103_vm3  ;;  %vm5108_vm3 = vcmp.ge.s32.totalorder %v3853_v52, %v3427_v55 }
 0x258   :  { %v714_v33 = vpop.permute.xlu1 %713  ;;  %v5106_v48 = vsel %vm4114_vm5, 4294967295, %v5105_v48 }
 0x259   :  { %v728_v42 = vsel %vm5097_vm7, %v725_v25, %v714_v33  ;;  %vm5112_vm7 = vcmp.ge.s32.totalorder %v3862_v53, %v3427_v55 }
 0x25a   :  { %v4106_v47 = vsel %vm5102_vm9, %v728_v42, %v720_v39  ;;  %vm5107_vm9 = vcmp.lt.s32.totalorder %v3853_v52, %v3429_v56  ;;  %v5109_v42 = vmov 0  ;;  %vm4155_vm11 = vmand %vm5112_vm7, %vm5111_vm14  ;;  %vm5116_vm14 = vcmp.lt.s32.totalorder %v3869_v57, %v3429_v56 }
 0x25b   :  { %v734_v51 = vmul.f32 %v4106_v47, %v3763_v31  ;;  %v736_v25 = vmul.f32 %v4106_v47, %v3765_v32  ;;  %v733_v33 = vmul.f32 %v4106_v47, %v3752_v27  ;;  %v735_v39 = vmul.f32 %v4106_v47, %v3754_v28  ;;  %vm4145_vm10 = vmand %vm5108_vm3, %vm5107_vm9 }
 0x25c   :  { %v5110_v42 = vsel %vm4145_vm10, 4294967295, %v5109_v42  ;;  %v710_v31 = vpop.permute.xlu1 %709  ;;  %v5113_v27 = vmov 0  ;;  %v4166_v28 = vadd.s32 944, %v3425_v54  ;;  %vm5115_vm10 = vcmask 261120  }
 0x25d   :  { %v5114_v27 = vsel %vm4155_vm11, 4294967295, %v5113_v27  ;;  %v726_v32 = vsel %vm5115_vm10, %v3699_v5, %v710_v31  ;;  %1585 = vmatprep.mubr.f32.mxu0 %v734_v51  ;;  %1660 = vmatprep.mubr.f32.mxu1 %v736_v25  ;;  %vm5117_vm7 = vcmp.ge.s32.totalorder %v3869_v57, %v3427_v55  ;;  %v5118_v52 = vmov 0 }
 0x25e   :  { %vm4176_vm5 = vmand %vm5117_vm7, %vm5116_vm14  ;;  %vm5120_vm3 = vcmp.lt.s32.totalorder %v3872_v58, %v3429_v56  ;;  %vm5121_vm9 = vcmp.ge.s32.totalorder %v3872_v58, %v3427_v55  ;;  %1586 = vmatmul.mubr.f32.vlgmr.msra.gmra.mxu0 %v733_v33  ;;  %1661 = vmatmul.mubr.f32.vlgmr.msra.gmra.mxu1 %v735_v39  ;;  %vm5124_vm14 = vcmp.lt.s32.totalorder %v3881_v59, %v3429_v56  ;;  %v4211_v57 = vadd.s32 560, %v3425_v54  ;;  %v716_v58 = vpop.permute.xlu0 %715 }
 0x25f   :  { %v5119_v52 = vsel %vm4176_vm5, 4294967295, %v5118_v52  ;;  %vm4186_vm11 = vmand %vm5121_vm9, %vm5120_vm3  ;;  %vm5125_vm7 = vcmp.ge.s32.totalorder %v3881_v59, %v3427_v55  ;;  %2924 = vmatpush3.msk.msra.mxu0 %vm3930_vm2, %v3281_v0  ;;  %2962 = vmatpush3.msk.msra.mxu1 %vm3940_vm0, %v3281_v0  ;;  %vm5132_vm0 = vcmask 523264   ;;  %vm5138_vm9 = vcmp.ge.s32.totalorder %v3898_v1, %v3427_v55 }
 0x260   :  { %vm4200_vm5 = vmand %vm5125_vm7, %vm5124_vm14  ;;  %vm5128_vm14 = vcmp.lt.s32.totalorder %v3888_v61, %v3429_v56  ;;  %vm5129_vm7 = vcmp.ge.s32.totalorder %v3888_v61, %v3427_v55  ;;  %2925 = vmatprep.subr.msk.mxu0 %vm3960_vm6, %v3281_v0  ;;  %2963 = vmatprep.subr.msk.mxu1 %vm3970_vm4, %v3281_v0  ;;  %v729_v61 = vsel %vm5132_vm0, %v726_v32, %v716_v58  ;;  %v722_v10 = vpop.permute.xlu1 %721  ;;  %v5211_v33 = vmov 0 }
 0x261   :  { %vm4225_vm3 = vmand %vm5129_vm7, %vm5128_vm14  ;;  %vm5133_vm14 = vcmp.lt.s32.totalorder %v3891_v63, %v3429_v56  ;;  %vm5134_vm7 = vcmp.ge.s32.totalorder %v3891_v63, %v3427_v55  ;;  %vm5137_vm6 = vcmp.lt.s32.totalorder %v3898_v1, %v3429_v56  ;;  %v4267_v63 = vadd.s32 816, %v3425_v54  ;;  %2926 = vmatpush3.msk.msra.mxu0 %vm3994_vm12, %v3281_v0  ;;  %2964 = vmatpush3.msk.msra.mxu1 %vm4004_vm8, %v3281_v0 }
 0x262   :  { %vm4248_vm1 = vmand %vm5134_vm7, %vm5133_vm14  ;;  %vm5142_vm14 = vcmp.lt.s32.totalorder %v3901_v2, %v3429_v56  ;;  %vm5143_vm7 = vcmp.ge.s32.totalorder %v3901_v2, %v3427_v55  ;;  %vm5146_vm12 = vcmp.lt.s32.totalorder %v3912_v3, %v3429_v56  ;;  %vm5147_vm2 = vcmp.ge.s32.totalorder %v3912_v3, %v3427_v55  ;;  %2927 = vmatprep.subr.msk.mxu0 %vm4025_vm15, %v3281_v0 }
 0x263   :  { %vm4258_vm4 = vmand %vm5138_vm9, %vm5137_vm6  ;;  %vm5141_vm9 = vcmask 785408   ;;  %v4304_v2 = vadd.s32 936, %v3425_v54  ;;  %2965 = vmatprep.subr.msk.mxu1 %vm4035_vm13, %v3281_v0  ;;  %vm5154_vm15 = vcmp.lt.s32.totalorder %v3922_v7, %v3429_v56  ;;  %vm5155_vm13 = vcmp.ge.s32.totalorder %v3922_v7, %v3427_v55 }
 0x264   :  { %v4276_v1 = vsel %vm5141_vm9, %v729_v61, %v722_v10  ;;  %vm4284_vm6 = vmand %vm5143_vm7, %vm5142_vm14  ;;  %vm5151_vm14 = vcmp.ge.s32.totalorder %v3919_v6, %v3427_v55  ;;  %vm5174_vm10 = vcmp.lt.s32.totalorder %v3986_v18, %v3429_v56  ;;  %v5219_v39 = vmov 0 }
 0x265   :  { %vm4294_vm8 = vmand %vm5147_vm2, %vm5146_vm12  ;;  %v742_v3 = vmul.f32 %v4276_v1, %v3785_v40  ;;  %v744_v51 = vmul.f32 %v4276_v1, %v3787_v41  ;;  %vm5150_vm2 = vcmp.lt.s32.totalorder %v3919_v6, %v3429_v56  ;;  %v5156_v40 = vmov 0 }
 0x266   :  { %vm4322_vm7 = vmand %vm5151_vm14, %vm5150_vm2  ;;  %v4339_v41 = vadd.s32 552, %v3425_v54  ;;  %vm5158_vm2 = vnez %v5092_v34  ;;  %vm5159_vm14 = vnez %v5096_v35  ;;  %v741_v6 = vmul.f32 %v4276_v1, %v3774_v36 }
 0x267   :  { %vm4332_vm12 = vmand %vm5155_vm13, %vm5154_vm15  ;;  %2928 = vmatpush3.msk.msra.mxu0 %vm5158_vm2, %v3281_v0  ;;  %2966 = vmatpush3.msk.msra.mxu1 %vm5159_vm14, %v3281_v0  ;;  %v743_v7 = vmul.f32 %v4276_v1, %v3776_v37  ;;  %vm5160_vm15 = vcmp.lt.s32.totalorder %v3949_v12, %v3429_v56  ;;  %vm5161_vm13 = vcmp.ge.s32.totalorder %v3949_v12, %v3427_v55  ;;  %v5166_v36 = vmov 0 }
 0x268   :  { %v5157_v40 = vsel %vm4332_vm12, 4294967295, %v5156_v40  ;;  %vm4357_vm9 = vmand %vm5161_vm13, %vm5160_vm15  ;;  %vm5164_vm2 = vcmp.lt.s32.totalorder %v3952_v13, %v3429_v56  ;;  %vm5165_vm14 = vcmp.ge.s32.totalorder %v3952_v13, %v3427_v55  ;;  %v851_v37 = vadd.s32 808, %v3425_v54  ;;  %1590 = vmatprep.mubr.f32.mxu0 %v742_v3  ;;  %1665 = vmatprep.mubr.f32.mxu1 %v744_v51 }
 0x269   :  { %v5163_v23 = vsel %vm4357_vm9, 4294967295, %v5162_v23  ;;  %vm4367_vm0 = vmand %vm5165_vm14, %vm5164_vm2  ;;  %vm5168_vm15 = vnez %v5101_v43  ;;  %vm5169_vm13 = vnez %v5106_v48  ;;  %vm5170_vm9 = vcmp.lt.s32.totalorder %v3983_v17, %v3429_v56  ;;  %1591 = vmatmul.mubr.f32.gmra.mxu0 %v741_v6  ;;  %1666 = vmatmul.mubr.f32.gmra.mxu1 %v743_v7 }
 0x26a   :  { %v5167_v36 = vsel %vm4367_vm0, 4294967295, %v5166_v36  ;;  %2929 = vmatprep.subr.msk.mxu0 %vm5168_vm15, %v3281_v0  ;;  %2967 = vmatprep.subr.msk.mxu1 %vm5169_vm13, %v3281_v0  ;;  %vm5171_vm2 = vcmp.ge.s32.totalorder %v3983_v17, %v3427_v55  ;;  %v5172_v12 = vmov 0  ;;  %vm5175_vm15 = vcmp.ge.s32.totalorder %v3986_v18, %v3427_v55 }
 0x26b   :  { %vm4386_vm14 = vmand %vm5171_vm2, %vm5170_vm9  ;;  %v5176_v13 = vmov 0  ;;  %v834_v17 = vadd.s32 672, %v3425_v54  ;;  %vm5178_vm9 = vcmp.lt.s32.totalorder %v4017_v21, %v3429_v56  ;;  %v5180_v18 = vmov 0 }
 0x26c   :  { %v5173_v12 = vsel %vm4386_vm14, 4294967295, %v5172_v12  ;;  %vm4396_vm0 = vmand %vm5175_vm15, %vm5174_vm10  ;;  %vm5179_vm10 = vcmp.ge.s32.totalorder %v4017_v21, %v3427_v55  ;;  %vm5182_vm15 = vcmp.lt.s32.totalorder %v4078_v9, %v3429_v56  ;;  %vm5183_vm13 = vcmp.ge.s32.totalorder %v4078_v9, %v3427_v55 }
 0x26d   :  { %v5177_v13 = vsel %vm4396_vm0, 4294967295, %v5176_v13  ;;  %vm4412_vm2 = vmand %vm5179_vm10, %vm5178_vm9  ;;  %v5184_v34 = vmov 0  ;;  %v818_v21 = vadd.s32 544, %v3425_v54  ;;  %vm5186_vm10 = vnez %v5110_v42 }
 0x26e   :  { %v5181_v18 = vsel %vm4412_vm2, 4294967295, %v5180_v18  ;;  %vm4422_vm12 = vmand %vm5183_vm13, %vm5182_vm15  ;;  %2930 = vmatpush3.msk.msra.mxu0 %vm5186_vm10, %v3281_v0  ;;  %vm5187_vm13 = vnez %v5114_v27  ;;  %vm5188_vm15 = vcmp.lt.s32.totalorder %v4081_v38, %v3429_v56  ;;  %vm5189_vm0 = vcmp.ge.s32.totalorder %v4081_v38, %v3427_v55 }
 0x26f   :  { %v5185_v34 = vsel %vm4422_vm12, 4294967295, %v5184_v34  ;;  %2968 = vmatpush3.msk.msra.mxu1 %vm5187_vm13, %v3281_v0  ;;  %vm4445_vm14 = vmand %vm5189_vm0, %vm5188_vm15  ;;  %v5190_v35 = vmov 0  ;;  %vm5192_vm9 = vcmp.lt.s32.totalorder %v4103_v46, %v3429_v56  ;;  %vm5193_vm10 = vcmp.ge.s32.totalorder %v4103_v46, %v3427_v55 }
 0x270   :  { %v5191_v35 = vsel %vm4445_vm14, 4294967295, %v5190_v35  ;;  %vm4455_vm12 = vmand %vm5193_vm10, %vm5192_vm9  ;;  %v5194_v9 = vmov 0  ;;  %v850_v38 = vadd.s32 800, %v3425_v54  ;;  %v738_v43 = vmul.f32 %v4106_v47, %v3797_v44  ;;  %2969 = vmatprep.subr.msk.mxu1 %vm4186_vm11, %v3281_v0 }
 0x271   :  { %v5195_v9 = vsel %vm4455_vm12, 4294967295, %v5194_v9  ;;  %vm5196_vm9 = vcmp.lt.s32.totalorder %v4123_v49, %v3429_v56  ;;  %vm5197_vm15 = vcmp.ge.s32.totalorder %v4123_v49, %v3427_v55  ;;  %vm5200_vm2 = vcmp.lt.s32.totalorder %v4126_v50, %v3429_v56  ;;  %2970 = vmatpush3.msk.msra.mxu1 %vm4225_vm3, %v3281_v0 }
 0x272   :  { %vm4474_vm10 = vmand %vm5197_vm15, %vm5196_vm9  ;;  %vm5201_vm0 = vcmp.ge.s32.totalorder %v4126_v50, %v3427_v55  ;;  %v5202_v48 = vmov 0  ;;  %v833_v44 = vadd.s32 664, %v3425_v54  ;;  %vm5204_vm9 = vnez %v5119_v52  ;;  %1735 = vmatprep.mubr.f32.mxu0 %v738_v43  ;;  %2971 = vmatprep.subr.msk.mxu1 %vm4258_vm4, %v3281_v0 }
 0x273   :  { %vm4484_vm13 = vmand %vm5201_vm0, %vm5200_vm2  ;;  %2931 = vmatprep.subr.msk.mxu0 %vm5204_vm9, %v3281_v0  ;;  %v740_v49 = vmul.f32 %v4106_v47, %v3800_v45  ;;  %vm5205_vm2 = vcmp.lt.s32.totalorder %v4129_v8, %v3429_v56  ;;  %vm5206_vm0 = vcmp.ge.s32.totalorder %v4129_v8, %v3427_v55  ;;  %v5207_v50 = vmov 0  ;;  %2972 = vmatpush3.msk.msra.mxu1 %vm4294_vm8, %v3281_v0 }
 0x274   :  { %v5203_v48 = vsel %vm4484_vm13, 4294967295, %v5202_v48  ;;  %vm4505_vm15 = vmand %vm5206_vm0, %vm5205_vm2  ;;  %vm5209_vm9 = vcmp.lt.s32.totalorder %v4166_v28, %v3429_v56  ;;  %vm5210_vm12 = vcmp.ge.s32.totalorder %v4166_v28, %v3427_v55  ;;  %v865_v45 = vadd.s32 920, %v3425_v54  ;;  %2932 = vmatpush3.msk.msra.mxu0 %vm4200_vm5, %v3281_v0 }
 0x275   :  { %v5208_v50 = vsel %vm4505_vm15, 4294967295, %v5207_v50  ;;  %vm4515_vm11 = vmand %vm5210_vm12, %vm5209_vm9  ;;  %vm5213_vm2 = vcmp.lt.s32.totalorder %v4211_v57, %v3429_v56  ;;  %vm5214_vm12 = vcmp.ge.s32.totalorder %v4211_v57, %v3427_v55  ;;  %vm5217_vm9 = vcmp.lt.s32.totalorder %v4267_v63, %v3429_v56  ;;  %1810 = vmatprep.mubr.f32.mxu1 %v740_v49  ;;  %2933 = vmatprep.subr.msk.mxu0 %vm4248_vm1, %v3281_v0 }
 0x276   :  { %v5212_v33 = vsel %vm4515_vm11, 4294967295, %v5211_v33  ;;  %vm4531_vm0 = vmand %vm5214_vm12, %vm5213_vm2  ;;  %vm5218_vm14 = vcmp.ge.s32.totalorder %v4267_v63, %v3427_v55  ;;  %v817_v42 = vadd.s32 536, %v3425_v54  ;;  %vm5221_vm2 = vcmp.lt.s32.totalorder %v4301_v20, %v3429_v56  ;;  %2934 = vmatpush3.msk.msra.mxu0 %vm4284_vm6, %v3281_v0 }
 0x277   :  { %vm4541_vm13 = vmand %vm5218_vm14, %vm5217_vm9  ;;  %vm5222_vm14 = vcmp.ge.s32.totalorder %v4301_v20, %v3427_v55  ;;  %vm5225_vm9 = vcmp.lt.s32.totalorder %v4304_v2, %v3429_v56  ;;  %vm5226_vm15 = vcmp.ge.s32.totalorder %v4304_v2, %v3427_v55  ;;  %vm1077_vm3 = vcmp.lt.s32.totalorder %v818_v21, %v3429_v56  ;;  %2935 = vmatprep.subr.msk.mxu0 %vm4322_vm7, %v3281_v0 }
 0x278   :  { %v5220_v39 = vsel %vm4541_vm13, 4294967295, %v5219_v39  ;;  %vm4558_vm12 = vmand %vm5222_vm14, %vm5221_vm2  ;;  %v849_v28 = vadd.s32 792, %v3425_v54  ;;  %vm5230_vm2 = vcmp.ge.s32.totalorder %v4339_v41, %v3427_v55  ;;  %vm5234_vm11 = vcmp.ge.s32.totalorder %v851_v37, %v3427_v55 }
 0x279   :  { %vm4568_vm5 = vmand %vm5226_vm15, %vm5225_vm9  ;;  %vm5229_vm15 = vcmp.lt.s32.totalorder %v4339_v41, %v3429_v56  ;;  %vm5233_vm9 = vcmp.lt.s32.totalorder %v851_v37, %v3429_v56  ;;  %v832_v5 = vadd.s32 656, %v3425_v54  ;;  %vm5242_vm1 = vcmp.ge.s32.totalorder %v866_v24, %v3427_v55  ;;  %v2099_v37 = vld [vmem:[#allocation7 + $0x18] sm:$0xff] }
 0x27a   :  { %vm4588_vm14 = vmand %vm5230_vm2, %vm5229_vm15  ;;  %vm5237_vm15 = vcmp.lt.s32.totalorder %v834_v17, %v3429_v56  ;;  %v864_v58 = vadd.s32 912, %v3425_v54  ;;  %v5247_v59 = vmov 0  ;;  %vm5250_vm6 = vcmp.ge.s32.totalorder %v850_v38, %v3427_v55 }
 0x27b   :  { %vm4596_vm13 = vmand %vm5234_vm11, %vm5233_vm9  ;;  %vm5238_vm11 = vcmp.ge.s32.totalorder %v834_v17, %v3427_v55  ;;  %vm5241_vm9 = vcmp.lt.s32.totalorder %v866_v24, %v3429_v56  ;;  %v5251_v61 = vmov 0  ;;  %v816_v10 = vadd.s32 528, %v3425_v54  ;;  %v602_v24 = vpop.f32.mrf.mxu0 }
 0x27c   :  { %vm4613_vm2 = vmand %vm5238_vm11, %vm5237_vm15  ;;  %vm5245_vm15 = vnez %v5157_v40  ;;  %v5263_v63 = vmov 0  ;;  %v863_v20 = vadd.s32 904, %v3425_v54  ;;  %v5275_v2 = vmov 0 }
 0x27d   :  { %vm4621_vm4 = vmand %vm5242_vm1, %vm5241_vm9  ;;  %2973 = vmatprep.subr.msk.mxu1 %vm5245_vm15, %v3281_v0  ;;  %vm5246_vm1 = vcmp.ge.s32.totalorder %v818_v21, %v3427_v55  ;;  %vm5249_vm9 = vcmp.lt.s32.totalorder %v850_v38, %v3429_v56  ;;  %v815_v3 = vadd.s32 520, %v3425_v54  ;;  %v847_v25 = vadd.s32 776, %v3425_v54  ;;  %v604_v38 = vpop.f32.mrf.mxu0  ;;  %v2096_v21 = vld [vmem:[#allocation7] sm:$0xff] }
 0x27e   :  { %vm4638_vm11 = vmand %vm5246_vm1, %vm1077_vm3  ;;  %vm5253_vm3 = vnez %v5163_v23  ;;  %vm5254_vm1 = vnez %v5167_v36  ;;  %v830_v41 = vadd.s32 640, %v3425_v54  ;;  %v270_v6 = vsub.s32 4, %v3425_v54 }
 0x27f   :  { %v5248_v59 = vsel %vm4638_vm11, 4294967295, %v5247_v59  ;;  %vm4646_vm8 = vmand %vm5250_vm6, %vm5249_vm9  ;;  %2936 = vmatpush3.msk.msra.mxu0 %vm5253_vm3, %v3281_v0  ;;  %2974 = vmatpush3.msk.msra.mxu1 %vm5254_vm1, %v3281_v0  ;;  %vm5255_vm11 = vcmp.lt.s32.totalorder %v833_v44, %v3429_v56  ;;  %vm5256_vm6 = vcmp.ge.s32.totalorder %v833_v44, %v3427_v55  ;;  %vm5259_vm3 = vnez %v5173_v12 }
 0x280   :  { %v5252_v61 = vsel %vm4646_vm8, 4294967295, %v5251_v61  ;;  %vm4663_vm9 = vmand %vm5256_vm6, %vm5255_vm11  ;;  %2937 = vmatprep.subr.msk.mxu0 %vm5259_vm3, %v3281_v0  ;;  %vm5260_vm1 = vnez %v5177_v13  ;;  %vm5261_vm8 = vcmp.lt.s32.totalorder %v865_v45, %v3429_v56  ;;  %vm5262_vm11 = vcmp.ge.s32.totalorder %v865_v45, %v3427_v55  ;;  %v2015_v13 = vld [vmem:[%s5057_s12 + $0x18] sm:$0xff] }
 0x281   :  { %v5258_v11 = vsel %vm4663_vm9, 4294967295, %v5257_v11  ;;  %2975 = vmatprep.subr.msk.mxu1 %vm5260_vm1, %v3281_v0  ;;  %vm4680_vm6 = vmand %vm5262_vm11, %vm5261_vm8  ;;  %vm5265_vm3 = vnez %v5181_v18  ;;  %vm5266_vm1 = vnez %v5185_v34  ;;  %vm5267_vm9 = vcmp.lt.s32.totalorder %v817_v42, %v3429_v56  ;;  %v2097_v18 = vld [vmem:[#allocation7 + $0x8] sm:$0xff] }
 0x282   :  { %v5264_v63 = vsel %vm4680_vm6, 4294967295, %v5263_v63  ;;  %2938 = vmatpush3.msk.msra.mxu0 %vm5265_vm3, %v3281_v0  ;;  %2976 = vmatpush3.msk.msra.mxu1 %vm5266_vm1, %v3281_v0  ;;  %vm5268_vm8 = vcmp.ge.s32.totalorder %v817_v42, %v3427_v55  ;;  %vm5271_vm3 = vnez %v5191_v35  ;;  %vm5272_vm1 = vnez %v5195_v9 }
 0x283   :  { %vm4697_vm11 = vmand %vm5268_vm8, %vm5267_vm9  ;;  %2939 = vmatprep.subr.msk.mxu0 %vm5271_vm3, %v3281_v0  ;;  %2977 = vmatprep.subr.msk.mxu1 %vm5272_vm1, %v3281_v0  ;;  %vm5273_vm6 = vcmp.lt.s32.totalorder %v849_v28, %v3429_v56  ;;  %vm5274_vm9 = vcmp.ge.s32.totalorder %v849_v28, %v3427_v55  ;;  %vm5277_vm3 = vnez %v5203_v48  ;;  %vm5278_vm1 = vcmp.lt.s32.totalorder %v832_v5, %v3429_v56 }
 0x284   :  { %vm4714_vm8 = vmand %vm5274_vm9, %vm5273_vm6  ;;  %2940 = vmatpush3.msk.msra.mxu0 %vm4474_vm10, %v3281_v0  ;;  %2978 = vmatpush3.msk.msra.mxu1 %vm5277_vm3, %v3281_v0  ;;  %vm5279_vm6 = vcmp.ge.s32.totalorder %v832_v5, %v3427_v55  ;;  %vm5282_vm10 = vnez %v5208_v50  ;;  %vm5283_vm3 = vnez %v5212_v33  ;;  %vm1122_vm15 = vcmp.lt.s32.totalorder %v863_v20, %v3429_v56  ;;  %v1909_v50 = vld [vmem:[#allocation4] sm:$0xff] }
 0x285   :  { %v5276_v2 = vsel %vm4714_vm8, 4294967295, %v5275_v2  ;;  %vm4731_vm9 = vmand %vm5279_vm6, %vm5278_vm1  ;;  %2941 = vmatprep.subr.msk.mxu0 %vm5282_vm10, %v3281_v0  ;;  %2979 = vmatprep.subr.msk.mxu1 %vm5283_vm3, %v3281_v0  ;;  %vm5284_vm8 = vcmp.lt.s32.totalorder %v864_v58, %v3429_v56  ;;  %vm5285_vm1 = vcmp.ge.s32.totalorder %v864_v58, %v3427_v55  ;;  %vm5288_vm10 = vnez %v5220_v39 }
 0x286   :  { %vm4748_vm6 = vmand %vm5285_vm1, %vm5284_vm8  ;;  %2942 = vmatpush3.msk.msra.mxu0 %vm4531_vm0, %v3281_v0  ;;  %2980 = vmatpush3.msk.msra.mxu1 %vm5288_vm10, %v3281_v0  ;;  %vm5289_vm8 = vcmp.lt.s32.totalorder %v816_v10, %v3429_v56  ;;  %vm5290_vm3 = vcmp.ge.s32.totalorder %v816_v10, %v3427_v55  ;;  %v862_v23 = vadd.s32 896, %v3425_v54  ;;  %v278_v36 = vsub.s32 6, %v3425_v54 }
 0x287   :  { %vm4766_vm1 = vmand %vm5290_vm3, %vm5289_vm8  ;;  %2943 = vmatprep.subr.msk.mxu0 %vm4558_vm12, %v3281_v0  ;;  %2981 = vmatprep.subr.msk.mxu1 %vm4568_vm5, %v3281_v0  ;;  %vm5293_vm0 = vcmp.lt.s32.totalorder %v848_v14, %v3429_v56  ;;  %vm5294_vm10 = vcmp.ge.s32.totalorder %v848_v14, %v3427_v55  ;;  %vm1074_vm7 = vcmp.lt.s32.totalorder %v815_v3, %v3429_v56  ;;  %v814_v12 = vadd.s32 512, %v3425_v54 }
 0x288   :  { %vm4784_vm8 = vmand %vm5294_vm10, %vm5293_vm0  ;;  %2944 = vmatpush3.msk.msra.mxu0 %vm4588_vm14, %v3281_v0  ;;  %2982 = vmatpush3.msk.msra.mxu1 %vm4596_vm13, %v3281_v0  ;;  %vm5297_vm5 = vcmp.lt.s32.totalorder %v831_v16, %v3429_v56  ;;  %vm5298_vm12 = vcmp.ge.s32.totalorder %v831_v16, %v3427_v55  ;;  %vm976_vm10 = vcmp.ge.s32.totalorder %v847_v25, %v3427_v55  ;;  %v846_v17 = vadd.s32 768, %v3425_v54 }
 0x289   :  { %vm4801_vm0 = vmand %vm5298_vm12, %vm5297_vm5  ;;  %vm1106_vm3 = vcmp.lt.s32.totalorder %v847_v25, %v3429_v56  ;;  %2945 = vmatprep.subr.msk.mxu0 %vm4613_vm2, %v3281_v0  ;;  %2983 = vmatprep.subr.msk.mxu1 %vm4621_vm4, %v3281_v0  ;;  %vm5301_vm13 = vcmp.ge.s32.totalorder %v863_v20, %v3427_v55  ;;  %v271_v34 = vrot.slane %v3739_v15, %v270_v6  ;;  %v5311_v9 = vmov 0 }
 0x28a   :  { %vm4818_vm14 = vmand %vm5301_vm13, %vm1122_vm15  ;;  %vm5304_vm2 = vnez %v5248_v59  ;;  %vm5305_vm4 = vnez %v5252_v61  ;;  %vm5306_vm15 = vcmp.ge.s32.totalorder %v815_v3, %v3427_v55  ;;  %v279_v35 = vrot.slane %v3739_v15, %v278_v36  ;;  %v2263_v15 = vld [vmem:[#allocation7 + $0x30] sm:$0xff] }
 0x28b   :  { %2946 = vmatpush3.msk.msra.mxu0 %vm5304_vm2, %v3281_v0  ;;  %2984 = vmatpush3.msk.msra.mxu1 %vm5305_vm4, %v3281_v0  ;;  %vm4835_vm13 = vmand %vm5306_vm15, %vm1074_vm7  ;;  %vm5309_vm2 = vnez %v5258_v11  ;;  %vm5310_vm4 = vnez %v5264_v63  ;;  %vm943_vm15 = vcmp.ge.s32.totalorder %v814_v12, %v3427_v55  ;;  %vm1073_vm5 = vcmp.lt.s32.totalorder %v814_v12, %v3429_v56 }
 0x28c   :  { %2947 = vmatprep.subr.msk.mxu0 %vm5309_vm2, %v3281_v0  ;;  %2985 = vmatprep.subr.msk.mxu1 %vm5310_vm4, %v3281_v0  ;;  %vm4852_vm7 = vmand %vm976_vm10, %vm1106_vm3  ;;  %vm5313_vm2 = vnez %v5276_v2  ;;  %vm5314_vm4 = vcmp.lt.s32.totalorder %v830_v41, %v3429_v56  ;;  %vm5315_vm12 = vcmp.ge.s32.totalorder %v830_v41, %v3427_v55  ;;  %vm975_vm10 = vcmp.ge.s32.totalorder %v846_v17, %v3427_v55 }
 0x28d   :  { %v5312_v9 = vsel %vm4852_vm7, 4294967295, %v5311_v9  ;;  %2948 = vmatpush3.msk.msra.mxu0 %vm4697_vm11, %v3281_v0  ;;  %2986 = vmatpush3.msk.msra.mxu1 %vm5313_vm2, %v3281_v0  ;;  %vm4868_vm3 = vmand %vm5315_vm12, %vm5314_vm4  ;;  %vm1105_vm7 = vcmp.lt.s32.totalorder %v846_v17, %v3429_v56  ;;  %vm5318_vm11 = vcmp.lt.s32.totalorder %v862_v23, %v3429_v56  ;;  %vm5319_vm12 = vcmp.ge.s32.totalorder %v862_v23, %v3427_v55  ;;  %v2098_v17 = vld [vmem:[#allocation7 + $0x10] sm:$0xff] }
 0x28e   :  { %2949 = vmatprep.subr.msk.mxu0 %vm4731_vm9, %v3281_v0  ;;  %2987 = vmatprep.subr.msk.mxu1 %vm4748_vm6, %v3281_v0  ;;  %vm1249_vm2 = vmand %vm5319_vm12, %vm5318_vm11  ;;  %v520_v43 = vadd.f32 %v3661_v60, %v271_v34  ;;  %v597_v46 = vadd.f32 %v3749_v26, %v279_v35  ;;  %v528_v55 = vadd.f32 %v3689_v4, %v3757_v29 }
 0x28f   :  { %2950 = vmatpush3.msk.msra.mxu0 %vm4766_vm1, %v3281_v0  ;;  %2988 = vmatpush3.msk.msra.mxu1 %vm4784_vm8, %v3281_v0  ;;  %vm1201_vm4 = vmand %vm943_vm15, %vm1073_vm5  ;;  %v605_v56 = vadd.f32 %v604_v38, %v3760_v30  ;;  %vm5320_vm6 = vnez %v5312_v9  ;;  %v526_v30 = vadd.f32 %v3679_v62, %v271_v34  ;;  %v603_v48 = vadd.f32 %v602_v24, %v279_v35  ;;  %v1911_v62 = vld [vmem:[#allocation4 + $0x10] sm:$0xff]  ;;  %v2013_v34 = vld [vmem:[%s5057_s12 + $0x8] sm:$0xff] }
 0x290   :  { %2951 = vmatprep.subr.msk.mxu0 %vm4801_vm0, %v3281_v0  ;;  %2989 = vmatprep.subr.msk.mxu1 %vm4818_vm14, %v3281_v0  ;;  %vm1233_vm9 = vmand %vm975_vm10, %vm1105_vm7  ;;  %v737_v60 = vmul.f32 %v4106_v47, %v520_v43  ;;  %v739_v4 = vmul.f32 %v4106_v47, %v597_v46  ;;  %v746_v26 = vmul.f32 %v4276_v1, %v528_v55  ;;  %v1910_v47 = vld [vmem:[#allocation4 + $0x8] sm:$0xff]  ;;  %vm3284_vm8 = vmmov 0   ;;  %v2014_v24 = vld [vmem:[%s5057_s12 + $0x10] sm:$0xff] }
 0x291   :  { %2952 = vmatpush3.msk.msra.mxu0 %vm4835_vm13, %v3281_v0  ;;  %2990 = vmatpush3.msk.msra.mxu1 %vm5320_vm6, %v3281_v0  ;;  %v748_v29 = vmul.f32 %v4276_v1, %v605_v56  ;;  %v745_v44 = vmul.f32 %v4276_v1, %v526_v30  ;;  %v747_v49 = vmul.f32 %v4276_v1, %v603_v48  ;;  %v2810_v1 = vld [vmem:[%s5048_s3] ss:$0 sm:$0xff]  ;;  %vm1829_vm0 = vcmask 130048   ;;  %v2262_v38 = vld [vmem:[#allocation7 + $0x28] sm:$0xff]  ;;  %v2261_v43 = vld [vmem:[#allocation7 + $0x20] sm:$0xff] }
 0x292   :  { %2953 = vmatprep.subr.msk.mxu0 %vm4868_vm3, %v3281_v0  ;;  %2991 = vmatprep.subr.msk.mxu1 %vm1249_vm2, %v3281_v0  ;;  %vm1826_vm1 = vcmp.eq.s32.totalorder %v3425_v54, %v2810_v1  ;;  %v4939_v54 = vld [vmem:[%s5065_s25] sm:$0xff]  ;;  %vm5321_vm14 = vcmask 261120   ;;  %v2429_v55 = vld [vmem:[#allocation7 + $0x50] sm:$0xff]  ;;  %v2428_v56 = vld [vmem:[#allocation7 + $0x48] sm:$0xff] }
 0x293   :  { %2954 = vmatpush3.msk.msra.mxu0 %vm1201_vm4, %v3281_v0  ;;  %2992 = vmatpush3.msk.msra.mxu1 %vm1233_vm9, %v3281_v0  ;;  %v1912_v0 = vld [vmem:[#allocation4 + $0x18] sm:$0xff]  ;;  %v2811_v33 = vsel %vm1826_vm1, 1.0, %v3280_v22  ;;  %v2012_v35 = vld [vmem:[%s5057_s12] sm:$0xff]  ;;  %vm5322_vm5 = vmmov %vm5321_vm14 }
 0x294   :  { %1736 = vmatmul.mubr.f32.vlgmr.msra.gmra.mxu0 %v737_v60  ;;  %1811 = vmatmul.mubr.f32.vlgmr.msra.gmra.mxu1 %v739_v4  ;;  %v1830_v45 = vsel %vm1829_vm0, %v2811_v33, 0.0  ;;  %v2264_v9 = vld [vmem:[#allocation7 + $0x38] sm:$0xff]  ;;  %vm5323_vm13 = vmmov %vm5322_vm5  ;;  %v2427_v60 = vld [vmem:[#allocation7 + $0x40] sm:$0xff] }
 0x295   :  { %1740 = vmatprep.mubr.f32.mxu0 %v746_v26  ;;  %1815 = vmatprep.mubr.f32.mxu1 %v748_v29  ;;  %v2430_v46 = vld [vmem:[#allocation7 + $0x58] sm:$0xff]  ;;  %vm5324_vm7 = vmmov %vm5322_vm5 }
 0x296   :  { %3054 = vmatprep.subr.mxu1 %v3280_v22  ;;  %3047 = vmatprep.subr.mxu0 %v3280_v22  ;;  %v2816_v1 = vld [vmem:[%s5056_s11] ss:$0 sm:$0xff]  ;;  %vm5325_vm15 = vmmov %vm5322_vm5 }
 0x297   :  { %3055 = vmatpush3.msra.mxu1 %v1912_v0  ;;  %1831 = vadd.xlane.f32.xlu0 %v1830_v45  ;;  %vm5326_vm3 = vmmov %vm5322_vm5 }
 0x298   :  { %1741 = vmatmul.mubr.f32.gmra.mxu0 %v745_v44  ;;  %1816 = vmatmul.mubr.f32.gmra.mxu1 %v747_v49  ;;  %v2814_v44 = vld [vmem:[#allocation6] ss:$0 sm:$0xff]  ;;  %vm5327_vm10 = vmmov %vm5326_vm3 }
 0x299   :  { %3056 = vmatprep.subr.mxu1 %v3280_v22  ;;  %3051 = vmatprep.mubr.msk.f32.mxu0 %vm3284_vm8, %v3280_v22  ;;  %vm5328_vm11 = vmmov %vm5326_vm3 }
 0x29a   :  { %3057 = vmatpush3.msra.mxu1 %v1911_v62  ;;  %3062 = vmatprep.mubr.msk.f32.mxu1 %vm3284_vm8, %v3280_v22  ;;  %v2815_v62 = vld [vmem:[%s5055_s10] ss:$0 sm:$0xff] }
 0x29b   :  { %3058 = vmatprep.subr.mxu1 %v3280_v22 }
 0x29c   :  { %3059 = vmatpush3.msra.mxu1 %v1910_v47 }
 0x29d   :  { %3060 = vmatprep.subr.mxu1 %v3280_v22 }
 0x29e   :  { %3061 = vmatpush3.msra.mxu1 %v1909_v50 }
 0x29f   :  { %3076 = vmatprep.subr.mxu1 %v3280_v22  ;;  %3063 = vmatmul.mubr.msk.f32.vlgmr.msra.gmra.mxu1 %vm5321_vm14, %v4939_v54 }
 0x2a0   :  { %3084 = vmatprep.mubr.msk.f32.mxu1 %vm3284_vm8, %v3280_v22  ;;  %3077 = vmatpush3.msra.mxu1 %v2099_v37 }
 0x2a1   :  { %3078 = vmatprep.subr.mxu1 %v3280_v22 }
 0x2a2   :  { %3079 = vmatpush3.msra.mxu1 %v2098_v17  ;;  %v2837_v17 = vld [vmem:[%s5060_s15 + $0x2] ss:$0 sm:$0xff] }
 0x2a3   :  { %3080 = vmatprep.subr.mxu1 %v3280_v22 }
 0x2a4   :  { %3081 = vmatpush3.msra.mxu1 %v2097_v18 }
 0x2a5   :  { %3082 = vmatprep.subr.mxu1 %v3280_v22 }
 0x2a6   :  { %3083 = vmatpush3.msra.mxu1 %v2096_v21 }
 0x2a7   :  { %3098 = vmatprep.subr.mxu1 %v3280_v22  ;;  %3085 = vmatmul.mubr.msk.f32.vlgmr.msra.gmra.mxu1 %vm5322_vm5, %v4939_v54 }
 0x2a8   :  { %3106 = vmatprep.mubr.msk.f32.mxu1 %vm3284_vm8, %v3280_v22  ;;  %3099 = vmatpush3.msra.mxu1 %v2264_v9 }
 0x2a9   :  { %3100 = vmatprep.subr.mxu1 %v3280_v22 }
 0x2aa   :  { %3101 = vmatpush3.msra.mxu1 %v2263_v15 }
 0x2ab   :  { %3102 = vmatprep.subr.mxu1 %v3280_v22 }
 0x2ac   :  { %3103 = vmatpush3.msra.mxu1 %v2262_v38 }
 0x2ad   :  { %3104 = vmatprep.subr.mxu1 %v3280_v22 }
 0x2ae   :  { %3105 = vmatpush3.msra.mxu1 %v2261_v43 }
 0x2af   :  { %3107 = vmatmul.mubr.msk.f32.vlgmr.msra.gmra.mxu1 %vm5323_vm13, %v4939_v54  ;;  %3120 = vmatprep.subr.mxu1 %v3280_v22 }
 0x2b0   :  { %3128 = vmatprep.mubr.msk.f32.mxu1 %vm3284_vm8, %v3280_v22  ;;  %3121 = vmatpush3.msra.mxu1 %v2430_v46 }
 0x2b1   :  { %3122 = vmatprep.subr.mxu1 %v3280_v22 }
 0x2b2   :  { %3123 = vmatpush3.msra.mxu1 %v2429_v55 }
 0x2b3   :  { %3124 = vmatprep.subr.mxu1 %v3280_v22 }
 0x2b4   :  { %3125 = vmatpush3.msra.mxu1 %v2428_v56 }
 0x2b5   :  { %3126 = vmatprep.subr.mxu1 %v3280_v22 }
 0x2b6   :  { %3127 = vmatpush3.msra.mxu1 %v2427_v60 }
 0x2b7   :  { %3129 = vmatmul.mubr.msk.f32.vlgmr.msra.gmra.mxu1 %vm5324_vm7, %v4939_v54 }
 0x31e   :  { %v2879_v8 = vpop.f32.mrf.mxu0  ;;  %v2917_v39 = vpop.f32.mrf.mxu1 }
 0x320   :  { %v2880_v42 = vpop.f32.mrf.mxu0  ;;  %v2918_v31 = vpop.f32.mrf.mxu1 }
 0x321   :  { %v2881_v59 = vadd.f32 %v2880_v42, %v2879_v8  ;;  %v2919_v61 = vadd.f32 %v2918_v31, %v2917_v39  ;;  %v1832_v4 = vpop.xlane.xlu0 %1831  ;;  %v2824_v8 = vld [vmem:[%s5057_s12 + $0x38] sm:$0xff]  ;;  %v2823_v39 = vld [vmem:[%s5057_s12 + $0x30] sm:$0xff]  ;;  %v2822_v42 = vld [vmem:[%s5057_s12 + $0x28] sm:$0xff] }
 0x322   :  { %v1833_v26 = vmax.f32 %v1832_v4, 1.0  ;;  %v2821_v31 = vld [vmem:[%s5057_s12 + $0x20] sm:$0xff] }
 0x323   :  { %v1663_v2 = vadd.f32 %v2919_v61, %v2881_v59 }
 0x324   :  { %3149 = vrcp.f32 %v1833_v26 }
 0x329   :  { %v2882_v27 = vpop.f32.mrf.mxu0  ;;  %v2920_v28 = vpop.f32.mrf.mxu1 }
 0x32b   :  { %v2883_v32 = vpop.f32.mrf.mxu0  ;;  %v2921_v52 = vpop.f32.mrf.mxu1 }
 0x32c   :  { %v2884_v10 = vadd.f32 %v2883_v32, %v2882_v27  ;;  %v2922_v11 = vadd.f32 %v2921_v52, %v2920_v28  ;;  %v2833_v27 = vld [vmem:[%s5057_s12 + $0x58] sm:$0xff]  ;;  %v2832_v28 = vld [vmem:[%s5057_s12 + $0x50] sm:$0xff]  ;;  %v2831_v32 = vld [vmem:[%s5057_s12 + $0x48] sm:$0xff] }
 0x32d   :  { %v2830_v52 = vld [vmem:[%s5057_s12 + $0x40] sm:$0xff] }
 0x32e   :  { %v1668_v3 = vadd.f32 %v2922_v11, %v2884_v10  ;;  %v2819_v10 = vld [vmem:[%s5060_s15] ss:$0 sm:$0xff]  ;;  %v2817_v11 = vld [vmem:[#allocation9] ss:$0 sm:$0xff] }
 0x331   :  { %v3150_v29 = vpop.eup %3149 }
 0x354   :  { %v2955_v5 = vpop.f32.mrf.mxu0  ;;  %v2993_v53 = vpop.f32.mrf.mxu1 }
 0x356   :  { %v2956_v57 = vpop.f32.mrf.mxu0  ;;  %v2994_v58 = vpop.f32.mrf.mxu1 }
 0x357   :  { %v2957_v16 = vadd.f32 %v2956_v57, %v2955_v5  ;;  %v2995_v6 = vadd.f32 %v2994_v58, %v2993_v53 }
 0x358   :  { %v2958_v14 = vpop.f32.mrf.mxu0  ;;  %v2996_v63 = vpop.f32.mrf.mxu1 }
 0x359   :  { %v1738_v25 = vadd.f32 %v2957_v16, %v1663_v2 }
 0x35a   :  { %v2959_v19 = vpop.f32.mrf.mxu0  ;;  %v2997_v20 = vpop.f32.mrf.mxu1 }
 0x35b   :  { %v2960_v51 = vadd.f32 %v2959_v19, %v2958_v14  ;;  %v2998_v41 = vadd.f32 %v2997_v20, %v2996_v63  ;;  %v1813_v23 = vadd.f32 %v2995_v6, %v1738_v25 }
 0x35d   :  { %v1743_v40 = vadd.f32 %v2960_v51, %v1668_v3  ;;  %v2825_v3 = vld [vmem:[#allocation9 + $0x1] ss:$0 sm:$0xff] }
 0x35f   :  { %v1818_v7 = vadd.f32 %v2998_v41, %v1743_v40  ;;  %v1982_v36 = vpop.f32.mrf.mxu1 }
 0x361   :  { %3048 = vmatpush3.msra.mxu0 %v1818_v7  ;;  %v3064_v12 = vpop.f32.mrf.mxu1 }
 0x362   :  { %3049 = vmatprep.subr.mxu0 %v3280_v22 }
 0x363   :  { %3050 = vmatpush3.msra.mxu0 %v1813_v23 }
 0x364   :  { %3052 = vmatmul.mubr.msk.f32.vlgmr.msra.gmra.mxu0 %vm1829_vm0, %v2811_v33  ;;  %3065 = vmatprep.subr.mxu0 %v3280_v22 }
 0x365   :  { %3073 = vmatprep.mubr.msk.f32.mxu0 %vm3284_vm8, %v3280_v22  ;;  %3066 = vmatpush3.msra.mxu0 %v2015_v13 }
 0x366   :  { %3067 = vmatprep.subr.mxu0 %v3280_v22 }
 0x367   :  { %3068 = vmatpush3.msra.mxu0 %v2014_v24  ;;  %v2173_v5 = vpop.f32.mrf.mxu1 }
 0x368   :  { %3069 = vmatprep.subr.mxu0 %v3280_v22  ;;  %v2174_v14 = vadd.f32 %v2819_v10, %v2173_v5 }
 0x369   :  { %3070 = vmatpush3.msra.mxu0 %v2013_v34  ;;  %v3086_v53 = vpop.f32.mrf.mxu1  ;;  %v2834_v34 = vld [vmem:[#allocation9 + $0x2] ss:$0 sm:$0xff] }
 0x36a   :  { %3071 = vmatprep.subr.mxu0 %v3280_v22 }
 0x36b   :  { %3072 = vmatpush3.msra.mxu0 %v2012_v35 }
 0x36c   :  { %3087 = vmatprep.subr.mxu0 %v3280_v22 }
 0x36f   :  { %v2339_v57 = vpop.f32.mrf.mxu1 }
 0x371   :  { %v3108_v58 = vpop.f32.mrf.mxu1 }
 0x377   :  { %v2505_v59 = vpop.f32.mrf.mxu1 }
 0x378   :  { %v2506_v18 = vadd.f32 %v2837_v17, %v2505_v59 }
 0x379   :  { %v3130_v61 = vpop.f32.mrf.mxu1 }
 0x424   :  { %v1903_v30 = vpop.f32.mrf.mxu0 }
 0x425   :  { %v1908_v48 = vmul.f32 %v3150_v29, %v1903_v30 }
 0x426   :  { %v3053_v49 = vpop.f32.mrf.mxu0 }
 0x427   :  { %v1986_v0 = vadd.f32 %v1982_v36, %v1908_v48 }
 0x429   :  { %v1994_v47 = vadd.f32 %v2814_v44, %v1986_v0 }
 0x42b   :  { %v2002_v50 = vmul.f32 %v2815_v62, %v1994_v47 }
 0x42d   :  { %v2010_v33 = vadd.f32 %v2816_v1, %v2002_v50 }
 0x42f   :  { %v2011_v45 = vmax.f32 %v2010_v33, 0.0 }
 0x431   :  { %3074 = vmatmul.mubr.msk.f32.vlgmr.msra.gmra.mxu0 %vm5325_vm15, %v2011_v45 }
 0x432   :  { %3088 = vmatpush3.msra.mxu0 %v2824_v8  ;;  %3095 = vmatprep.mubr.msk.f32.mxu0 %vm3284_vm8, %v3280_v22 }
 0x433   :  { %3089 = vmatprep.subr.mxu0 %v3280_v22 }
 0x434   :  { %3090 = vmatpush3.msra.mxu0 %v2823_v39 }
 0x435   :  { %3091 = vmatprep.subr.mxu0 %v3280_v22 }
 0x436   :  { %3092 = vmatpush3.msra.mxu0 %v2822_v42 }
 0x437   :  { %3093 = vmatprep.subr.mxu0 %v3280_v22 }
 0x438   :  { %3094 = vmatpush3.msra.mxu0 %v2821_v31 }
 0x439   :  { %3096 = vmatmul.mubr.msk.f32.vlgmr.msra.gmra.mxu0 %vm5326_vm3, %v2011_v45  ;;  %3109 = vmatprep.subr.mxu0 %v3280_v22 }
 0x43a   :  { %3110 = vmatpush3.msra.mxu0 %v2833_v27  ;;  %3117 = vmatprep.mubr.msk.f32.mxu0 %vm3284_vm8, %v3280_v22 }
 0x43b   :  { %3111 = vmatprep.subr.mxu0 %v3280_v22 }
 0x43c   :  { %3112 = vmatpush3.msra.mxu0 %v2832_v28 }
 0x43d   :  { %3113 = vmatprep.subr.mxu0 %v3280_v22 }
 0x43e   :  { %3114 = vmatpush3.msra.mxu0 %v2831_v32 }
 0x43f   :  { %3115 = vmatprep.subr.mxu0 %v3280_v22  ;;  %v2828_v22 = vld [vmem:[%s5060_s15 + $0x1] ss:$0 sm:$0xff] }
 0x440   :  { %3116 = vmatpush3.msra.mxu0 %v2830_v52  ;;  %v2340_v51 = vadd.f32 %v2828_v22, %v2339_v57 }
 0x441   :  { %3118 = vmatmul.mubr.msk.f32.vlgmr.msra.gmra.mxu0 %vm5327_vm10, %v2011_v45 }
 0x4f1   :  { %v2092_v63 = vpop.f32.mrf.mxu0 }
 0x4f2   :  { %v2093_v16 = vadd.f32 %v2817_v11, %v2092_v63 }
 0x4f3   :  { %v3075_v19 = vpop.f32.mrf.mxu0 }
 0x4f4   :  { %v2509_v20 = vadd.f32 %v2174_v14, %v2093_v16 }
 0x4f6   :  { %v2839_v2 = vmul.f32 -1.442695, %v2509_v20 }
 0x4f8   :  { %3151 = vpow2.f32 %v2839_v2 }
 0x4f9   :  { %v2256_v25 = vpop.f32.mrf.mxu0 }
 0x4fa   :  { %v2257_v40 = vadd.f32 %v2825_v3, %v2256_v25 }
 0x4fb   :  { %v3097_v41 = vpop.f32.mrf.mxu0 }
 0x4fc   :  { %v2516_v6 = vadd.f32 %v2340_v51, %v2257_v40 }
 0x4fe   :  { %v2840_v7 = vmul.f32 -1.442695, %v2516_v6 }
 0x500   :  { %3153 = vpow2.f32 %v2840_v7 }
 0x501   :  { %v2422_v23 = vpop.f32.mrf.mxu0 }
 0x502   :  { %v2423_v35 = vadd.f32 %v2834_v34, %v2422_v23 }
 0x503   :  { %v3119_v36 = vpop.f32.mrf.mxu0 }
 0x505   :  { %v3152_v37 = vpop.eup %3151 }
 0x506   :  { %v2513_v12 = vadd.f32 1.0, %v3152_v37 }
 0x508   :  { %3155 = vrcp.f32 %v2513_v12 }
 0x50d   :  { %v3154_v13 = vpop.eup %3153 }
 0x50e   :  { %v2520_v24 = vadd.f32 1.0, %v3154_v13 }
 0x510   :  { %3157 = vrcp.f32 %v2520_v24 }
 0x515   :  { %v3156_v21 = vpop.eup %3155 }
 0x516   :  { %v2523_v9 = vmul.f32 %v3156_v21, %v2506_v18 }
 0x518   :  { %v2524_v15 = vadd.f32 %v2523_v9, %v2423_v35 }
 0x51a   :  { %3159 = vtanh.f32 %v2524_v15 }
 0x51d   :  { %v3158_v38 = vpop.eup %3157 }
 0x51e   :  { %v2526_v43 = vsub.f32 1.0, %v3158_v38  ;;  %v2528_v55 = vmul.f32 %v4939_v54, %v3158_v38 }
 0x527   :  { %v3160_v46 = vpop.eup %3159 }
 0x528   :  { %v2527_v56 = vmul.f32 %v3160_v46, %v2526_v43 }
 0x52a   :  { %v2529_v60 = vadd.f32 %v2528_v55, %v2527_v56 }
 0x52c   :  { %2530 = vst.msk [vmem:[%s5061_s16] sm:$0xff] %vm5328_vm11, %v2529_v60 }
 0x52d   :  { %2535 = vsyncpa [#allocation3], 1 }
 0x52e   :  { %2536 = vsyncpa [#allocation5], 1 }
 0x52f   :  { %2537 = vsyncpa [#allocation8], 1 }

// kernel: mpnn_forward.7
= control target key start
LH: loop header
LB: loop body
LE: loop exit
PB: predicated region body
PF: predicated region fallthrough
CT: control target
= control target key end

     0   :  { %vm71_vm0 = vcmask 1043456   ;;  %vm64_vm1 = vcmask 31744   ;;  %v3093_v3 = vmov 0   ;;  %v3094_v22 = vmov 0.0   ;;  %s3097_s30 = smov 32   ;;  %s5001_s4 = inlined_call_operand.vmem [shape: f32[4,32], index: 4, kind: input, shape index: {}]   ;;  %s5002_s1 = inlined_call_operand.vmem [shape: f32[16,4], index: 1, kind: input, shape index: {}]   ;;  %s5003_s2 = inlined_call_operand.vmem [shape: s32[16,1], index: 2, kind: input, shape index: {}]   ;;  %s5004_s6 = inlined_call_operand.vmem [shape: f32[32,1024], index: 6, kind: input, shape index: {}]   ;;  %s5005_s5 = inlined_call_operand.vmem [shape: f32[1,32], index: 5, kind: input, shape index: {}]   ;;  %s5006_s0 = inlined_call_operand.vmem [shape: f32[8,32], index: 0, kind: input, shape index: {}]   ;;  %s5007_s7 = inlined_call_operand.vmem [shape: f32[1,1024], index: 7, kind: input, shape index: {}]   ;;  %s5008_s8 = inlined_call_operand.vmem [shape: f32[32,32], index: 8, kind: input, shape index: {}]   ;;  %s5009_s3 = inlined_call_operand.vmem [shape: s32[1,16], index: 3, kind: input, shape index: {}]   ;;  %s5010_s13 = inlined_call_operand.vmem [shape: f32[3,32,32], index: 13, kind: input, shape index: {}]   ;;  %s5011_s12 = inlined_call_operand.vmem [shape: f32[3,32,32], index: 12, kind: input, shape index: {}]   ;;  %s5012_s9 = inlined_call_operand.vmem [shape: f32[1,32], index: 9, kind: input, shape index: {}]   ;;  %s5013_s10 = inlined_call_operand.vmem [shape: f32[1,32], index: 10, kind: input, shape index: {}]   ;;  %s5014_s11 = inlined_call_operand.vmem [shape: f32[1,32], index: 11, kind: input, shape index: {}]   ;;  %s5015_s15 = inlined_call_operand.vmem [shape: f32[3,1,32], index: 15, kind: input, shape index: {}]   ;;  %s5016_s14 = inlined_call_operand.vmem [shape: f32[3,1,32], index: 14, kind: input, shape index: {}]   ;;  %s5017_s16 = inlined_call_operand.vmem [shape: f32[8,32], index: 16, kind: output, shape index: {}]  }
   0x1   :  { %5019 = sst [smem:[#allocation2_spill]] %s5001_s4  ;;  %v54_v1 = vld [vmem:[%s5002_s1] sm:$0xff]  ;;  %v55_v2 = vld [vmem:[%s5002_s1 + $0x8] sm:$0xff]  ;;  %3079 = vset.pattern.permute.xlu0 %v3093_v3  ;;  %v179_v6 = vld [vmem:[%s5004_s6 + $0xd8] sm:$0xff]  ;;  %297 = vmatprep.mubr.f32.mxu1 %v3094_v22  ;;  %vm5018_vm2 = vcmask 261120   ;;  %v186_v37 = vlaneseq  ;;  %vm557_vm4 = vcmask 64512  }
   0x2   :  { %s5020_s23 = sld [smem:[#allocation2_spill]]  ;;  %2980 = vmatprep.mubr.msk.f32.mxu0 %vm64_vm1, %v54_v1  ;;  %v543_v4 = vld [vmem:[%s5003_s2] sm:$0xff]  ;;  %v177_v5 = vld [vmem:[%s5004_s6 + $0xc8] sm:$0xff]  ;;  %v178_v9 = vld [vmem:[%s5004_s6 + $0xd0] sm:$0xff]  ;;  %s3098_s4 = smov 64  }
   0x3   :  { %546 = vperm.xlu0 %3079, %v543_v4   ;;  %v544_v7 = vld [vmem:[%s5003_s2 + $0x8] sm:$0xff]  ;;  %257 = vmatprep.subr.mxu1 %v177_v5  ;;  %v176_v8 = vld [vmem:[%s5004_s6 + $0xc0] sm:$0xff]  ;;  %v171_v11 = vld [vmem:[%s5004_s6 + $0x98] sm:$0xff]  ;;  %v542_v45 = vand.u32 127, %v186_v37  ;;  %v3320_v54 = vshrl.u32 %v186_v37, 7 }
   0x4   :  { %258 = vmatpush1.msra.mxu1 %v176_v8  ;;  %v169_v10 = vld [vmem:[%s5004_s6 + $0x88] sm:$0xff]  ;;  %v168_v12 = vld [vmem:[%s5004_s6 + $0x80] sm:$0xff]  ;;  %v170_v13 = vld [vmem:[%s5004_s6 + $0x90] sm:$0xff] }
   0x5   :  { %259 = vmatprep.subr.mxu1 %v169_v10  ;;  %v161_v14 = vld [vmem:[%s5004_s6 + $0x48] sm:$0xff]  ;;  %v163_v15 = vld [vmem:[%s5004_s6 + $0x58] sm:$0xff]  ;;  %v160_v16 = vld [vmem:[%s5004_s6 + $0x40] sm:$0xff]  ;;  %v941_v53 = vadd.s32 1, %v542_v45  ;;  %v3322_v55 = vmul.u32 32, %v542_v45  ;;  %v715_v57 = vadd.s32 248, %v3320_v54 }
   0x6   :  { %260 = vmatpush1.msra.mxu1 %v168_v12  ;;  %v162_v17 = vld [vmem:[%s5004_s6 + $0x50] sm:$0xff]  ;;  %v153_v18 = vld [vmem:[%s5004_s6 + $0x8] sm:$0xff]  ;;  %v155_v19 = vld [vmem:[%s5004_s6 + $0x18] sm:$0xff]  ;;  %v747_v58 = vadd.s32 504, %v3320_v54  ;;  %v699_v59 = vadd.s32 120, %v3320_v54  ;;  %v731_v60 = vadd.s32 376, %v3320_v54 }
   0x7   :  { %549 = vperm.xlu0 %3079, %v544_v7   ;;  %261 = vmatprep.subr.mxu1 %v161_v14  ;;  %v152_v20 = vld [vmem:[%s5004_s6] sm:$0xff]  ;;  %v154_v21 = vld [vmem:[%s5004_s6 + $0x10] sm:$0xff]  ;;  %v181_v23 = vld [vmem:[%s5004_s6 + $0xe8] sm:$0xff]  ;;  %v3324_v56 = vmul.u32 32, %v941_v53  ;;  %v714_v61 = vadd.s32 240, %v3320_v54  ;;  %v746_v62 = vadd.s32 496, %v3320_v54  ;;  %vm844_vm6 = vcmp.ge.s32.totalorder %v715_v57, %v3322_v55 }
   0x8   :  { %v56_v0 = vld [vmem:[%s5020_s23] sm:$0xf]  ;;  %262 = vmatpush1.msra.mxu1 %v160_v16  ;;  %v183_v24 = vld [vmem:[%s5004_s6 + $0xf8] sm:$0xff]  ;;  %v182_v31 = vld [vmem:[%s5004_s6 + $0xf0] sm:$0xff]  ;;  %v698_v63 = vadd.s32 112, %v3320_v54  ;;  %vm876_vm8 = vcmp.ge.s32.totalorder %v747_v58, %v3322_v55  ;;  %vm828_vm11 = vcmp.ge.s32.totalorder %v699_v59, %v3322_v55  ;;  %vm860_vm13 = vcmp.ge.s32.totalorder %v731_v60, %v3322_v55 }
   0x9   :  { %2978 = vmatprep.subr.msk.mxu0 %vm71_vm0, %v56_v0  ;;  %263 = vmatprep.subr.mxu1 %v153_v18  ;;  %v2469_v26 = vld [vmem:[%s5005_s5] ss:$0 sm:$0xff]  ;;  %v173_v33 = vld [vmem:[%s5004_s6 + $0xa8] sm:$0xff]  ;;  %v175_v34 = vld [vmem:[%s5004_s6 + $0xb8] sm:$0xff]  ;;  %vm974_vm7 = vcmp.lt.s32.totalorder %v715_v57, %v3324_v56  ;;  %vm1006_vm9 = vcmp.lt.s32.totalorder %v747_v58, %v3324_v56  ;;  %vm958_vm12 = vcmp.lt.s32.totalorder %v699_v59, %v3324_v56  ;;  %v730_v1 = vadd.s32 368, %v3320_v54 }
   0xa   :  { %2979 = vmatpush3.msk.msra.mxu0 %vm71_vm0, %v56_v0  ;;  %264 = vmatpush1.msra.mxu1 %v152_v20  ;;  %v180_v30 = vld [vmem:[%s5004_s6 + $0xe0] sm:$0xff]  ;;  %v174_v36 = vld [vmem:[%s5004_s6 + $0xb0] sm:$0xff]  ;;  %v165_v39 = vld [vmem:[%s5004_s6 + $0x68] sm:$0xff]  ;;  %vm990_vm14 = vcmp.lt.s32.totalorder %v731_v60, %v3324_v56  ;;  %v3095_v0 = vmov 1.0   ;;  %vm843_vm0 = vcmp.ge.s32.totalorder %v714_v61, %v3322_v55  ;;  %v745_v3 = vadd.s32 488, %v3320_v54 }
   0xb   :  { %2981 = vmatmul.mubr.msk.f32.vlgmr.msra.gmra.mxu0 %vm64_vm1, %v55_v2  ;;  %334 = vmatprep.subr.mxu0 %v179_v6  ;;  %v172_v35 = vld [vmem:[%s5004_s6 + $0xa0] sm:$0xff]  ;;  %v167_v40 = vld [vmem:[%s5004_s6 + $0x78] sm:$0xff]  ;;  %v166_v42 = vld [vmem:[%s5004_s6 + $0x70] sm:$0xff]  ;;  %vm973_vm1 = vcmp.lt.s32.totalorder %v714_v61, %v3324_v56  ;;  %v713_v2 = vadd.s32 232, %v3320_v54  ;;  %v697_v4 = vadd.s32 104, %v3320_v54  ;;  %v729_v5 = vadd.s32 360, %v3320_v54 }
   0xc   :  { %335 = vmatpush1.msra.mxu0 %v178_v9  ;;  %374 = vmatprep.mubr.f32.mxu0 %v3094_v22  ;;  %v164_v41 = vld [vmem:[%s5004_s6 + $0x60] sm:$0xff]  ;;  %v157_v43 = vld [vmem:[%s5004_s6 + $0x28] sm:$0xff]  ;;  %v159_v44 = vld [vmem:[%s5004_s6 + $0x38] sm:$0xff]  ;;  %v712_v6 = vadd.s32 224, %v3320_v54  ;;  %v744_v7 = vadd.s32 480, %v3320_v54  ;;  %v696_v8 = vadd.s32 96, %v3320_v54 }
   0xd   :  { %336 = vmatprep.subr.mxu0 %v171_v11  ;;  %411 = vmatprep.subr.mxu1 %v181_v23  ;;  %v156_v47 = vld [vmem:[%s5004_s6 + $0x20] sm:$0xff]  ;;  %v158_v48 = vld [vmem:[%s5004_s6 + $0x30] sm:$0xff]  ;;  %vm1102_vm10 = vmand %vm844_vm6, %vm974_vm7  ;;  %vm827_vm7 = vcmp.ge.s32.totalorder %v698_v63, %v3322_v55  ;;  %v728_v9 = vadd.s32 352, %v3320_v54  ;;  %v711_v10 = vadd.s32 216, %v3320_v54  ;;  %v743_v11 = vadd.s32 472, %v3320_v54  ;;  %s3096_s6 = smov 96  }
   0xe   :  { %337 = vmatpush1.msra.mxu0 %v170_v13  ;;  %v53_v49 = vld [vmem:[%s5006_s0] sm:$0xff]  ;;  %vm1134_vm15 = vmand %vm876_vm8, %vm1006_vm9  ;;  %vm957_vm8 = vcmp.lt.s32.totalorder %v698_v63, %v3324_v56  ;;  %v695_v12 = vadd.s32 88, %v3320_v54  ;;  %v727_v13 = vadd.s32 344, %v3320_v54  ;;  %v710_v14 = vadd.s32 208, %v3320_v54 }
   0xf   :  { %338 = vmatprep.subr.mxu0 %v163_v15  ;;  %vm1118_vm6 = vmand %vm860_vm13, %vm990_vm14  ;;  %vm842_vm13 = vcmp.ge.s32.totalorder %v713_v2, %v3322_v55  ;;  %vm972_vm14 = vcmp.lt.s32.totalorder %v713_v2, %v3324_v56  ;;  %v742_v15 = vadd.s32 464, %v3320_v54  ;;  %v694_v16 = vadd.s32 80, %v3320_v54 }
  0x10   :  { %339 = vmatpush1.msra.mxu0 %v162_v17  ;;  %vm1101_vm9 = vmand %vm843_vm0, %vm973_vm1  ;;  %vm874_vm0 = vcmp.ge.s32.totalorder %v745_v3, %v3322_v55  ;;  %vm1004_vm1 = vcmp.lt.s32.totalorder %v745_v3, %v3324_v56  ;;  %v726_v17 = vadd.s32 336, %v3320_v54  ;;  %v709_v18 = vadd.s32 200, %v3320_v54 }
  0x11   :  { %340 = vmatprep.subr.mxu0 %v155_v19  ;;  %v741_v19 = vadd.s32 456, %v3320_v54  ;;  %v693_v20 = vadd.s32 72, %v3320_v54  ;;  %v708_v23 = vadd.s32 192, %v3320_v54  ;;  %v689_v37 = vadd.s32 40, %v3320_v54 }
  0x12   :  { %341 = vmatpush1.msra.mxu0 %v154_v21  ;;  %v725_v21 = vadd.s32 328, %v3320_v54  ;;  %v686_v53 = vadd.s32 16, %v3320_v54  ;;  %v718_v57 = vadd.s32 272, %v3320_v54  ;;  %v701_v58 = vadd.s32 136, %v3320_v54 }
  0x13   :  { %488 = vmatprep.subr.mxu0 %v183_v24  ;;  %v740_v24 = vadd.s32 448, %v3320_v54  ;;  %v733_v59 = vadd.s32 392, %v3320_v54  ;;  %v685_v63 = vadd.s32 8, %v3320_v54  ;;  %v700_v2 = vadd.s32 128, %v3320_v54 }
  0x14   :  { %v732_v3 = vadd.s32 384, %v3320_v54 }
  0x7e   :  { %v547_v46 = vpop.permute.xlu0 %546 }
  0x7f   :  { %vm551_vm3 = vcmp.eq.s32.totalorder %v542_v45, %v547_v46  ;;  %v703_v46 = vadd.s32 152, %v3320_v54 }
  0x80   :  { %v2481_v51 = vsel %vm551_vm3, 1.0, %v3094_v22  ;;  %vm1086_vm3 = vmand %vm828_vm11, %vm958_vm12  ;;  %vm989_vm11 = vcmp.lt.s32.totalorder %v730_v1, %v3324_v56 }
  0x82   :  { %v550_v50 = vpop.permute.xlu0 %549 }
  0x83   :  { %vm552_vm5 = vcmp.eq.s32.totalorder %v542_v45, %v550_v50 }
  0x84   :  { %v2482_v52 = vsel %vm552_vm5, 1.0, %v3094_v22  ;;  %vm1005_vm5 = vcmp.lt.s32.totalorder %v746_v62, %v3324_v56 }
  0xcb   :  { %v2982_v25 = vpop.f32.mrf.mxu0 }
  0xcc   :  { %v147_v32 = vadd.f32 %v2982_v25, %v2469_v26  ;;  %v692_v25 = vadd.s32 64, %v3320_v54 }
  0xcd   :  { %v141_v27 = vpop.f32.mrf.mxu0 }
  0xce   :  { %v142_v28 = vadd.f32 %v2469_v26, %v141_v27  ;;  %v151_v38 = vmax.f32 %v147_v32, 0.0  ;;  %v724_v26 = vadd.s32 320, %v3320_v54  ;;  %v707_v27 = vadd.s32 184, %v3320_v54 }
  0xcf   :  { %v738_v32 = vadd.s32 432, %v3320_v54 }
  0xd0   :  { %v150_v29 = vmax.f32 %v142_v28, 0.0  ;;  %v739_v28 = vadd.s32 440, %v3320_v54 }
  0xd2   :  { %2473 = vmatmul.mubr.msk.f32.vlgmr.msra.gmra.mxu1 %vm5018_vm2, %v150_v29  ;;  %2475 = vmatmul.mubr.msk.f32.vlgmr.msra.gmra.mxu0 %vm5018_vm2, %v150_v29 }
  0xd3   :  { %412 = vmatpush1.msra.mxu1 %v180_v30  ;;  %489 = vmatpush1.msra.mxu0 %v182_v31  ;;  %v723_v30 = vadd.s32 312, %v3320_v54  ;;  %v706_v31 = vadd.s32 176, %v3320_v54 }
  0xd4   :  { %413 = vmatprep.subr.mxu1 %v173_v33  ;;  %490 = vmatprep.subr.mxu0 %v175_v34  ;;  %v690_v33 = vadd.s32 48, %v3320_v54  ;;  %v722_v34 = vadd.s32 304, %v3320_v54 }
  0xd5   :  { %303 = vmatprep.mubr.f32.mxu1 %v3094_v22  ;;  %380 = vmatprep.mubr.f32.mxu0 %v3094_v22 }
  0xd6   :  { %414 = vmatpush1.msra.mxu1 %v172_v35  ;;  %491 = vmatpush1.msra.mxu0 %v174_v36  ;;  %v705_v35 = vadd.s32 168, %v3320_v54  ;;  %v737_v36 = vadd.s32 424, %v3320_v54 }
  0xd7   :  { %2474 = vmatmul.mubr.msk.f32.gmra.mxu1 %vm5018_vm2, %v151_v38  ;;  %2476 = vmatmul.mubr.msk.f32.gmra.mxu0 %vm5018_vm2, %v151_v38 }
  0xd8   :  { %415 = vmatprep.subr.mxu1 %v165_v39  ;;  %492 = vmatprep.subr.mxu0 %v167_v40  ;;  %v704_v39 = vadd.s32 160, %v3320_v54  ;;  %v736_v40 = vadd.s32 416, %v3320_v54 }
  0xd9   :  { %416 = vmatpush1.msra.mxu1 %v164_v41  ;;  %493 = vmatpush1.msra.mxu0 %v166_v42  ;;  %v688_v41 = vadd.s32 32, %v3320_v54  ;;  %v720_v42 = vadd.s32 288, %v3320_v54 }
  0xda   :  { %417 = vmatprep.subr.mxu1 %v157_v43  ;;  %494 = vmatprep.subr.mxu0 %v159_v44 }
  0xdb   :  { %418 = vmatpush1.msra.mxu1 %v156_v47  ;;  %451 = vmatprep.mubr.f32.mxu1 %v3094_v22  ;;  %v735_v47 = vadd.s32 408, %v3320_v54 }
  0xdc   :  { %495 = vmatpush1.msra.mxu0 %v158_v48  ;;  %528 = vmatprep.mubr.f32.mxu0 %v3094_v22  ;;  %v687_v48 = vadd.s32 24, %v3320_v54 }
  0xdd   :  { %2477 = vmatmul.mubr.msk.f32.vlgmr.msra.gmra.mxu1 %vm5018_vm2, %v150_v29  ;;  %2479 = vmatmul.mubr.msk.f32.vlgmr.msra.gmra.mxu0 %vm5018_vm2, %v150_v29  ;;  %v691_v29 = vadd.s32 56, %v3320_v54 }
  0xde   :  { %457 = vmatprep.mubr.f32.mxu1 %v3094_v22  ;;  %534 = vmatprep.mubr.f32.mxu0 %v3094_v22 }
  0xdf   :  { %2983 = vmatprep.subr.mxu1 %v53_v49  ;;  %2788 = vmatprep.subr.msk.mxu0 %vm1102_vm10, %v3095_v0  ;;  %vm859_vm10 = vcmp.ge.s32.totalorder %v730_v1, %v3322_v55  ;;  %v717_v1 = vadd.s32 264, %v3320_v54 }
  0xe0   :  { %2984 = vmatpush3.msra.mxu1 %v53_v49  ;;  %2789 = vmatpush3.msk.msra.mxu0 %vm1086_vm3, %v3095_v0  ;;  %vm1117_vm3 = vmand %vm859_vm10, %vm989_vm11  ;;  %vm841_vm10 = vcmp.ge.s32.totalorder %v712_v6, %v3322_v55  ;;  %vm971_vm11 = vcmp.lt.s32.totalorder %v712_v6, %v3324_v56  ;;  %v719_v49 = vadd.s32 280, %v3320_v54  ;;  %v716_v6 = vadd.s32 256, %v3320_v54 }
  0xe1   :  { %2478 = vmatmul.mubr.msk.f32.gmra.mxu1 %vm5018_vm2, %v151_v38  ;;  %2480 = vmatmul.mubr.msk.f32.gmra.mxu0 %vm5018_vm2, %v151_v38  ;;  %v721_v38 = vadd.s32 296, %v3320_v54  ;;  %vm947_vm2 = vcmp.lt.s32.totalorder %v688_v41, %v3324_v56 }
  0xe2   :  { %2985 = vmatprep.mubr.msk.f32.mxu1 %vm557_vm4, %v2481_v51  ;;  %2826 = vmatprep.subr.msk.mxu1 %vm1134_vm15, %v3095_v0  ;;  %vm1085_vm15 = vmand %vm827_vm7, %vm957_vm8  ;;  %vm858_vm7 = vcmp.ge.s32.totalorder %v729_v5, %v3322_v55  ;;  %vm988_vm8 = vcmp.lt.s32.totalorder %v729_v5, %v3324_v56  ;;  %v702_v51 = vadd.s32 144, %v3320_v54 }
  0xe3   :  { %2790 = vmatprep.subr.msk.mxu0 %vm1101_vm9, %v3095_v0  ;;  %vm1132_vm9 = vmand %vm874_vm0, %vm1004_vm1  ;;  %vm825_vm0 = vcmp.ge.s32.totalorder %v696_v8, %v3322_v55  ;;  %vm955_vm1 = vcmp.lt.s32.totalorder %v696_v8, %v3324_v56  ;;  %v811_v8 = vadd.s32 1016, %v3320_v54 }
  0xe4   :  { %2791 = vmatpush3.msk.msra.mxu0 %vm1085_vm15, %v3095_v0  ;;  %vm1116_vm15 = vmand %vm858_vm7, %vm988_vm8  ;;  %vm840_vm7 = vcmp.ge.s32.totalorder %v711_v10, %v3322_v55  ;;  %vm970_vm8 = vcmp.lt.s32.totalorder %v711_v10, %v3324_v56 }
  0xe5   :  { %2986 = vmatmul.mubr.msk.f32.vlgmr.msra.gmra.mxu1 %vm557_vm4, %v2482_v52  ;;  %vm875_vm4 = vcmp.ge.s32.totalorder %v746_v62, %v3322_v55  ;;  %v734_v52 = vadd.s32 400, %v3320_v54 }
  0xe6   :  { %2827 = vmatpush3.msk.msra.mxu1 %vm1118_vm6, %v3095_v0  ;;  %vm1133_vm12 = vmand %vm875_vm4, %vm1005_vm5  ;;  %vm826_vm4 = vcmp.ge.s32.totalorder %v697_v4, %v3322_v55  ;;  %vm956_vm5 = vcmp.lt.s32.totalorder %v697_v4, %v3324_v56 }
  0xe7   :  { %2828 = vmatprep.subr.msk.mxu1 %vm1133_vm12, %v3095_v0  ;;  %vm1100_vm6 = vmand %vm842_vm13, %vm972_vm14  ;;  %vm873_vm13 = vcmp.ge.s32.totalorder %v744_v7, %v3322_v55  ;;  %vm1003_vm14 = vcmp.lt.s32.totalorder %v744_v7, %v3324_v56  ;;  %v779_v7 = vadd.s32 760, %v3320_v54 }
  0xe8   :  { %2829 = vmatpush3.msk.msra.mxu1 %vm1117_vm3, %v3095_v0  ;;  %2792 = vmatprep.subr.msk.mxu0 %vm1100_vm6, %v3095_v0  ;;  %vm1084_vm12 = vmand %vm826_vm4, %vm956_vm5  ;;  %vm857_vm4 = vcmp.ge.s32.totalorder %v728_v9, %v3322_v55  ;;  %vm987_vm5 = vcmp.lt.s32.totalorder %v728_v9, %v3324_v56 }
  0xe9   :  { %2830 = vmatprep.subr.msk.mxu1 %vm1132_vm9, %v3095_v0  ;;  %2793 = vmatpush3.msk.msra.mxu0 %vm1084_vm12, %v3095_v0  ;;  %vm1099_vm3 = vmand %vm841_vm10, %vm971_vm11  ;;  %vm872_vm10 = vcmp.ge.s32.totalorder %v743_v11, %v3322_v55  ;;  %vm1002_vm11 = vcmp.lt.s32.totalorder %v743_v11, %v3324_v56 }
  0xea   :  { %2831 = vmatpush3.msk.msra.mxu1 %vm1116_vm15, %v3095_v0  ;;  %2794 = vmatprep.subr.msk.mxu0 %vm1099_vm3, %v3095_v0  ;;  %vm1131_vm6 = vmand %vm873_vm13, %vm1003_vm14  ;;  %vm824_vm13 = vcmp.ge.s32.totalorder %v695_v12, %v3322_v55  ;;  %vm954_vm14 = vcmp.lt.s32.totalorder %v695_v12, %v3324_v56 }
  0xeb   :  { %2832 = vmatprep.subr.msk.mxu1 %vm1131_vm6, %v3095_v0  ;;  %vm1083_vm9 = vmand %vm825_vm0, %vm955_vm1  ;;  %vm856_vm0 = vcmp.ge.s32.totalorder %v727_v13, %v3322_v55  ;;  %vm986_vm1 = vcmp.lt.s32.totalorder %v727_v13, %v3324_v56  ;;  %v188_v13 = vsub.s32 0, %v3320_v54 }
  0xec   :  { %2795 = vmatpush3.msk.msra.mxu0 %vm1083_vm9, %v3095_v0  ;;  %vm1115_vm12 = vmand %vm857_vm4, %vm987_vm5  ;;  %vm839_vm4 = vcmp.ge.s32.totalorder %v710_v14, %v3322_v55  ;;  %vm969_vm5 = vcmp.lt.s32.totalorder %v710_v14, %v3324_v56  ;;  %v196_v14 = vsub.s32 2, %v3320_v54 }
  0xed   :  { %2833 = vmatpush3.msk.msra.mxu1 %vm1115_vm12, %v3095_v0  ;;  %vm1098_vm15 = vmand %vm840_vm7, %vm970_vm8  ;;  %vm871_vm7 = vcmp.ge.s32.totalorder %v742_v15, %v3322_v55  ;;  %vm1001_vm8 = vcmp.lt.s32.totalorder %v742_v15, %v3324_v56  ;;  %v3632_v15 = vld [vmem:[%s5007_s7] sm:$0xff] }
  0xee   :  { %2796 = vmatprep.subr.msk.mxu0 %vm1098_vm15, %v3095_v0  ;;  %vm1130_vm3 = vmand %vm872_vm10, %vm1002_vm11  ;;  %vm823_vm10 = vcmp.ge.s32.totalorder %v694_v16, %v3322_v55  ;;  %vm953_vm11 = vcmp.lt.s32.totalorder %v694_v16, %v3324_v56  ;;  %v192_v16 = vsub.s32 1, %v3320_v54 }
  0xef   :  { %2834 = vmatprep.subr.msk.mxu1 %vm1130_vm3, %v3095_v0  ;;  %vm1082_vm6 = vmand %vm824_vm13, %vm954_vm14  ;;  %vm855_vm13 = vcmp.ge.s32.totalorder %v726_v17, %v3322_v55  ;;  %vm985_vm14 = vcmp.lt.s32.totalorder %v726_v17, %v3324_v56  ;;  %v200_v17 = vsub.s32 3, %v3320_v54 }
  0xf0   :  { %2797 = vmatpush3.msk.msra.mxu0 %vm1082_vm6, %v3095_v0  ;;  %vm1114_vm9 = vmand %vm856_vm0, %vm986_vm1  ;;  %vm838_vm0 = vcmp.ge.s32.totalorder %v709_v18, %v3322_v55  ;;  %vm968_vm1 = vcmp.lt.s32.totalorder %v709_v18, %v3324_v56 }
  0xf1   :  { %2835 = vmatpush3.msk.msra.mxu1 %vm1114_vm9, %v3095_v0  ;;  %vm1097_vm12 = vmand %vm839_vm4, %vm969_vm5  ;;  %vm870_vm4 = vcmp.ge.s32.totalorder %v741_v19, %v3322_v55  ;;  %vm1000_vm5 = vcmp.lt.s32.totalorder %v741_v19, %v3324_v56  ;;  %v189_v19 = vrot.slane %v3632_v15, %v188_v13  ;;  %v3845_v13 = vadd.s32 840, %v3320_v54 }
  0xf2   :  { %2798 = vmatprep.subr.msk.mxu0 %vm1097_vm12, %v3095_v0  ;;  %vm1129_vm15 = vmand %vm871_vm7, %vm1001_vm8  ;;  %vm822_vm7 = vcmp.ge.s32.totalorder %v693_v20, %v3322_v55  ;;  %vm952_vm8 = vcmp.lt.s32.totalorder %v693_v20, %v3324_v56  ;;  %v197_v20 = vrot.slane %v3632_v15, %v196_v14  ;;  %v782_v14 = vadd.s32 784, %v3320_v54 }
  0xf3   :  { %2836 = vmatprep.subr.msk.mxu1 %vm1129_vm15, %v3095_v0  ;;  %vm1081_vm3 = vmand %vm823_vm10, %vm953_vm11  ;;  %vm854_vm10 = vcmp.ge.s32.totalorder %v725_v21, %v3322_v55  ;;  %vm984_vm11 = vcmp.lt.s32.totalorder %v725_v21, %v3324_v56  ;;  %v208_v21 = vsub.s32 5, %v3320_v54 }
  0xf4   :  { %2799 = vmatpush3.msk.msra.mxu0 %vm1081_vm3, %v3095_v0  ;;  %vm1113_vm6 = vmand %vm855_vm13, %vm985_vm14  ;;  %vm837_vm13 = vcmp.ge.s32.totalorder %v708_v23, %v3322_v55  ;;  %vm967_vm14 = vcmp.lt.s32.totalorder %v708_v23, %v3324_v56  ;;  %v216_v23 = vsub.s32 7, %v3320_v54 }
  0xf5   :  { %2837 = vmatpush3.msk.msra.mxu1 %vm1113_vm6, %v3095_v0  ;;  %vm1096_vm9 = vmand %vm838_vm0, %vm968_vm1  ;;  %vm869_vm0 = vcmp.ge.s32.totalorder %v740_v24, %v3322_v55  ;;  %vm999_vm1 = vcmp.lt.s32.totalorder %v740_v24, %v3324_v56  ;;  %v193_v24 = vrot.slane %v3632_v15, %v192_v16  ;;  %v765_v16 = vadd.s32 648, %v3320_v54 }
  0xf6   :  { %2800 = vmatprep.subr.msk.mxu0 %vm1096_vm9, %v3095_v0  ;;  %vm1128_vm12 = vmand %vm870_vm4, %vm1000_vm5  ;;  %vm821_vm4 = vcmp.ge.s32.totalorder %v692_v25, %v3322_v55  ;;  %vm951_vm5 = vcmp.lt.s32.totalorder %v692_v25, %v3324_v56  ;;  %v201_v25 = vrot.slane %v3632_v15, %v200_v17  ;;  %v3876_v17 = vadd.s32 704, %v3320_v54 }
  0xf7   :  { %2838 = vmatprep.subr.msk.mxu1 %vm1128_vm12, %v3095_v0  ;;  %vm1080_vm15 = vmand %vm822_vm7, %vm952_vm8  ;;  %vm853_vm7 = vcmp.ge.s32.totalorder %v724_v26, %v3322_v55  ;;  %vm983_vm8 = vcmp.lt.s32.totalorder %v724_v26, %v3324_v56 }
  0xf8   :  { %2801 = vmatpush3.msk.msra.mxu0 %vm1080_vm15, %v3095_v0  ;;  %vm1112_vm3 = vmand %vm854_vm10, %vm984_vm11  ;;  %vm836_vm10 = vcmp.ge.s32.totalorder %v707_v27, %v3322_v55  ;;  %vm966_vm11 = vcmp.lt.s32.totalorder %v707_v27, %v3324_v56 }
  0xf9   :  { %2839 = vmatpush3.msk.msra.mxu1 %vm1112_vm3, %v3095_v0  ;;  %vm1095_vm6 = vmand %vm837_vm13, %vm967_vm14  ;;  %vm868_vm13 = vcmp.ge.s32.totalorder %v739_v28, %v3322_v55  ;;  %vm998_vm14 = vcmp.lt.s32.totalorder %v739_v28, %v3324_v56 }
  0xfa   :  { %2802 = vmatprep.subr.msk.mxu0 %vm1095_vm6, %v3095_v0  ;;  %vm1127_vm9 = vmand %vm869_vm0, %vm999_vm1  ;;  %vm820_vm0 = vcmp.ge.s32.totalorder %v691_v29, %v3322_v55  ;;  %vm950_vm1 = vcmp.lt.s32.totalorder %v691_v29, %v3324_v56  ;;  %v3650_v29 = vrot.slane %v3632_v15, %v208_v21  ;;  %v3910_v21 = vadd.s32 576, %v3320_v54 }
  0xfb   :  { %2840 = vmatprep.subr.msk.mxu1 %vm1127_vm9, %v3095_v0  ;;  %vm1079_vm12 = vmand %vm821_vm4, %vm951_vm5  ;;  %vm852_vm4 = vcmp.ge.s32.totalorder %v723_v30, %v3322_v55  ;;  %vm982_vm5 = vcmp.lt.s32.totalorder %v723_v30, %v3324_v56  ;;  %v3653_v30 = vrot.slane %v3632_v15, %v216_v23  ;;  %v5117_v23 = vmov 0 }
  0xfc   :  { %2803 = vmatpush3.msk.msra.mxu0 %vm1079_vm12, %v3095_v0  ;;  %vm1111_vm15 = vmand %vm853_vm7, %vm983_vm8  ;;  %vm835_vm7 = vcmp.ge.s32.totalorder %v706_v31, %v3322_v55  ;;  %vm965_vm8 = vcmp.lt.s32.totalorder %v706_v31, %v3324_v56 }
  0xfd   :  { %2841 = vmatpush3.msk.msra.mxu1 %vm1111_vm15, %v3095_v0  ;;  %vm1094_vm3 = vmand %vm836_vm10, %vm966_vm11  ;;  %vm867_vm10 = vcmp.ge.s32.totalorder %v738_v32, %v3322_v55  ;;  %vm997_vm11 = vcmp.lt.s32.totalorder %v738_v32, %v3324_v56 }
  0xfe   :  { %2804 = vmatprep.subr.msk.mxu0 %vm1094_vm3, %v3095_v0  ;;  %vm1126_vm6 = vmand %vm868_vm13, %vm998_vm14  ;;  %vm819_vm13 = vcmp.ge.s32.totalorder %v690_v33, %v3322_v55  ;;  %vm949_vm14 = vcmp.lt.s32.totalorder %v690_v33, %v3324_v56 }
  0xff   :  { %2842 = vmatprep.subr.msk.mxu1 %vm1126_vm6, %v3095_v0  ;;  %vm1078_vm9 = vmand %vm820_vm0, %vm950_vm1  ;;  %vm851_vm0 = vcmp.ge.s32.totalorder %v722_v34, %v3322_v55  ;;  %vm981_vm1 = vcmp.lt.s32.totalorder %v722_v34, %v3324_v56  ;;  %v3661_v34 = vadd.s32 632, %v3320_v54 }
 0x100   :  { %2805 = vmatpush3.msk.msra.mxu0 %vm1078_vm9, %v3095_v0  ;;  %vm1110_vm12 = vmand %vm852_vm4, %vm982_vm5  ;;  %vm834_vm4 = vcmp.ge.s32.totalorder %v705_v35, %v3322_v55  ;;  %vm964_vm5 = vcmp.lt.s32.totalorder %v705_v35, %v3324_v56  ;;  %v3664_v35 = vadd.s32 888, %v3320_v54 }
 0x101   :  { %2843 = vmatpush3.msk.msra.mxu1 %vm1110_vm12, %v3095_v0  ;;  %vm1093_vm15 = vmand %vm835_vm7, %vm965_vm8  ;;  %vm866_vm7 = vcmp.ge.s32.totalorder %v737_v36, %v3322_v55  ;;  %vm996_vm8 = vcmp.lt.s32.totalorder %v737_v36, %v3324_v56 }
 0x102   :  { %2806 = vmatprep.subr.msk.mxu0 %vm1093_vm15, %v3095_v0  ;;  %vm1125_vm3 = vmand %vm867_vm10, %vm997_vm11  ;;  %vm818_vm10 = vcmp.ge.s32.totalorder %v689_v37, %v3322_v55  ;;  %vm948_vm11 = vcmp.lt.s32.totalorder %v689_v37, %v3324_v56 }
 0x103   :  { %2844 = vmatprep.subr.msk.mxu1 %vm1125_vm3, %v3095_v0  ;;  %vm1077_vm6 = vmand %vm819_vm13, %vm949_vm14  ;;  %vm850_vm13 = vcmp.ge.s32.totalorder %v721_v38, %v3322_v55  ;;  %vm980_vm14 = vcmp.lt.s32.totalorder %v721_v38, %v3324_v56  ;;  %v3672_v38 = vadd.s32 752, %v3320_v54 }
 0x104   :  { %2807 = vmatpush3.msk.msra.mxu0 %vm1077_vm6, %v3095_v0  ;;  %vm1109_vm9 = vmand %vm851_vm0, %vm981_vm1  ;;  %vm833_vm0 = vcmp.ge.s32.totalorder %v704_v39, %v3322_v55  ;;  %vm963_vm1 = vcmp.lt.s32.totalorder %v704_v39, %v3324_v56  ;;  %vm865_vm6 = vcmp.ge.s32.totalorder %v736_v40, %v3322_v55  ;;  %v3675_v39 = vadd.s32 1008, %v3320_v54 }
 0x105   :  { %2845 = vmatpush3.msk.msra.mxu1 %vm1109_vm9, %v3095_v0  ;;  %vm1092_vm12 = vmand %vm834_vm4, %vm964_vm5  ;;  %vm995_vm4 = vcmp.lt.s32.totalorder %v736_v40, %v3324_v56  ;;  %vm817_vm9 = vcmp.ge.s32.totalorder %v688_v41, %v3322_v55 }
 0x106   :  { %2808 = vmatprep.subr.msk.mxu0 %vm1092_vm12, %v3095_v0  ;;  %vm1124_vm15 = vmand %vm866_vm7, %vm996_vm8  ;;  %vm849_vm8 = vcmp.ge.s32.totalorder %v720_v42, %v3322_v55  ;;  %vm979_vm12 = vcmp.lt.s32.totalorder %v720_v42, %v3324_v56  ;;  %v3683_v42 = vadd.s32 624, %v3320_v54 }
 0x107   :  { %2846 = vmatprep.subr.msk.mxu1 %vm1124_vm15, %v3095_v0  ;;  %vm1076_vm3 = vmand %vm818_vm10, %vm948_vm11  ;;  %vm864_vm15 = vcmp.ge.s32.totalorder %v735_v47, %v3322_v55 }
 0x108   :  { %2809 = vmatpush3.msk.msra.mxu0 %vm1076_vm3, %v3095_v0  ;;  %vm1108_vm5 = vmand %vm850_vm13, %vm980_vm14  ;;  %vm962_vm14 = vcmp.lt.s32.totalorder %v703_v46, %v3324_v56  ;;  %vm816_vm3 = vcmp.ge.s32.totalorder %v687_v48, %v3322_v55 }
 0x109   :  { %2847 = vmatpush3.msk.msra.mxu1 %vm1108_vm5, %v3095_v0  ;;  %vm1091_vm7 = vmand %vm833_vm0, %vm963_vm1  ;;  %vm994_vm0 = vcmp.lt.s32.totalorder %v735_v47, %v3324_v56  ;;  %vm848_vm5 = vcmp.ge.s32.totalorder %v719_v49, %v3322_v55  ;;  %v3699_v47 = vadd.s32 1000, %v3320_v54 }
 0x10a   :  { %2810 = vmatprep.subr.msk.mxu0 %vm1091_vm7, %v3095_v0  ;;  %vm1123_vm10 = vmand %vm865_vm6, %vm995_vm4  ;;  %vm946_vm6 = vcmp.lt.s32.totalorder %v687_v48, %v3324_v56  ;;  %v3710_v48 = vadd.s32 616, %v3320_v54 }
 0x10b   :  { %2848 = vmatprep.subr.msk.mxu1 %vm1123_vm10, %v3095_v0  ;;  %vm1075_vm11 = vmand %vm817_vm9, %vm947_vm2  ;;  %vm832_vm2 = vcmp.ge.s32.totalorder %v703_v46, %v3322_v55  ;;  %vm978_vm9 = vcmp.lt.s32.totalorder %v719_v49, %v3324_v56  ;;  %vm961_vm10 = vcmp.lt.s32.totalorder %v702_v51, %v3324_v56  ;;  %v3696_v46 = vadd.s32 744, %v3320_v54 }
 0x10c   :  { %2811 = vmatpush3.msk.msra.mxu0 %vm1075_vm11, %v3095_v0  ;;  %vm1107_vm13 = vmand %vm849_vm8, %vm979_vm12  ;;  %vm831_vm12 = vcmp.ge.s32.totalorder %v702_v51, %v3322_v55  ;;  %vm863_vm11 = vcmp.ge.s32.totalorder %v734_v52, %v3322_v55  ;;  %v3713_v49 = vadd.s32 872, %v3320_v54  ;;  %v3735_v51 = vadd.s32 992, %v3320_v54 }
 0x10d   :  { %2849 = vmatpush3.msk.msra.mxu1 %vm1107_vm13, %v3095_v0  ;;  %vm1090_vm1 = vmand %vm832_vm2, %vm962_vm14  ;;  %vm993_vm13 = vcmp.lt.s32.totalorder %v734_v52, %v3324_v56  ;;  %vm815_vm14 = vcmp.ge.s32.totalorder %v686_v53, %v3322_v55  ;;  %v3746_v52 = vadd.s32 608, %v3320_v54 }
 0x10e   :  { %2812 = vmatprep.subr.msk.mxu0 %vm1090_vm1, %v3095_v0  ;;  %vm1122_vm4 = vmand %vm864_vm15, %vm994_vm0  ;;  %vm945_vm15 = vcmp.lt.s32.totalorder %v686_v53, %v3324_v56  ;;  %vm847_vm1 = vcmp.ge.s32.totalorder %v718_v57, %v3322_v55  ;;  %v3755_v53 = vadd.s32 864, %v3320_v54 }
 0x10f   :  { %2850 = vmatprep.subr.msk.mxu1 %vm1122_vm4, %v3095_v0  ;;  %vm1074_vm7 = vmand %vm816_vm3, %vm946_vm6  ;;  %vm977_vm3 = vcmp.lt.s32.totalorder %v718_v57, %v3324_v56  ;;  %vm830_vm4 = vcmp.ge.s32.totalorder %v701_v58, %v3322_v55  ;;  %v3762_v57 = vadd.s32 728, %v3320_v54 }
 0x110   :  { %2813 = vmatpush3.msk.msra.mxu0 %vm1074_vm7, %v3095_v0  ;;  %vm1106_vm8 = vmand %vm848_vm5, %vm978_vm9  ;;  %vm960_vm5 = vcmp.lt.s32.totalorder %v701_v58, %v3324_v56  ;;  %vm862_vm7 = vcmp.ge.s32.totalorder %v733_v59, %v3322_v55  ;;  %v3765_v58 = vadd.s32 984, %v3320_v54 }
 0x111   :  { %2851 = vmatpush3.msk.msra.mxu1 %vm1106_vm8, %v3095_v0  ;;  %vm1089_vm2 = vmand %vm831_vm12, %vm961_vm10  ;;  %vm992_vm8 = vcmp.lt.s32.totalorder %v733_v59, %v3324_v56  ;;  %v3774_v59 = vadd.s32 600, %v3320_v54 }
 0x112   :  { %2814 = vmatprep.subr.msk.mxu0 %vm1089_vm2, %v3095_v0  ;;  %vm1121_vm0 = vmand %vm863_vm11, %vm993_vm13  ;;  %vm814_vm11 = vcmp.ge.s32.totalorder %v685_v63, %v3322_v55  ;;  %vm944_vm13 = vcmp.lt.s32.totalorder %v685_v63, %v3324_v56  ;;  %vm846_vm2 = vcmp.ge.s32.totalorder %v717_v1, %v3322_v55  ;;  %v3784_v63 = vadd.s32 720, %v3320_v54 }
 0x113   :  { %2852 = vmatprep.subr.msk.mxu1 %vm1121_vm0, %v3095_v0  ;;  %vm1073_vm6 = vmand %vm815_vm14, %vm945_vm15  ;;  %vm976_vm14 = vcmp.lt.s32.totalorder %v717_v1, %v3324_v56  ;;  %vm829_vm0 = vcmp.ge.s32.totalorder %v700_v2, %v3322_v55  ;;  %v3791_v1 = vadd.s32 976, %v3320_v54 }
 0x114   :  { %2815 = vmatpush3.msk.msra.mxu0 %vm1073_vm6, %v3095_v0  ;;  %vm1105_vm9 = vmand %vm847_vm1, %vm977_vm3  ;;  %vm959_vm1 = vcmp.lt.s32.totalorder %v700_v2, %v3324_v56  ;;  %vm861_vm6 = vcmp.ge.s32.totalorder %v732_v3, %v3322_v55  ;;  %v3794_v2 = vadd.s32 592, %v3320_v54 }
 0x115   :  { %2853 = vmatpush3.msk.msra.mxu1 %vm1105_vm9, %v3095_v0  ;;  %vm1088_vm12 = vmand %vm830_vm4, %vm960_vm5  ;;  %vm991_vm4 = vcmp.lt.s32.totalorder %v732_v3, %v3324_v56  ;;  %vm813_vm5 = vcmp.ge.s32.totalorder %v3320_v54, %v3322_v55  ;;  %vm943_vm9 = vcmp.lt.s32.totalorder %v3320_v54, %v3324_v56  ;;  %v3805_v3 = vadd.s32 848, %v3320_v54 }
 0x116   :  { %2816 = vmatprep.subr.msk.mxu0 %vm1088_vm12, %v3095_v0  ;;  %vm1120_vm10 = vmand %vm862_vm7, %vm992_vm8 }
 0x117   :  { %2854 = vmatprep.subr.msk.mxu1 %vm1120_vm10, %v3095_v0  ;;  %vm1072_vm15 = vmand %vm814_vm11, %vm944_vm13  ;;  %vm845_vm10 = vcmp.ge.s32.totalorder %v716_v6, %v3322_v55  ;;  %vm975_vm11 = vcmp.lt.s32.totalorder %v716_v6, %v3324_v56  ;;  %vm908_vm13 = vcmp.ge.s32.totalorder %v779_v7, %v3322_v55  ;;  %v3812_v6 = vadd.s32 712, %v3320_v54 }
 0x118   :  { %2817 = vmatpush3.msk.msra.mxu0 %vm1072_vm15, %v3095_v0  ;;  %vm1104_vm3 = vmand %vm846_vm2, %vm976_vm14  ;;  %vm1038_vm14 = vcmp.lt.s32.totalorder %v779_v7, %v3324_v56  ;;  %vm940_vm15 = vcmp.ge.s32.totalorder %v811_v8, %v3322_v55  ;;  %v3815_v7 = vadd.s32 968, %v3320_v54 }
 0x119   :  { %2855 = vmatpush3.msk.msra.mxu1 %vm1104_vm3, %v3095_v0  ;;  %vm1087_vm7 = vmand %vm829_vm0, %vm959_vm1  ;;  %vm1070_vm0 = vcmp.lt.s32.totalorder %v811_v8, %v3324_v56 }
 0x11a   :  { %2818 = vmatprep.subr.msk.mxu0 %vm1087_vm7, %v3095_v0  ;;  %vm1119_vm8 = vmand %vm861_vm6, %vm991_vm4  ;;  %vm892_vm6 = vcmp.ge.s32.totalorder %v3661_v34, %v3322_v55  ;;  %vm1022_vm4 = vcmp.lt.s32.totalorder %v3661_v34, %v3324_v56  ;;  %vm907_vm7 = vcmp.ge.s32.totalorder %v3672_v38, %v3322_v55  ;;  %v5046_v34 = vmov 0 }
 0x11b   :  { %vm1071_vm12 = vmand %vm813_vm5, %vm943_vm9  ;;  %2856 = vmatprep.subr.msk.mxu1 %vm1119_vm8, %v3095_v0  ;;  %vm924_vm5 = vcmp.ge.s32.totalorder %v3664_v35, %v3322_v55  ;;  %vm1054_vm9 = vcmp.lt.s32.totalorder %v3664_v35, %v3324_v56  ;;  %vm1037_vm8 = vcmp.lt.s32.totalorder %v3672_v38, %v3324_v56  ;;  %v5050_v35 = vmov 0 }
 0x11c   :  { %2819 = vmatpush3.msk.msra.mxu0 %vm1071_vm12, %v3095_v0  ;;  %vm1103_vm2 = vmand %vm845_vm10, %vm975_vm11  ;;  %vm939_vm12 = vcmp.ge.s32.totalorder %v3675_v39, %v3322_v55  ;;  %vm1069_vm10 = vcmp.lt.s32.totalorder %v3675_v39, %v3324_v56  ;;  %vm891_vm11 = vcmp.ge.s32.totalorder %v3683_v42, %v3322_v55  ;;  %v3974_v38 = vadd.s32 696, %v3320_v54 }
 0x11d   :  { %2857 = vmatpush3.msk.msra.mxu1 %vm1103_vm2, %v3095_v0  ;;  %vm1166_vm1 = vmand %vm908_vm13, %vm1038_vm14  ;;  %vm1021_vm13 = vcmp.lt.s32.totalorder %v3683_v42, %v3324_v56 }
 0x11e   :  { %2864 = vmatprep.subr.msk.mxu0 %vm1166_vm1, %v3095_v0  ;;  %vm1198_vm3 = vmand %vm940_vm15, %vm1070_vm0 }
 0x11f   :  { %2902 = vmatprep.subr.msk.mxu1 %vm1198_vm3, %v3095_v0  ;;  %vm3823_vm2 = vmand %vm892_vm6, %vm1022_vm4  ;;  %vm5043_vm3 = vcmask 261120  }
 0x120   :  { %vm3833_vm0 = vmand %vm924_vm5, %vm1054_vm9  ;;  %vm5039_vm5 = vcmp.lt.s32.totalorder %v3699_v47, %v3324_v56 }
 0x121   :  { %vm3853_vm6 = vmand %vm907_vm7, %vm1037_vm8 }
 0x122   :  { %vm3863_vm4 = vmand %vm939_vm12, %vm1069_vm10 }
 0x123   :  { %vm3887_vm12 = vmand %vm891_vm11, %vm1021_vm13  ;;  %vm5040_vm11 = vcmp.ge.s32.totalorder %v3699_v47, %v3322_v55 }
 0x124   :  { %vm3928_vm13 = vmand %vm5040_vm11, %vm5039_vm5  ;;  %vm5044_vm5 = vcmp.lt.s32.totalorder %v3710_v48, %v3324_v56  ;;  %vm5045_vm11 = vcmp.ge.s32.totalorder %v3710_v48, %v3322_v55  ;;  %v5060_v48 = vmov 0 }
 0x125   :  { %vm3948_vm9 = vmand %vm5045_vm11, %vm5044_vm5 }
 0x126   :  { %v5047_v34 = vsel %vm3948_vm9, 4294967295, %v5046_v34  ;;  %vm5057_vm9 = vcmask 785408  }
 0x192   :  { %v3528_v43 = vpop.f32.mrf.mxu1  ;;  %v376_v10 = vpop.f32.mrf.mxu0 }
 0x193   :  { %v3645_v27 = vadd.f32 %v3528_v43, %v189_v19  ;;  %v3647_v28 = vadd.f32 %v376_v10, %v197_v20  ;;  %v3686_v43 = vadd.s32 880, %v3320_v54 }
 0x194   :  { %v3530_v44 = vpop.f32.mrf.mxu1  ;;  %v378_v11 = vpop.f32.mrf.mxu0 }
 0x195   :  { %v3656_v31 = vadd.f32 %v3530_v44, %v193_v24  ;;  %v3658_v32 = vadd.f32 %v378_v11, %v201_v25  ;;  %vm5031_vm10 = vcmp.lt.s32.totalorder %v3686_v43, %v3324_v56  ;;  %vm5032_vm7 = vcmp.ge.s32.totalorder %v3686_v43, %v3322_v55 }
 0x196   :  { %vm3897_vm8 = vmand %vm5032_vm7, %vm5031_vm10  ;;  %vm5035_vm7 = vcmp.lt.s32.totalorder %v3696_v46, %v3324_v56  ;;  %vm5036_vm10 = vcmp.ge.s32.totalorder %v3696_v46, %v3322_v55  ;;  %v5055_v43 = vmov 0  ;;  %v3996_v46 = vadd.s32 952, %v3320_v54 }
 0x197   :  { %v3532_v45 = vpop.f32.mrf.mxu1  ;;  %v382_v12 = vpop.f32.mrf.mxu0  ;;  %vm3918_vm15 = vmand %vm5036_vm10, %vm5035_vm7  ;;  %vm5048_vm7 = vcmp.lt.s32.totalorder %v3713_v49, %v3324_v56  ;;  %vm5049_vm10 = vcmp.ge.s32.totalorder %v3713_v49, %v3322_v55  ;;  %v4016_v49 = vadd.s32 568, %v3320_v54  ;;  %v5212_v11 = vmov 0 }
 0x198   :  { %v3667_v36 = vadd.f32 %v3532_v45, %v189_v19  ;;  %v3669_v37 = vadd.f32 %v382_v12, %v197_v20  ;;  %v3842_v12 = vadd.s32 584, %v3320_v54  ;;  %vm3958_vm14 = vmand %vm5049_vm10, %vm5048_vm7  ;;  %vm5052_vm7 = vcmask 523264  }
 0x199   :  { %v3538_v50 = vpop.f32.mrf.mxu1  ;;  %v384_v18 = vpop.f32.mrf.mxu0  ;;  %v5051_v35 = vsel %vm3958_vm14, 4294967295, %v5050_v35  ;;  %vm5066_vm14 = vcmp.lt.s32.totalorder %v3755_v53, %v3324_v56  ;;  %v4194_v20 = vadd.s32 680, %v3320_v54 }
 0x19a   :  { %v3678_v40 = vadd.f32 %v3538_v50, %v193_v24  ;;  %v3680_v41 = vadd.f32 %v384_v18, %v201_v25  ;;  %v3724_v50 = vadd.s32 736, %v3320_v54  ;;  %v3879_v18 = vadd.s32 960, %v3320_v54 }
 0x19b   :  { %v800_v24 = vadd.s32 928, %v3320_v54 }
 0x19c   :  { %vm5053_vm10 = vcmp.lt.s32.totalorder %v3724_v50, %v3324_v56 }
 0x19d   :  { %v3556_v60 = vpop.f32.mrf.mxu1  ;;  %v3642_v26 = vpop.f32.mrf.mxu0 }
 0x19f   :  { %v3566_v61 = vpop.f32.mrf.mxu1  ;;  %v532_v33 = vpop.f32.mrf.mxu0 }
 0x1a0   :  { %v3690_v44 = vadd.f32 %v3566_v61, %v3650_v29  ;;  %v3693_v45 = vadd.f32 %v532_v33, %v3653_v30  ;;  %v3781_v61 = vadd.s32 856, %v3320_v54 }
 0x1a1   :  { %v3574_v62 = vpop.f32.mrf.mxu1 }
 0x1a3   :  { %v3584_v4 = vpop.f32.mrf.mxu1 }
 0x1a5   :  { %v3594_v5 = vpop.f32.mrf.mxu1 }
 0x1a7   :  { %v3607_v9 = vpop.f32.mrf.mxu1 }
 0x1a8   :  { %653 = vrot.lane.b32.xlu0 %v3607_v9, %s3096_s6  ;;  %641 = vrot.lane.b32.xlu1 %v3607_v9, %s3097_s30 }
 0x1ac   :  { %649 = vrot.lane.b32.xlu0 %v3594_v5, %s3098_s4  ;;  %647 = vrot.lane.b32.xlu1 %v3607_v9, %s3098_s4 }
 0x1b0   :  { %643 = vrot.lane.b32.xlu1 %v3594_v5, %s3097_s30 }
 0x1b4   :  { %655 = vrot.lane.b32.xlu1 %v3594_v5, %s3096_s6 }
 0x21a   :  { %v642_v8 = vpop.permute.xlu1 %641  ;;  %v654_v39 = vpop.permute.xlu0 %653 }
 0x21b   :  { %v659_v25 = vsel %vm5043_vm3, %v3607_v9, %v642_v8  ;;  %v3971_v9 = vadd.s32 832, %v3320_v54  ;;  %vm5054_vm3 = vcmp.ge.s32.totalorder %v3724_v50, %v3322_v55  ;;  %v4019_v50 = vadd.s32 824, %v3320_v54 }
 0x21c   :  { %vm3983_vm1 = vmand %vm5054_vm3, %vm5053_vm10  ;;  %vm5058_vm3 = vcmp.lt.s32.totalorder %v3735_v51, %v3324_v56  ;;  %vm5059_vm10 = vcmp.ge.s32.totalorder %v3735_v51, %v3322_v55  ;;  %v4022_v8 = vadd.s32 688, %v3320_v54 }
 0x21d   :  { %v5056_v43 = vsel %vm3983_vm1, 4294967295, %v5055_v43  ;;  %vm4007_vm5 = vmand %vm5059_vm10, %vm5058_vm3  ;;  %vm5063_vm3 = vcmp.ge.s32.totalorder %v3746_v52, %v3322_v55 }
 0x21e   :  { %v648_v33 = vpop.permute.xlu1 %647  ;;  %v5061_v48 = vsel %vm4007_vm5, 4294967295, %v5060_v48 }
 0x21f   :  { %v662_v42 = vsel %vm5052_vm7, %v659_v25, %v648_v33  ;;  %vm5067_vm7 = vcmp.ge.s32.totalorder %v3755_v53, %v3322_v55 }
 0x220   :  { %v3999_v47 = vsel %vm5057_vm9, %v662_v42, %v654_v39  ;;  %vm5062_vm9 = vcmp.lt.s32.totalorder %v3746_v52, %v3324_v56  ;;  %v5064_v42 = vmov 0  ;;  %vm4048_vm11 = vmand %vm5067_vm7, %vm5066_vm14  ;;  %vm5071_vm14 = vcmp.lt.s32.totalorder %v3762_v57, %v3324_v56 }
 0x221   :  { %v668_v51 = vmul.f32 %v3999_v47, %v3656_v31  ;;  %v670_v25 = vmul.f32 %v3999_v47, %v3658_v32  ;;  %v667_v33 = vmul.f32 %v3999_v47, %v3645_v27  ;;  %v669_v39 = vmul.f32 %v3999_v47, %v3647_v28  ;;  %vm4038_vm10 = vmand %vm5063_vm3, %vm5062_vm9 }
 0x222   :  { %v5065_v42 = vsel %vm4038_vm10, 4294967295, %v5064_v42  ;;  %v644_v31 = vpop.permute.xlu1 %643  ;;  %v5068_v27 = vmov 0  ;;  %v4059_v28 = vadd.s32 944, %v3320_v54  ;;  %vm5070_vm10 = vcmask 261120  }
 0x223   :  { %v5069_v27 = vsel %vm4048_vm11, 4294967295, %v5068_v27  ;;  %v660_v32 = vsel %vm5070_vm10, %v3594_v5, %v644_v31  ;;  %1519 = vmatprep.mubr.f32.mxu0 %v668_v51  ;;  %1594 = vmatprep.mubr.f32.mxu1 %v670_v25  ;;  %vm5072_vm7 = vcmp.ge.s32.totalorder %v3762_v57, %v3322_v55  ;;  %v5073_v52 = vmov 0 }
 0x224   :  { %vm4069_vm5 = vmand %vm5072_vm7, %vm5071_vm14  ;;  %vm5075_vm3 = vcmp.lt.s32.totalorder %v3765_v58, %v3324_v56  ;;  %vm5076_vm9 = vcmp.ge.s32.totalorder %v3765_v58, %v3322_v55  ;;  %1520 = vmatmul.mubr.f32.vlgmr.msra.gmra.mxu0 %v667_v33  ;;  %1595 = vmatmul.mubr.f32.vlgmr.msra.gmra.mxu1 %v669_v39  ;;  %vm5079_vm14 = vcmp.lt.s32.totalorder %v3774_v59, %v3324_v56  ;;  %v4104_v57 = vadd.s32 560, %v3320_v54  ;;  %v650_v58 = vpop.permute.xlu0 %649 }
 0x225   :  { %v5074_v52 = vsel %vm4069_vm5, 4294967295, %v5073_v52  ;;  %vm4079_vm11 = vmand %vm5076_vm9, %vm5075_vm3  ;;  %vm5080_vm7 = vcmp.ge.s32.totalorder %v3774_v59, %v3322_v55  ;;  %2865 = vmatpush3.msk.msra.mxu0 %vm3823_vm2, %v3095_v0  ;;  %2903 = vmatpush3.msk.msra.mxu1 %vm3833_vm0, %v3095_v0  ;;  %vm5087_vm0 = vcmask 523264   ;;  %vm5093_vm9 = vcmp.ge.s32.totalorder %v3791_v1, %v3322_v55 }
 0x226   :  { %vm4093_vm5 = vmand %vm5080_vm7, %vm5079_vm14  ;;  %vm5083_vm14 = vcmp.lt.s32.totalorder %v3781_v61, %v3324_v56  ;;  %vm5084_vm7 = vcmp.ge.s32.totalorder %v3781_v61, %v3322_v55  ;;  %2866 = vmatprep.subr.msk.mxu0 %vm3853_vm6, %v3095_v0  ;;  %2904 = vmatprep.subr.msk.mxu1 %vm3863_vm4, %v3095_v0  ;;  %v663_v61 = vsel %vm5087_vm0, %v660_v32, %v650_v58  ;;  %v656_v10 = vpop.permute.xlu1 %655  ;;  %v5166_v33 = vmov 0 }
 0x227   :  { %vm4118_vm3 = vmand %vm5084_vm7, %vm5083_vm14  ;;  %vm5088_vm14 = vcmp.lt.s32.totalorder %v3784_v63, %v3324_v56  ;;  %vm5089_vm7 = vcmp.ge.s32.totalorder %v3784_v63, %v3322_v55  ;;  %vm5092_vm6 = vcmp.lt.s32.totalorder %v3791_v1, %v3324_v56  ;;  %v4160_v63 = vadd.s32 816, %v3320_v54  ;;  %2867 = vmatpush3.msk.msra.mxu0 %vm3887_vm12, %v3095_v0  ;;  %2905 = vmatpush3.msk.msra.mxu1 %vm3897_vm8, %v3095_v0 }
 0x228   :  { %vm4141_vm1 = vmand %vm5089_vm7, %vm5088_vm14  ;;  %vm5097_vm14 = vcmp.lt.s32.totalorder %v3794_v2, %v3324_v56  ;;  %vm5098_vm7 = vcmp.ge.s32.totalorder %v3794_v2, %v3322_v55  ;;  %vm5101_vm12 = vcmp.lt.s32.totalorder %v3805_v3, %v3324_v56  ;;  %vm5102_vm2 = vcmp.ge.s32.totalorder %v3805_v3, %v3322_v55  ;;  %2868 = vmatprep.subr.msk.mxu0 %vm3918_vm15, %v3095_v0 }
 0x229   :  { %vm4151_vm4 = vmand %vm5093_vm9, %vm5092_vm6  ;;  %vm5096_vm9 = vcmask 785408   ;;  %v4197_v2 = vadd.s32 936, %v3320_v54  ;;  %2906 = vmatprep.subr.msk.mxu1 %vm3928_vm13, %v3095_v0  ;;  %vm5109_vm15 = vcmp.lt.s32.totalorder %v3815_v7, %v3324_v56  ;;  %vm5110_vm13 = vcmp.ge.s32.totalorder %v3815_v7, %v3322_v55 }
 0x22a   :  { %v4169_v1 = vsel %vm5096_vm9, %v663_v61, %v656_v10  ;;  %vm4177_vm6 = vmand %vm5098_vm7, %vm5097_vm14  ;;  %vm5106_vm14 = vcmp.ge.s32.totalorder %v3812_v6, %v3322_v55  ;;  %vm5129_vm10 = vcmp.lt.s32.totalorder %v3879_v18, %v3324_v56  ;;  %v5174_v39 = vmov 0 }
 0x22b   :  { %vm4187_vm8 = vmand %vm5102_vm2, %vm5101_vm12  ;;  %v676_v3 = vmul.f32 %v4169_v1, %v3678_v40  ;;  %v678_v51 = vmul.f32 %v4169_v1, %v3680_v41  ;;  %vm5105_vm2 = vcmp.lt.s32.totalorder %v3812_v6, %v3324_v56  ;;  %v5111_v40 = vmov 0 }
 0x22c   :  { %vm4215_vm7 = vmand %vm5106_vm14, %vm5105_vm2  ;;  %v4232_v41 = vadd.s32 552, %v3320_v54  ;;  %vm5113_vm2 = vnez %v5047_v34  ;;  %vm5114_vm14 = vnez %v5051_v35  ;;  %v675_v6 = vmul.f32 %v4169_v1, %v3667_v36 }
 0x22d   :  { %vm4225_vm12 = vmand %vm5110_vm13, %vm5109_vm15  ;;  %2869 = vmatpush3.msk.msra.mxu0 %vm5113_vm2, %v3095_v0  ;;  %2907 = vmatpush3.msk.msra.mxu1 %vm5114_vm14, %v3095_v0  ;;  %v677_v7 = vmul.f32 %v4169_v1, %v3669_v37  ;;  %vm5115_vm15 = vcmp.lt.s32.totalorder %v3842_v12, %v3324_v56  ;;  %vm5116_vm13 = vcmp.ge.s32.totalorder %v3842_v12, %v3322_v55  ;;  %v5121_v36 = vmov 0 }
 0x22e   :  { %v5112_v40 = vsel %vm4225_vm12, 4294967295, %v5111_v40  ;;  %vm4250_vm9 = vmand %vm5116_vm13, %vm5115_vm15  ;;  %vm5119_vm2 = vcmp.lt.s32.totalorder %v3845_v13, %v3324_v56  ;;  %vm5120_vm14 = vcmp.ge.s32.totalorder %v3845_v13, %v3322_v55  ;;  %v785_v37 = vadd.s32 808, %v3320_v54  ;;  %1524 = vmatprep.mubr.f32.mxu0 %v676_v3  ;;  %1599 = vmatprep.mubr.f32.mxu1 %v678_v51 }
 0x22f   :  { %v5118_v23 = vsel %vm4250_vm9, 4294967295, %v5117_v23  ;;  %vm4260_vm0 = vmand %vm5120_vm14, %vm5119_vm2  ;;  %vm5123_vm15 = vnez %v5056_v43  ;;  %vm5124_vm13 = vnez %v5061_v48  ;;  %vm5125_vm9 = vcmp.lt.s32.totalorder %v3876_v17, %v3324_v56  ;;  %1525 = vmatmul.mubr.f32.gmra.mxu0 %v675_v6  ;;  %1600 = vmatmul.mubr.f32.gmra.mxu1 %v677_v7 }
 0x230   :  { %v5122_v36 = vsel %vm4260_vm0, 4294967295, %v5121_v36  ;;  %2870 = vmatprep.subr.msk.mxu0 %vm5123_vm15, %v3095_v0  ;;  %2908 = vmatprep.subr.msk.mxu1 %vm5124_vm13, %v3095_v0  ;;  %vm5126_vm2 = vcmp.ge.s32.totalorder %v3876_v17, %v3322_v55  ;;  %v5127_v12 = vmov 0  ;;  %vm5130_vm15 = vcmp.ge.s32.totalorder %v3879_v18, %v3322_v55 }
 0x231   :  { %vm4279_vm14 = vmand %vm5126_vm2, %vm5125_vm9  ;;  %v5131_v13 = vmov 0  ;;  %v768_v17 = vadd.s32 672, %v3320_v54  ;;  %vm5133_vm9 = vcmp.lt.s32.totalorder %v3910_v21, %v3324_v56  ;;  %v5135_v18 = vmov 0 }
 0x232   :  { %v5128_v12 = vsel %vm4279_vm14, 4294967295, %v5127_v12  ;;  %vm4289_vm0 = vmand %vm5130_vm15, %vm5129_vm10  ;;  %vm5134_vm10 = vcmp.ge.s32.totalorder %v3910_v21, %v3322_v55  ;;  %vm5137_vm15 = vcmp.lt.s32.totalorder %v3971_v9, %v3324_v56  ;;  %vm5138_vm13 = vcmp.ge.s32.totalorder %v3971_v9, %v3322_v55 }
 0x233   :  { %v5132_v13 = vsel %vm4289_vm0, 4294967295, %v5131_v13  ;;  %vm4305_vm2 = vmand %vm5134_vm10, %vm5133_vm9  ;;  %v5139_v34 = vmov 0  ;;  %v752_v21 = vadd.s32 544, %v3320_v54  ;;  %vm5141_vm10 = vnez %v5065_v42 }
 0x234   :  { %v5136_v18 = vsel %vm4305_vm2, 4294967295, %v5135_v18  ;;  %vm4315_vm12 = vmand %vm5138_vm13, %vm5137_vm15  ;;  %2871 = vmatpush3.msk.msra.mxu0 %vm5141_vm10, %v3095_v0  ;;  %vm5142_vm13 = vnez %v5069_v27  ;;  %vm5143_vm15 = vcmp.lt.s32.totalorder %v3974_v38, %v3324_v56  ;;  %vm5144_vm0 = vcmp.ge.s32.totalorder %v3974_v38, %v3322_v55 }
 0x235   :  { %v5140_v34 = vsel %vm4315_vm12, 4294967295, %v5139_v34  ;;  %2909 = vmatpush3.msk.msra.mxu1 %vm5142_vm13, %v3095_v0  ;;  %vm4338_vm14 = vmand %vm5144_vm0, %vm5143_vm15  ;;  %v5145_v35 = vmov 0  ;;  %vm5147_vm9 = vcmp.lt.s32.totalorder %v3996_v46, %v3324_v56  ;;  %vm5148_vm10 = vcmp.ge.s32.totalorder %v3996_v46, %v3322_v55 }
 0x236   :  { %v5146_v35 = vsel %vm4338_vm14, 4294967295, %v5145_v35  ;;  %vm4348_vm12 = vmand %vm5148_vm10, %vm5147_vm9  ;;  %v5149_v9 = vmov 0  ;;  %v784_v38 = vadd.s32 800, %v3320_v54  ;;  %v672_v43 = vmul.f32 %v3999_v47, %v3690_v44  ;;  %2910 = vmatprep.subr.msk.mxu1 %vm4079_vm11, %v3095_v0 }
 0x237   :  { %v5150_v9 = vsel %vm4348_vm12, 4294967295, %v5149_v9  ;;  %vm5151_vm9 = vcmp.lt.s32.totalorder %v4016_v49, %v3324_v56  ;;  %vm5152_vm15 = vcmp.ge.s32.totalorder %v4016_v49, %v3322_v55  ;;  %vm5155_vm2 = vcmp.lt.s32.totalorder %v4019_v50, %v3324_v56  ;;  %2911 = vmatpush3.msk.msra.mxu1 %vm4118_vm3, %v3095_v0 }
 0x238   :  { %vm4367_vm10 = vmand %vm5152_vm15, %vm5151_vm9  ;;  %vm5156_vm0 = vcmp.ge.s32.totalorder %v4019_v50, %v3322_v55  ;;  %v5157_v48 = vmov 0  ;;  %v767_v44 = vadd.s32 664, %v3320_v54  ;;  %vm5159_vm9 = vnez %v5074_v52  ;;  %1669 = vmatprep.mubr.f32.mxu0 %v672_v43  ;;  %2912 = vmatprep.subr.msk.mxu1 %vm4151_vm4, %v3095_v0 }
 0x239   :  { %vm4377_vm13 = vmand %vm5156_vm0, %vm5155_vm2  ;;  %2872 = vmatprep.subr.msk.mxu0 %vm5159_vm9, %v3095_v0  ;;  %v674_v49 = vmul.f32 %v3999_v47, %v3693_v45  ;;  %vm5160_vm2 = vcmp.lt.s32.totalorder %v4022_v8, %v3324_v56  ;;  %vm5161_vm0 = vcmp.ge.s32.totalorder %v4022_v8, %v3322_v55  ;;  %v5162_v50 = vmov 0  ;;  %2913 = vmatpush3.msk.msra.mxu1 %vm4187_vm8, %v3095_v0 }
 0x23a   :  { %v5158_v48 = vsel %vm4377_vm13, 4294967295, %v5157_v48  ;;  %vm4398_vm15 = vmand %vm5161_vm0, %vm5160_vm2  ;;  %vm5164_vm9 = vcmp.lt.s32.totalorder %v4059_v28, %v3324_v56  ;;  %vm5165_vm12 = vcmp.ge.s32.totalorder %v4059_v28, %v3322_v55  ;;  %v799_v45 = vadd.s32 920, %v3320_v54  ;;  %2873 = vmatpush3.msk.msra.mxu0 %vm4093_vm5, %v3095_v0 }
 0x23b   :  { %v5163_v50 = vsel %vm4398_vm15, 4294967295, %v5162_v50  ;;  %vm4408_vm11 = vmand %vm5165_vm12, %vm5164_vm9  ;;  %vm5168_vm2 = vcmp.lt.s32.totalorder %v4104_v57, %v3324_v56  ;;  %vm5169_vm12 = vcmp.ge.s32.totalorder %v4104_v57, %v3322_v55  ;;  %vm5172_vm9 = vcmp.lt.s32.totalorder %v4160_v63, %v3324_v56  ;;  %1744 = vmatprep.mubr.f32.mxu1 %v674_v49  ;;  %2874 = vmatprep.subr.msk.mxu0 %vm4141_vm1, %v3095_v0 }
 0x23c   :  { %v5167_v33 = vsel %vm4408_vm11, 4294967295, %v5166_v33  ;;  %vm4424_vm0 = vmand %vm5169_vm12, %vm5168_vm2  ;;  %vm5173_vm14 = vcmp.ge.s32.totalorder %v4160_v63, %v3322_v55  ;;  %v751_v42 = vadd.s32 536, %v3320_v54  ;;  %vm5176_vm2 = vcmp.lt.s32.totalorder %v4194_v20, %v3324_v56  ;;  %2875 = vmatpush3.msk.msra.mxu0 %vm4177_vm6, %v3095_v0 }
 0x23d   :  { %vm4434_vm13 = vmand %vm5173_vm14, %vm5172_vm9  ;;  %vm5177_vm14 = vcmp.ge.s32.totalorder %v4194_v20, %v3322_v55  ;;  %vm5180_vm9 = vcmp.lt.s32.totalorder %v4197_v2, %v3324_v56  ;;  %vm5181_vm15 = vcmp.ge.s32.totalorder %v4197_v2, %v3322_v55  ;;  %vm1011_vm3 = vcmp.lt.s32.totalorder %v752_v21, %v3324_v56  ;;  %2876 = vmatprep.subr.msk.mxu0 %vm4215_vm7, %v3095_v0 }
 0x23e   :  { %v5175_v39 = vsel %vm4434_vm13, 4294967295, %v5174_v39  ;;  %vm4451_vm12 = vmand %vm5177_vm14, %vm5176_vm2  ;;  %v783_v28 = vadd.s32 792, %v3320_v54  ;;  %vm5185_vm2 = vcmp.ge.s32.totalorder %v4232_v41, %v3322_v55  ;;  %vm5189_vm11 = vcmp.ge.s32.totalorder %v785_v37, %v3322_v55 }
 0x23f   :  { %vm4461_vm5 = vmand %vm5181_vm15, %vm5180_vm9  ;;  %vm5184_vm15 = vcmp.lt.s32.totalorder %v4232_v41, %v3324_v56  ;;  %vm5188_vm9 = vcmp.lt.s32.totalorder %v785_v37, %v3324_v56  ;;  %v766_v5 = vadd.s32 656, %v3320_v54  ;;  %vm5197_vm1 = vcmp.ge.s32.totalorder %v800_v24, %v3322_v55  ;;  %v2033_v37 = vld [vmem:[%s5010_s13 + $0x18] sm:$0xff] }
 0x240   :  { %vm4481_vm14 = vmand %vm5185_vm2, %vm5184_vm15  ;;  %vm5192_vm15 = vcmp.lt.s32.totalorder %v768_v17, %v3324_v56  ;;  %v798_v58 = vadd.s32 912, %v3320_v54  ;;  %v5202_v59 = vmov 0  ;;  %vm5205_vm6 = vcmp.ge.s32.totalorder %v784_v38, %v3322_v55 }
 0x241   :  { %vm4489_vm13 = vmand %vm5189_vm11, %vm5188_vm9  ;;  %vm5193_vm11 = vcmp.ge.s32.totalorder %v768_v17, %v3322_v55  ;;  %vm5196_vm9 = vcmp.lt.s32.totalorder %v800_v24, %v3324_v56  ;;  %v5206_v61 = vmov 0  ;;  %v750_v10 = vadd.s32 528, %v3320_v54  ;;  %v536_v24 = vpop.f32.mrf.mxu0 }
 0x242   :  { %vm4506_vm2 = vmand %vm5193_vm11, %vm5192_vm15  ;;  %vm5200_vm15 = vnez %v5112_v40  ;;  %v5218_v63 = vmov 0  ;;  %v797_v20 = vadd.s32 904, %v3320_v54  ;;  %v5230_v2 = vmov 0 }
 0x243   :  { %vm4514_vm4 = vmand %vm5197_vm1, %vm5196_vm9  ;;  %2914 = vmatprep.subr.msk.mxu1 %vm5200_vm15, %v3095_v0  ;;  %vm5201_vm1 = vcmp.ge.s32.totalorder %v752_v21, %v3322_v55  ;;  %vm5204_vm9 = vcmp.lt.s32.totalorder %v784_v38, %v3324_v56  ;;  %v749_v3 = vadd.s32 520, %v3320_v54  ;;  %v781_v25 = vadd.s32 776, %v3320_v54  ;;  %v538_v38 = vpop.f32.mrf.mxu0  ;;  %v2030_v21 = vld [vmem:[%s5010_s13] sm:$0xff] }
 0x244   :  { %vm4531_vm11 = vmand %vm5201_vm1, %vm1011_vm3  ;;  %vm5208_vm3 = vnez %v5118_v23  ;;  %vm5209_vm1 = vnez %v5122_v36  ;;  %v764_v41 = vadd.s32 640, %v3320_v54  ;;  %v204_v6 = vsub.s32 4, %v3320_v54 }
 0x245   :  { %v5203_v59 = vsel %vm4531_vm11, 4294967295, %v5202_v59  ;;  %vm4539_vm8 = vmand %vm5205_vm6, %vm5204_vm9  ;;  %2877 = vmatpush3.msk.msra.mxu0 %vm5208_vm3, %v3095_v0  ;;  %2915 = vmatpush3.msk.msra.mxu1 %vm5209_vm1, %v3095_v0  ;;  %vm5210_vm11 = vcmp.lt.s32.totalorder %v767_v44, %v3324_v56  ;;  %vm5211_vm6 = vcmp.ge.s32.totalorder %v767_v44, %v3322_v55  ;;  %vm5214_vm3 = vnez %v5128_v12 }
 0x246   :  { %v5207_v61 = vsel %vm4539_vm8, 4294967295, %v5206_v61  ;;  %vm4556_vm9 = vmand %vm5211_vm6, %vm5210_vm11  ;;  %2878 = vmatprep.subr.msk.mxu0 %vm5214_vm3, %v3095_v0  ;;  %vm5215_vm1 = vnez %v5132_v13  ;;  %vm5216_vm8 = vcmp.lt.s32.totalorder %v799_v45, %v3324_v56  ;;  %vm5217_vm11 = vcmp.ge.s32.totalorder %v799_v45, %v3322_v55  ;;  %v1949_v13 = vld [vmem:[%s5011_s12 + $0x18] sm:$0xff] }
 0x247   :  { %v5213_v11 = vsel %vm4556_vm9, 4294967295, %v5212_v11  ;;  %2916 = vmatprep.subr.msk.mxu1 %vm5215_vm1, %v3095_v0  ;;  %vm4573_vm6 = vmand %vm5217_vm11, %vm5216_vm8  ;;  %vm5220_vm3 = vnez %v5136_v18  ;;  %vm5221_vm1 = vnez %v5140_v34  ;;  %vm5222_vm9 = vcmp.lt.s32.totalorder %v751_v42, %v3324_v56  ;;  %v2031_v18 = vld [vmem:[%s5010_s13 + $0x8] sm:$0xff] }
 0x248   :  { %v5219_v63 = vsel %vm4573_vm6, 4294967295, %v5218_v63  ;;  %2879 = vmatpush3.msk.msra.mxu0 %vm5220_vm3, %v3095_v0  ;;  %2917 = vmatpush3.msk.msra.mxu1 %vm5221_vm1, %v3095_v0  ;;  %vm5223_vm8 = vcmp.ge.s32.totalorder %v751_v42, %v3322_v55  ;;  %vm5226_vm3 = vnez %v5146_v35  ;;  %vm5227_vm1 = vnez %v5150_v9 }
 0x249   :  { %vm4590_vm11 = vmand %vm5223_vm8, %vm5222_vm9  ;;  %2880 = vmatprep.subr.msk.mxu0 %vm5226_vm3, %v3095_v0  ;;  %2918 = vmatprep.subr.msk.mxu1 %vm5227_vm1, %v3095_v0  ;;  %vm5228_vm6 = vcmp.lt.s32.totalorder %v783_v28, %v3324_v56  ;;  %vm5229_vm9 = vcmp.ge.s32.totalorder %v783_v28, %v3322_v55  ;;  %vm5232_vm3 = vnez %v5158_v48  ;;  %vm5233_vm1 = vcmp.lt.s32.totalorder %v766_v5, %v3324_v56 }
 0x24a   :  { %vm4607_vm8 = vmand %vm5229_vm9, %vm5228_vm6  ;;  %2881 = vmatpush3.msk.msra.mxu0 %vm4367_vm10, %v3095_v0  ;;  %2919 = vmatpush3.msk.msra.mxu1 %vm5232_vm3, %v3095_v0  ;;  %vm5234_vm6 = vcmp.ge.s32.totalorder %v766_v5, %v3322_v55  ;;  %vm5237_vm10 = vnez %v5163_v50  ;;  %vm5238_vm3 = vnez %v5167_v33  ;;  %vm1056_vm15 = vcmp.lt.s32.totalorder %v797_v20, %v3324_v56  ;;  %v1843_v50 = vld [vmem:[%s5008_s8] sm:$0xff] }
 0x24b   :  { %v5231_v2 = vsel %vm4607_vm8, 4294967295, %v5230_v2  ;;  %vm4624_vm9 = vmand %vm5234_vm6, %vm5233_vm1  ;;  %2882 = vmatprep.subr.msk.mxu0 %vm5237_vm10, %v3095_v0  ;;  %2920 = vmatprep.subr.msk.mxu1 %vm5238_vm3, %v3095_v0  ;;  %vm5239_vm8 = vcmp.lt.s32.totalorder %v798_v58, %v3324_v56  ;;  %vm5240_vm1 = vcmp.ge.s32.totalorder %v798_v58, %v3322_v55  ;;  %vm5243_vm10 = vnez %v5175_v39 }
 0x24c   :  { %vm4641_vm6 = vmand %vm5240_vm1, %vm5239_vm8  ;;  %2883 = vmatpush3.msk.msra.mxu0 %vm4424_vm0, %v3095_v0  ;;  %2921 = vmatpush3.msk.msra.mxu1 %vm5243_vm10, %v3095_v0  ;;  %vm5244_vm8 = vcmp.lt.s32.totalorder %v750_v10, %v3324_v56  ;;  %vm5245_vm3 = vcmp.ge.s32.totalorder %v750_v10, %v3322_v55  ;;  %v796_v23 = vadd.s32 896, %v3320_v54  ;;  %v212_v36 = vsub.s32 6, %v3320_v54 }
 0x24d   :  { %vm4659_vm1 = vmand %vm5245_vm3, %vm5244_vm8  ;;  %2884 = vmatprep.subr.msk.mxu0 %vm4451_vm12, %v3095_v0  ;;  %2922 = vmatprep.subr.msk.mxu1 %vm4461_vm5, %v3095_v0  ;;  %vm5248_vm0 = vcmp.lt.s32.totalorder %v782_v14, %v3324_v56  ;;  %vm5249_vm10 = vcmp.ge.s32.totalorder %v782_v14, %v3322_v55  ;;  %vm1008_vm7 = vcmp.lt.s32.totalorder %v749_v3, %v3324_v56  ;;  %v748_v12 = vadd.s32 512, %v3320_v54 }
 0x24e   :  { %vm4677_vm8 = vmand %vm5249_vm10, %vm5248_vm0  ;;  %2885 = vmatpush3.msk.msra.mxu0 %vm4481_vm14, %v3095_v0  ;;  %2923 = vmatpush3.msk.msra.mxu1 %vm4489_vm13, %v3095_v0  ;;  %vm5252_vm5 = vcmp.lt.s32.totalorder %v765_v16, %v3324_v56  ;;  %vm5253_vm12 = vcmp.ge.s32.totalorder %v765_v16, %v3322_v55  ;;  %vm910_vm10 = vcmp.ge.s32.totalorder %v781_v25, %v3322_v55  ;;  %v780_v17 = vadd.s32 768, %v3320_v54 }
 0x24f   :  { %vm4694_vm0 = vmand %vm5253_vm12, %vm5252_vm5  ;;  %vm1040_vm3 = vcmp.lt.s32.totalorder %v781_v25, %v3324_v56  ;;  %2886 = vmatprep.subr.msk.mxu0 %vm4506_vm2, %v3095_v0  ;;  %2924 = vmatprep.subr.msk.mxu1 %vm4514_vm4, %v3095_v0  ;;  %vm5256_vm13 = vcmp.ge.s32.totalorder %v797_v20, %v3322_v55  ;;  %v205_v34 = vrot.slane %v3632_v15, %v204_v6  ;;  %v5266_v9 = vmov 0 }
 0x250   :  { %vm4711_vm14 = vmand %vm5256_vm13, %vm1056_vm15  ;;  %vm5259_vm2 = vnez %v5203_v59  ;;  %vm5260_vm4 = vnez %v5207_v61  ;;  %vm5261_vm15 = vcmp.ge.s32.totalorder %v749_v3, %v3322_v55  ;;  %v213_v35 = vrot.slane %v3632_v15, %v212_v36  ;;  %v2761_v15 = vld [vmem:[%s5010_s13 + $0x30] sm:$0xff] }
 0x251   :  { %2887 = vmatpush3.msk.msra.mxu0 %vm5259_vm2, %v3095_v0  ;;  %2925 = vmatpush3.msk.msra.mxu1 %vm5260_vm4, %v3095_v0  ;;  %vm4728_vm13 = vmand %vm5261_vm15, %vm1008_vm7  ;;  %vm5264_vm2 = vnez %v5213_v11  ;;  %vm5265_vm4 = vnez %v5219_v63  ;;  %vm877_vm15 = vcmp.ge.s32.totalorder %v748_v12, %v3322_v55  ;;  %vm1007_vm5 = vcmp.lt.s32.totalorder %v748_v12, %v3324_v56 }
 0x252   :  { %2888 = vmatprep.subr.msk.mxu0 %vm5264_vm2, %v3095_v0  ;;  %2926 = vmatprep.subr.msk.mxu1 %vm5265_vm4, %v3095_v0  ;;  %vm4745_vm7 = vmand %vm910_vm10, %vm1040_vm3  ;;  %vm5268_vm2 = vnez %v5231_v2  ;;  %vm5269_vm4 = vcmp.lt.s32.totalorder %v764_v41, %v3324_v56  ;;  %vm5270_vm12 = vcmp.ge.s32.totalorder %v764_v41, %v3322_v55  ;;  %vm909_vm10 = vcmp.ge.s32.totalorder %v780_v17, %v3322_v55 }
 0x253   :  { %v5267_v9 = vsel %vm4745_vm7, 4294967295, %v5266_v9  ;;  %2889 = vmatpush3.msk.msra.mxu0 %vm4590_vm11, %v3095_v0  ;;  %2927 = vmatpush3.msk.msra.mxu1 %vm5268_vm2, %v3095_v0  ;;  %vm4761_vm3 = vmand %vm5270_vm12, %vm5269_vm4  ;;  %vm1039_vm7 = vcmp.lt.s32.totalorder %v780_v17, %v3324_v56  ;;  %vm5273_vm11 = vcmp.lt.s32.totalorder %v796_v23, %v3324_v56  ;;  %vm5274_vm12 = vcmp.ge.s32.totalorder %v796_v23, %v3322_v55  ;;  %v2032_v17 = vld [vmem:[%s5010_s13 + $0x10] sm:$0xff] }
 0x254   :  { %2890 = vmatprep.subr.msk.mxu0 %vm4624_vm9, %v3095_v0  ;;  %2928 = vmatprep.subr.msk.mxu1 %vm4641_vm6, %v3095_v0  ;;  %vm1183_vm2 = vmand %vm5274_vm12, %vm5273_vm11  ;;  %v454_v43 = vadd.f32 %v3556_v60, %v205_v34  ;;  %v531_v46 = vadd.f32 %v3642_v26, %v213_v35  ;;  %v462_v55 = vadd.f32 %v3584_v4, %v3650_v29 }
 0x255   :  { %2891 = vmatpush3.msk.msra.mxu0 %vm4659_vm1, %v3095_v0  ;;  %2929 = vmatpush3.msk.msra.mxu1 %vm4677_vm8, %v3095_v0  ;;  %vm1135_vm4 = vmand %vm877_vm15, %vm1007_vm5  ;;  %v539_v56 = vadd.f32 %v538_v38, %v3653_v30  ;;  %vm5275_vm6 = vnez %v5267_v9  ;;  %v460_v30 = vadd.f32 %v3574_v62, %v205_v34  ;;  %v537_v48 = vadd.f32 %v536_v24, %v213_v35  ;;  %v1845_v62 = vld [vmem:[%s5008_s8 + $0x10] sm:$0xff]  ;;  %v1947_v34 = vld [vmem:[%s5011_s12 + $0x8] sm:$0xff] }
 0x256   :  { %2892 = vmatprep.subr.msk.mxu0 %vm4694_vm0, %v3095_v0  ;;  %2930 = vmatprep.subr.msk.mxu1 %vm4711_vm14, %v3095_v0  ;;  %vm1167_vm9 = vmand %vm909_vm10, %vm1039_vm7  ;;  %v671_v60 = vmul.f32 %v3999_v47, %v454_v43  ;;  %v673_v4 = vmul.f32 %v3999_v47, %v531_v46  ;;  %v680_v26 = vmul.f32 %v4169_v1, %v462_v55  ;;  %v1844_v47 = vld [vmem:[%s5008_s8 + $0x8] sm:$0xff]  ;;  %vm3099_vm8 = vmmov 0   ;;  %v1948_v24 = vld [vmem:[%s5011_s12 + $0x10] sm:$0xff] }
 0x257   :  { %2893 = vmatpush3.msk.msra.mxu0 %vm4728_vm13, %v3095_v0  ;;  %2931 = vmatpush3.msk.msra.mxu1 %vm5275_vm6, %v3095_v0  ;;  %v682_v29 = vmul.f32 %v4169_v1, %v539_v56  ;;  %v679_v44 = vmul.f32 %v4169_v1, %v460_v30  ;;  %v681_v49 = vmul.f32 %v4169_v1, %v537_v48  ;;  %v2741_v1 = vld [vmem:[%s5009_s3] ss:$0 sm:$0xff]  ;;  %vm1763_vm0 = vcmask 130048   ;;  %v2762_v9 = vld [vmem:[%s5010_s13 + $0x38] sm:$0xff]  ;;  %v2760_v38 = vld [vmem:[%s5010_s13 + $0x28] sm:$0xff] }
 0x258   :  { %2894 = vmatprep.subr.msk.mxu0 %vm4761_vm3, %v3095_v0  ;;  %2932 = vmatprep.subr.msk.mxu1 %vm1183_vm2, %v3095_v0  ;;  %vm1760_vm1 = vcmp.eq.s32.totalorder %v3320_v54, %v2741_v1  ;;  %v4844_v54 = vld [vmem:[%s5006_s0] sm:$0xff]  ;;  %vm5276_vm14 = vcmask 261120   ;;  %v2776_v46 = vld [vmem:[%s5010_s13 + $0x58] sm:$0xff]  ;;  %v2775_v55 = vld [vmem:[%s5010_s13 + $0x50] sm:$0xff] }
 0x259   :  { %2895 = vmatpush3.msk.msra.mxu0 %vm1135_vm4, %v3095_v0  ;;  %2933 = vmatpush3.msk.msra.mxu1 %vm1167_vm9, %v3095_v0  ;;  %v1846_v0 = vld [vmem:[%s5008_s8 + $0x18] sm:$0xff]  ;;  %v2742_v33 = vsel %vm1760_vm1, 1.0, %v3094_v22  ;;  %v1946_v35 = vld [vmem:[%s5011_s12] sm:$0xff]  ;;  %vm5277_vm5 = vmmov %vm5276_vm14 }
 0x25a   :  { %1670 = vmatmul.mubr.f32.vlgmr.msra.gmra.mxu0 %v671_v60  ;;  %1745 = vmatmul.mubr.f32.vlgmr.msra.gmra.mxu1 %v673_v4  ;;  %v1764_v45 = vsel %vm1763_vm0, %v2742_v33, 0.0  ;;  %v2759_v43 = vld [vmem:[%s5010_s13 + $0x20] sm:$0xff]  ;;  %vm5278_vm13 = vmmov %vm5277_vm5  ;;  %v2774_v56 = vld [vmem:[%s5010_s13 + $0x48] sm:$0xff] }
 0x25b   :  { %1674 = vmatprep.mubr.f32.mxu0 %v680_v26  ;;  %1749 = vmatprep.mubr.f32.mxu1 %v682_v29  ;;  %v2773_v60 = vld [vmem:[%s5010_s13 + $0x40] sm:$0xff]  ;;  %vm5279_vm7 = vmmov %vm5277_vm5 }
 0x25c   :  { %2995 = vmatprep.subr.mxu1 %v3094_v22  ;;  %2988 = vmatprep.subr.mxu0 %v3094_v22  ;;  %v2747_v1 = vld [vmem:[%s5014_s11] ss:$0 sm:$0xff]  ;;  %vm5280_vm15 = vmmov %vm5277_vm5 }
 0x25d   :  { %2996 = vmatpush3.msra.mxu1 %v1846_v0  ;;  %1765 = vadd.xlane.f32.xlu0 %v1764_v45  ;;  %vm5281_vm3 = vmmov %vm5277_vm5 }
 0x25e   :  { %1675 = vmatmul.mubr.f32.gmra.mxu0 %v679_v44  ;;  %1750 = vmatmul.mubr.f32.gmra.mxu1 %v681_v49  ;;  %v2745_v44 = vld [vmem:[%s5012_s9] ss:$0 sm:$0xff]  ;;  %vm5282_vm10 = vmmov %vm5281_vm3 }
 0x25f   :  { %2997 = vmatprep.subr.mxu1 %v3094_v22  ;;  %2992 = vmatprep.mubr.msk.f32.mxu0 %vm3099_vm8, %v3094_v22  ;;  %vm5283_vm11 = vmmov %vm5281_vm3 }
 0x260   :  { %2998 = vmatpush3.msra.mxu1 %v1845_v62  ;;  %3003 = vmatprep.mubr.msk.f32.mxu1 %vm3099_vm8, %v3094_v22  ;;  %v2746_v62 = vld [vmem:[%s5013_s10] ss:$0 sm:$0xff] }
 0x261   :  { %2999 = vmatprep.subr.mxu1 %v3094_v22 }
 0x262   :  { %3000 = vmatpush3.msra.mxu1 %v1844_v47 }
 0x263   :  { %3001 = vmatprep.subr.mxu1 %v3094_v22 }
 0x264   :  { %3002 = vmatpush3.msra.mxu1 %v1843_v50 }
 0x265   :  { %3017 = vmatprep.subr.mxu1 %v3094_v22  ;;  %3004 = vmatmul.mubr.msk.f32.vlgmr.msra.gmra.mxu1 %vm5276_vm14, %v4844_v54 }
 0x266   :  { %3025 = vmatprep.mubr.msk.f32.mxu1 %vm3099_vm8, %v3094_v22  ;;  %3018 = vmatpush3.msra.mxu1 %v2033_v37 }
 0x267   :  { %3019 = vmatprep.subr.mxu1 %v3094_v22 }
 0x268   :  { %3020 = vmatpush3.msra.mxu1 %v2032_v17  ;;  %v2778_v17 = vld [vmem:[%s5015_s15 + $0x2] ss:$0 sm:$0xff] }
 0x269   :  { %3021 = vmatprep.subr.mxu1 %v3094_v22 }
 0x26a   :  { %3022 = vmatpush3.msra.mxu1 %v2031_v18 }
 0x26b   :  { %3023 = vmatprep.subr.mxu1 %v3094_v22 }
 0x26c   :  { %3024 = vmatpush3.msra.mxu1 %v2030_v21 }
 0x26d   :  { %3039 = vmatprep.subr.mxu1 %v3094_v22  ;;  %3026 = vmatmul.mubr.msk.f32.vlgmr.msra.gmra.mxu1 %vm5277_vm5, %v4844_v54 }
 0x26e   :  { %3047 = vmatprep.mubr.msk.f32.mxu1 %vm3099_vm8, %v3094_v22  ;;  %3040 = vmatpush3.msra.mxu1 %v2762_v9 }
 0x26f   :  { %3041 = vmatprep.subr.mxu1 %v3094_v22 }
 0x270   :  { %3042 = vmatpush3.msra.mxu1 %v2761_v15 }
 0x271   :  { %3043 = vmatprep.subr.mxu1 %v3094_v22 }
 0x272   :  { %3044 = vmatpush3.msra.mxu1 %v2760_v38 }
 0x273   :  { %3045 = vmatprep.subr.mxu1 %v3094_v22 }
 0x274   :  { %3046 = vmatpush3.msra.mxu1 %v2759_v43 }
 0x275   :  { %3048 = vmatmul.mubr.msk.f32.vlgmr.msra.gmra.mxu1 %vm5278_vm13, %v4844_v54  ;;  %3061 = vmatprep.subr.mxu1 %v3094_v22 }
 0x276   :  { %3069 = vmatprep.mubr.msk.f32.mxu1 %vm3099_vm8, %v3094_v22  ;;  %3062 = vmatpush3.msra.mxu1 %v2776_v46 }
 0x277   :  { %3063 = vmatprep.subr.mxu1 %v3094_v22 }
 0x278   :  { %3064 = vmatpush3.msra.mxu1 %v2775_v55 }
 0x279   :  { %3065 = vmatprep.subr.mxu1 %v3094_v22 }
 0x27a   :  { %3066 = vmatpush3.msra.mxu1 %v2774_v56 }
 0x27b   :  { %3067 = vmatprep.subr.mxu1 %v3094_v22 }
 0x27c   :  { %3068 = vmatpush3.msra.mxu1 %v2773_v60 }
 0x27d   :  { %3070 = vmatmul.mubr.msk.f32.vlgmr.msra.gmra.mxu1 %vm5279_vm7, %v4844_v54 }
 0x2e4   :  { %v2820_v8 = vpop.f32.mrf.mxu0  ;;  %v2858_v39 = vpop.f32.mrf.mxu1 }
 0x2e6   :  { %v2821_v42 = vpop.f32.mrf.mxu0  ;;  %v2859_v31 = vpop.f32.mrf.mxu1 }
 0x2e7   :  { %v2822_v59 = vadd.f32 %v2821_v42, %v2820_v8  ;;  %v2860_v61 = vadd.f32 %v2859_v31, %v2858_v39  ;;  %v1766_v4 = vpop.xlane.xlu0 %1765  ;;  %v2755_v8 = vld [vmem:[%s5011_s12 + $0x38] sm:$0xff]  ;;  %v2754_v39 = vld [vmem:[%s5011_s12 + $0x30] sm:$0xff]  ;;  %v2753_v42 = vld [vmem:[%s5011_s12 + $0x28] sm:$0xff] }
 0x2e8   :  { %v1767_v26 = vmax.f32 %v1766_v4, 1.0  ;;  %v2752_v31 = vld [vmem:[%s5011_s12 + $0x20] sm:$0xff] }
 0x2e9   :  { %v1597_v2 = vadd.f32 %v2860_v61, %v2822_v59 }
 0x2ea   :  { %3080 = vrcp.f32 %v1767_v26 }
 0x2ef   :  { %v2823_v27 = vpop.f32.mrf.mxu0  ;;  %v2861_v28 = vpop.f32.mrf.mxu1 }
 0x2f1   :  { %v2824_v32 = vpop.f32.mrf.mxu0  ;;  %v2862_v52 = vpop.f32.mrf.mxu1 }
 0x2f2   :  { %v2825_v10 = vadd.f32 %v2824_v32, %v2823_v27  ;;  %v2863_v11 = vadd.f32 %v2862_v52, %v2861_v28  ;;  %v2769_v27 = vld [vmem:[%s5011_s12 + $0x58] sm:$0xff]  ;;  %v2768_v28 = vld [vmem:[%s5011_s12 + $0x50] sm:$0xff]  ;;  %v2767_v32 = vld [vmem:[%s5011_s12 + $0x48] sm:$0xff] }
 0x2f3   :  { %v2766_v52 = vld [vmem:[%s5011_s12 + $0x40] sm:$0xff] }
 0x2f4   :  { %v1602_v3 = vadd.f32 %v2863_v11, %v2825_v10  ;;  %v2750_v10 = vld [vmem:[%s5015_s15] ss:$0 sm:$0xff] }
 0x2f5   :  { %v2748_v11 = vld [vmem:[%s5016_s14] ss:$0 sm:$0xff] }
 0x2f7   :  { %v3081_v29 = vpop.eup %3080 }
 0x31a   :  { %v2896_v5 = vpop.f32.mrf.mxu0  ;;  %v2934_v53 = vpop.f32.mrf.mxu1 }
 0x31c   :  { %v2897_v57 = vpop.f32.mrf.mxu0  ;;  %v2935_v58 = vpop.f32.mrf.mxu1 }
 0x31d   :  { %v2898_v16 = vadd.f32 %v2897_v57, %v2896_v5  ;;  %v2936_v6 = vadd.f32 %v2935_v58, %v2934_v53 }
 0x31e   :  { %v2899_v14 = vpop.f32.mrf.mxu0  ;;  %v2937_v63 = vpop.f32.mrf.mxu1 }
 0x31f   :  { %v1672_v25 = vadd.f32 %v2898_v16, %v1597_v2 }
 0x320   :  { %v2900_v19 = vpop.f32.mrf.mxu0  ;;  %v2938_v20 = vpop.f32.mrf.mxu1 }
 0x321   :  { %v2901_v51 = vadd.f32 %v2900_v19, %v2899_v14  ;;  %v2939_v41 = vadd.f32 %v2938_v20, %v2937_v63  ;;  %v1747_v23 = vadd.f32 %v2936_v6, %v1672_v25  ;;  %v2764_v20 = vld [vmem:[%s5015_s15 + $0x1] ss:$0 sm:$0xff] }
 0x323   :  { %v1677_v40 = vadd.f32 %v2901_v51, %v1602_v3  ;;  %v2757_v3 = vld [vmem:[%s5016_s14 + $0x1] ss:$0 sm:$0xff] }
 0x325   :  { %v1752_v7 = vadd.f32 %v2939_v41, %v1677_v40  ;;  %v4855_v36 = vpop.f32.mrf.mxu1 }
 0x327   :  { %2989 = vmatpush3.msra.mxu0 %v1752_v7  ;;  %v3005_v12 = vpop.f32.mrf.mxu1 }
 0x328   :  { %2990 = vmatprep.subr.mxu0 %v3094_v22 }
 0x329   :  { %2991 = vmatpush3.msra.mxu0 %v1747_v23 }
 0x32a   :  { %2993 = vmatmul.mubr.msk.f32.vlgmr.msra.gmra.mxu0 %vm1763_vm0, %v2742_v33  ;;  %3006 = vmatprep.subr.mxu0 %v3094_v22 }
 0x32b   :  { %3014 = vmatprep.mubr.msk.f32.mxu0 %vm3099_vm8, %v3094_v22  ;;  %3007 = vmatpush3.msra.mxu0 %v1949_v13 }
 0x32c   :  { %3008 = vmatprep.subr.mxu0 %v3094_v22 }
 0x32d   :  { %3009 = vmatpush3.msra.mxu0 %v1948_v24  ;;  %v2107_v5 = vpop.f32.mrf.mxu1 }
 0x32e   :  { %3010 = vmatprep.subr.mxu0 %v3094_v22  ;;  %v2108_v14 = vadd.f32 %v2750_v10, %v2107_v5 }
 0x32f   :  { %3011 = vmatpush3.msra.mxu0 %v1947_v34  ;;  %v3027_v53 = vpop.f32.mrf.mxu1  ;;  %v2771_v34 = vld [vmem:[%s5016_s14 + $0x2] ss:$0 sm:$0xff] }
 0x330   :  { %3012 = vmatprep.subr.mxu0 %v3094_v22 }
 0x331   :  { %3013 = vmatpush3.msra.mxu0 %v1946_v35 }
 0x332   :  { %3028 = vmatprep.subr.mxu0 %v3094_v22 }
 0x335   :  { %v2273_v57 = vpop.f32.mrf.mxu1 }
 0x336   :  { %v2274_v51 = vadd.f32 %v2764_v20, %v2273_v57 }
 0x337   :  { %v3049_v58 = vpop.f32.mrf.mxu1 }
 0x33d   :  { %v2439_v59 = vpop.f32.mrf.mxu1 }
 0x33e   :  { %v2440_v18 = vadd.f32 %v2778_v17, %v2439_v59 }
 0x33f   :  { %v3071_v61 = vpop.f32.mrf.mxu1 }
 0x3ea   :  { %v1837_v30 = vpop.f32.mrf.mxu0 }
 0x3eb   :  { %v1842_v48 = vmul.f32 %v3081_v29, %v1837_v30 }
 0x3ec   :  { %v2994_v49 = vpop.f32.mrf.mxu0 }
 0x3ed   :  { %v1920_v0 = vadd.f32 %v4855_v36, %v1842_v48 }
 0x3ef   :  { %v1928_v47 = vadd.f32 %v2745_v44, %v1920_v0 }
 0x3f1   :  { %v1936_v50 = vmul.f32 %v2746_v62, %v1928_v47 }
 0x3f3   :  { %v1944_v33 = vadd.f32 %v2747_v1, %v1936_v50 }
 0x3f5   :  { %v1945_v45 = vmax.f32 %v1944_v33, 0.0 }
 0x3f7   :  { %3015 = vmatmul.mubr.msk.f32.vlgmr.msra.gmra.mxu0 %vm5280_vm15, %v1945_v45 }
 0x3f8   :  { %3029 = vmatpush3.msra.mxu0 %v2755_v8  ;;  %3036 = vmatprep.mubr.msk.f32.mxu0 %vm3099_vm8, %v3094_v22 }
 0x3f9   :  { %3030 = vmatprep.subr.mxu0 %v3094_v22 }
 0x3fa   :  { %3031 = vmatpush3.msra.mxu0 %v2754_v39 }
 0x3fb   :  { %3032 = vmatprep.subr.mxu0 %v3094_v22 }
 0x3fc   :  { %3033 = vmatpush3.msra.mxu0 %v2753_v42 }
 0x3fd   :  { %3034 = vmatprep.subr.mxu0 %v3094_v22 }
 0x3fe   :  { %3035 = vmatpush3.msra.mxu0 %v2752_v31 }
 0x3ff   :  { %3037 = vmatmul.mubr.msk.f32.vlgmr.msra.gmra.mxu0 %vm5281_vm3, %v1945_v45  ;;  %3050 = vmatprep.subr.mxu0 %v3094_v22 }
 0x400   :  { %3051 = vmatpush3.msra.mxu0 %v2769_v27  ;;  %3058 = vmatprep.mubr.msk.f32.mxu0 %vm3099_vm8, %v3094_v22 }
 0x401   :  { %3052 = vmatprep.subr.mxu0 %v3094_v22 }
 0x402   :  { %3053 = vmatpush3.msra.mxu0 %v2768_v28 }
 0x403   :  { %3054 = vmatprep.subr.mxu0 %v3094_v22 }
 0x404   :  { %3055 = vmatpush3.msra.mxu0 %v2767_v32 }
 0x405   :  { %3056 = vmatprep.subr.mxu0 %v3094_v22 }
 0x406   :  { %3057 = vmatpush3.msra.mxu0 %v2766_v52 }
 0x407   :  { %3059 = vmatmul.mubr.msk.f32.vlgmr.msra.gmra.mxu0 %vm5282_vm10, %v1945_v45 }
 0x4b7   :  { %v2026_v63 = vpop.f32.mrf.mxu0 }
 0x4b8   :  { %v2027_v22 = vadd.f32 %v2748_v11, %v2026_v63 }
 0x4b9   :  { %v3016_v16 = vpop.f32.mrf.mxu0 }
 0x4ba   :  { %v2443_v19 = vadd.f32 %v2108_v14, %v2027_v22 }
 0x4bc   :  { %v2780_v2 = vmul.f32 -1.442695, %v2443_v19 }
 0x4be   :  { %3082 = vpow2.f32 %v2780_v2 }
 0x4bf   :  { %v2190_v25 = vpop.f32.mrf.mxu0 }
 0x4c0   :  { %v2191_v40 = vadd.f32 %v2757_v3, %v2190_v25 }
 0x4c1   :  { %v3038_v41 = vpop.f32.mrf.mxu0 }
 0x4c2   :  { %v2450_v6 = vadd.f32 %v2274_v51, %v2191_v40 }
 0x4c4   :  { %v2781_v7 = vmul.f32 -1.442695, %v2450_v6 }
 0x4c6   :  { %3084 = vpow2.f32 %v2781_v7 }
 0x4c7   :  { %v2356_v23 = vpop.f32.mrf.mxu0 }
 0x4c8   :  { %v2357_v35 = vadd.f32 %v2771_v34, %v2356_v23 }
 0x4c9   :  { %v3060_v36 = vpop.f32.mrf.mxu0 }
 0x4cb   :  { %v3083_v37 = vpop.eup %3082 }
 0x4cc   :  { %v2447_v12 = vadd.f32 1.0, %v3083_v37 }
 0x4ce   :  { %3086 = vrcp.f32 %v2447_v12 }
 0x4d3   :  { %v3085_v13 = vpop.eup %3084 }
 0x4d4   :  { %v2454_v24 = vadd.f32 1.0, %v3085_v13 }
 0x4d6   :  { %3088 = vrcp.f32 %v2454_v24 }
 0x4db   :  { %v3087_v21 = vpop.eup %3086 }
 0x4dc   :  { %v2457_v9 = vmul.f32 %v3087_v21, %v2440_v18 }
 0x4de   :  { %v2458_v15 = vadd.f32 %v2457_v9, %v2357_v35 }
 0x4e0   :  { %3090 = vtanh.f32 %v2458_v15 }
 0x4e3   :  { %v3089_v38 = vpop.eup %3088 }
 0x4e4   :  { %v2460_v43 = vsub.f32 1.0, %v3089_v38  ;;  %v2462_v55 = vmul.f32 %v4844_v54, %v3089_v38 }
 0x4ed   :  { %v3091_v46 = vpop.eup %3090 }
 0x4ee   :  { %v2461_v56 = vmul.f32 %v3091_v46, %v2460_v43 }
 0x4f0   :  { %v2463_v60 = vadd.f32 %v2462_v55, %v2461_v56 }
 0x4f2   :  { %2464 = vst.msk [vmem:[%s5017_s16] sm:$0xff] %vm5283_vm11, %v2463_v60 }

</bundles_post_ra>
